<compile_context>
chip_gen: v5e
topology: v5e:2x2
jax: 0.10.0
libtpu: 0.0.40
codegen_flags: <defaults>
</compile_context>

<pallas_src>
import jax
import jax.numpy as jnp
from jax.experimental import pallas as pl
from jax.experimental.pallas import tpu as pltpu


def _round_up(n: int, m: int) -> int:
    return (n + m - 1) // m * m


# ---------------------------------------------------------------------------
# Fused kernel:  scores = (x @ W0 + b0) @ W1 + b1    (one VMEM-resident tile)
# ---------------------------------------------------------------------------
def _encoder_kernel(x_ref, w0_ref, b0_ref, w1_ref, b1_ref, o_ref):
    # Cast the f32 activation tile to bf16 in-register (avoids a wrapper-side
    # pad/cast round trip through HBM); accumulate on the MXU in f32.
    x = x_ref[...].astype(jnp.bfloat16)
    feat = jnp.dot(x, w0_ref[...], preferred_element_type=jnp.float32)
    feat = feat + b0_ref[...]
    # Intentional mixed precision: feat is rounded to bf16 for the second MXU
    # pass (f32 accumulate).  The second GEMM is <13% of total FLOPs and the
    # extra quantization stays well inside bf16-level tolerance.
    scores = jnp.dot(feat.astype(jnp.bfloat16), w1_ref[...],
                     preferred_element_type=jnp.float32)
    o_ref[...] = (scores + b1_ref[...]).astype(o_ref.dtype)


def _choose_tm(batch: int, tm_max: int) -> int:
    """Sublane-aligned M tile; aims for >= 2 grid steps (v7x has 2 TCs)."""
    m8 = _round_up(max(batch, 1), 8)
    if m8 <= 8:
        return 8
    return min(tm_max, _round_up(pl.cdiv(m8, 2), 8))


def only_time_encoder_forward(x, w0, b0, w1, b1, out_features, *, tm_max=512):
    """Fused forward.  x: (B, C, H, W) f32 -> scores: (B, out_features) f32.

    w0: (Din, 1024) bf16      -- pretrained-time-model weight (pre-cast)
    b0: (1, 1024)   f32
    w1: (1024, 128) bf16      -- fc01 weight, zero-padded 40 -> 128 lanes
    b1: (1, 128)    f32       -- fc01 bias,  zero-padded 40 -> 128 lanes
    """
    B = x.shape[0]
    x_flat = x.reshape(B, -1)                      # glue: reshape only
    Din = x_flat.shape[1]
    Dhid = w0.shape[1]                             # 1024
    N_pad = w1.shape[1]                            # 128

    tm = _choose_tm(B, tm_max)
    grid = (pl.cdiv(B, tm),)                       # ragged last block is fine:
    # rows past B in the last block are unspecified, rows never mix in a GEMM,
    # and the output array only has B rows so they are never written back.

    flops = 2 * B * (Din * Dhid + Dhid * N_pad)
    bytes_accessed = (x_flat.size * 4 + w0.size * 2 + b0.size * 4
                      + w1.size * 2 + b1.size * 4 + B * N_pad * 4)

    # TODO(synk): for much larger in_features (Din >~ 3K on v5e, >~ 4-8K on
    # v7x's 64 MiB VMEM) add a trailing "arbitrary" K grid axis with an f32
    # VMEM accumulator and single-buffer the constant weight blocks
    # (pipeline_mode=pl.Buffered(1)); at Din=Dhid=1024 the resident bf16
    # weights (~2.25 MiB) fit every generation under the limit below.
    # TODO(synk): when this layer runs repeatedly at small B inside a larger
    # model, hide the weight fetch with a cross-pallas_call DMA prefetch.
    out = pl.pallas_call(
        _encoder_kernel,
        out_shape=jax.ShapeDtypeStruct((B, N_pad), jnp.float32),
        grid=grid,
        in_specs=[
            pl.BlockSpec((tm, Din), lambda i: (i, 0)),      # x tile (f32)
            pl.BlockSpec((Din, Dhid), lambda i: (0, 0)),    # W0 (resident)
            pl.BlockSpec((1, Dhid), lambda i: (0, 0)),      # b0
            pl.BlockSpec((Dhid, N_pad), lambda i: (0, 0)),  # W1 (resident)
            pl.BlockSpec((1, N_pad), lambda i: (0, 0)),     # b1
        ],
        out_specs=pl.BlockSpec((tm, N_pad), lambda i: (i, 0)),
        compiler_params=pltpu.CompilerParams(
            dimension_semantics=("parallel",),
            vmem_limit_bytes=48 * 1024 * 1024,
        ),
        cost_estimate=pl.CostEstimate(
            flops=flops, transcendentals=0, bytes_accessed=bytes_accessed),
    )(x_flat, w0, b0, w1, b1)

    return out[:, :out_features]


# ---------------------------------------------------------------------------
# OnlyTimeEncoder
# ---------------------------------------------------------------------------
class OnlyTimeEncoderPallas:
    """Pallas re-implementation of OnlyTimeEncoder.forward.

    All weight casting / padding is done ONCE at construction time (hoisted
    out of the forward path): bf16 copies of both matmul weights and the fc01
    weight/bias zero-padded 40 -> 128 so the kernel's stores are lane-dense.
    """

    HIDDEN = 1024
    OUT = 40
    OUT_PAD = 128

    def __init__(self, key, in_features):
        k1, k2, k3, k4 = jax.random.split(key, 4)
        # TODO(synk): the architecture of `pretrained_model_time` is not
        # specified in the reference code; a deterministic synthetic stand-in
        # (flatten + Linear(in_features, 1024)) produces the 1024-d
        # time_feature that fc01 expects.  Its nocliptune / linear_proba flags
        # are configuration-only and have no forward-pass compute.
        self.pre_w = (jax.random.normal(k1, (in_features, self.HIDDEN), jnp.float32)
                      * (1.0 / jnp.sqrt(in_features)))
        self.pre_b = jax.random.normal(k2, (self.HIDDEN,), jnp.float32) * 0.01
        # fc01 = nn.Linear(1024, 40); stored transposed as (1024, 40).
        self.fc01_w = (jax.random.normal(k3, (self.HIDDEN, self.OUT), jnp.float32)
                       * (1.0 / jnp.sqrt(float(self.HIDDEN))))
        self.fc01_b = jax.random.normal(k4, (self.OUT,), jnp.float32) * 0.01

        # ---- one-time kernel-ready buffers (hoisted out of forward) --------
        self._w0 = self.pre_w.astype(jnp.bfloat16)                   # (Din, 1024)
        self._b0 = self.pre_b.astype(jnp.float32).reshape(1, self.HIDDEN)
        self._w1 = (jnp.zeros((self.HIDDEN, self.OUT_PAD), jnp.bfloat16)
                    .at[:, :self.OUT].set(self.fc01_w.astype(jnp.bfloat16)))
        self._b1 = (jnp.zeros((1, self.OUT_PAD), jnp.float32)
                    .at[0, :self.OUT].set(self.fc01_b.astype(jnp.float32)))
        (self._w0, self._b0, self._w1, self._b1) = jax.block_until_ready(
            (self._w0, self._b0, self._w1, self._b1))

    def __call__(self, x):
        return only_time_encoder_forward(
            x, self._w0, self._b0, self._w1, self._b1, self.OUT)


if __name__ == "__main__":
    key = jax.random.PRNGKey(0)
    kx, kp = jax.random.split(key)

    # Small example input consistent with an NCHW front end: 4*16*16 = 1024.
    B, C, H, W = 2, 4, 16, 16
    x = jax.random.normal(kx, (B, C, H, W), jnp.float32)

    enc = OnlyTimeEncoderPallas(kp, in_features=C * H * W)
    scores = enc(x)
    scores = jax.block_until_ready(scores)

    # Reference check in plain JAX (f32).  The kernel uses bf16 operands with
    # f32 accumulation, so allow bf16-level tolerance.
    feat_ref = x.reshape(B, -1) @ enc.pre_w + enc.pre_b
    scores_ref = feat_ref @ enc.fc01_w + enc.fc01_b
    assert scores.shape == (B, 40), scores.shape
    assert jnp.allclose(scores, scores_ref, atol=5e-2, rtol=5e-2)

    print("KERNEL_OK")
</pallas_src>

<mosaic_0001>
module attributes {stable_mosaic.version = 11 : i64} {
  func.func @_encoder_kernel(%arg0: i32, %arg1: memref<8x1024xf32, #tpu.memory_space<vmem>>, %arg2: memref<1024x1024xbf16, #tpu.memory_space<vmem>>, %arg3: memref<1x1024xf32, #tpu.memory_space<vmem>>, %arg4: memref<1024x128xbf16, #tpu.memory_space<vmem>>, %arg5: memref<1x128xf32, #tpu.memory_space<vmem>>, %arg6: memref<8x128xf32, #tpu.memory_space<vmem>>) attributes {dimension_semantics = [#tpu.dimension_semantics<parallel>], iteration_bounds = array<i64: 1>, scalar_prefetch = 0 : i64, scratch_operands = 0 : i64, tpu.core_type = #tpu.core_type<tc>, window_params = [{transform_indices = @transform_0, window_bounds = array<i64: 8, 1024>}, {pipeline_mode = #tpu.pipeline_mode<synchronous>, transform_indices = @transform_1, window_bounds = array<i64: 1024, 1024>}, {pipeline_mode = #tpu.pipeline_mode<synchronous>, transform_indices = @transform_2, window_bounds = array<i64: 1, 1024>}, {pipeline_mode = #tpu.pipeline_mode<synchronous>, transform_indices = @transform_3, window_bounds = array<i64: 1024, 128>}, {pipeline_mode = #tpu.pipeline_mode<synchronous>, transform_indices = @transform_4, window_bounds = array<i64: 1, 128>}, {transform_indices = @transform_5, window_bounds = array<i64: 8, 128>}]} {
    %c0 = arith.constant 0 : index
    %c0_0 = arith.constant 0 : index
    %0 = vector.load %arg1[%c0, %c0_0] : memref<8x1024xf32, #tpu.memory_space<vmem>>, vector<8x1024xf32>
    %1 = arith.truncf %0 : vector<8x1024xf32> to vector<8x1024xbf16>
    %c0_1 = arith.constant 0 : index
    %c0_2 = arith.constant 0 : index
    %2 = vector.load %arg2[%c0_1, %c0_2] : memref<1024x1024xbf16, #tpu.memory_space<vmem>>, vector<1024x1024xbf16>
    %cst = arith.constant dense<0.000000e+00> : vector<8x1024xf32>
    %3 = tpu.matmul %1, %2, %cst {dimension_numbers = #tpu.dot_dimension_numbers<[1], [0], [0], [1], [0, 0, 1, 1], [], []>} : vector<8x1024xbf16>, vector<1024x1024xbf16>, vector<8x1024xf32> -> vector<8x1024xf32>
    %c0_3 = arith.constant 0 : index
    %c0_4 = arith.constant 0 : index
    %4 = vector.load %arg3[%c0_3, %c0_4] : memref<1x1024xf32, #tpu.memory_space<vmem>>, vector<1x1024xf32>
    %5 = vector.broadcast %4 : vector<1x1024xf32> to vector<8x1024xf32>
    %6 = arith.addf %3, %5 : vector<8x1024xf32>
    %7 = arith.truncf %6 : vector<8x1024xf32> to vector<8x1024xbf16>
    %c0_5 = arith.constant 0 : index
    %c0_6 = arith.constant 0 : index
    %8 = vector.load %arg4[%c0_5, %c0_6] : memref<1024x128xbf16, #tpu.memory_space<vmem>>, vector<1024x128xbf16>
    %cst_7 = arith.constant dense<0.000000e+00> : vector<8x128xf32>
    %9 = tpu.matmul %7, %8, %cst_7 {dimension_numbers = #tpu.dot_dimension_numbers<[1], [0], [0], [1], [0, 0, 1, 1], [], []>} : vector<8x1024xbf16>, vector<1024x128xbf16>, vector<8x128xf32> -> vector<8x128xf32>
    %c0_8 = arith.constant 0 : index
    %c0_9 = arith.constant 0 : index
    %10 = vector.load %arg5[%c0_8, %c0_9] : memref<1x128xf32, #tpu.memory_space<vmem>>, vector<1x128xf32>
    %11 = vector.broadcast %10 : vector<1x128xf32> to vector<8x128xf32>
    %12 = arith.addf %9, %11 : vector<8x128xf32>
    %c0_10 = arith.constant 0 : index
    %c0_11 = arith.constant 0 : index
    %13 = vector.load %arg6[%c0_10, %c0_11] : memref<8x128xf32, #tpu.memory_space<vmem>>, vector<8x128xf32>
    tpu.vector_store %arg6[%c0_10, %c0_11], %12 {strides = array<i32>} : memref<8x128xf32, #tpu.memory_space<vmem>>, vector<8x128xf32>,
    return
  }
  func.func @transform_0(%arg0: i32) -> (i32, i32) {
    %c0_i32 = arith.constant 0 : i32
    %c0_i32_0 = arith.constant 0 : i32
    return %arg0, %c0_i32 : i32, i32
  }
  func.func @transform_1(%arg0: i32) -> (i32, i32) {
    %c0_i32 = arith.constant 0 : i32
    %c0_i32_0 = arith.constant 0 : i32
    %c0_i32_1 = arith.constant 0 : i32
    return %c0_i32, %c0_i32_0 : i32, i32
  }
  func.func @transform_2(%arg0: i32) -> (i32, i32) {
    %c0_i32 = arith.constant 0 : i32
    %c0_i32_0 = arith.constant 0 : i32
    %c0_i32_1 = arith.constant 0 : i32
    return %c0_i32, %c0_i32_0 : i32, i32
  }
  func.func @transform_3(%arg0: i32) -> (i32, i32) {
    %c0_i32 = arith.constant 0 : i32
    %c0_i32_0 = arith.constant 0 : i32
    %c0_i32_1 = arith.constant 0 : i32
    return %c0_i32, %c0_i32_0 : i32, i32
  }
  func.func @transform_4(%arg0: i32) -> (i32, i32) {
    %c0_i32 = arith.constant 0 : i32
    %c0_i32_0 = arith.constant 0 : i32
    %c0_i32_1 = arith.constant 0 : i32
    return %c0_i32, %c0_i32_0 : i32, i32
  }
  func.func @transform_5(%arg0: i32) -> (i32, i32) {
    %c0_i32 = arith.constant 0 : i32
    %c0_i32_0 = arith.constant 0 : i32
    return %arg0, %c0_i32 : i32, i32
  }
}

</mosaic_0001>

<bundles_post_ra>
// kernel: tpu_custom_call.1
= control target key start
LH: loop header
LB: loop body
LE: loop exit
PB: predicated region body
PF: predicated region fallthrough
CT: control target
= control target key end

     0   :  { %10 = vsyncpa [#allocation3], 0  ;;  %s7975_s0 = inlined_call_operand.hbm [shape: f32[2,1024], index: 0, kind: input, shape index: {}]   ;;  %s7976_s1 = inlined_call_operand.hbm [shape: bf16[1024,1024], index: 1, kind: input, shape index: {}]   ;;  %s7977_s2 = inlined_call_operand.hbm [shape: f32[1,1024], index: 2, kind: input, shape index: {}]   ;;  %s7978_s3 = inlined_call_operand.hbm [shape: bf16[1024,128], index: 3, kind: input, shape index: {}]   ;;  %s7979_s4 = inlined_call_operand.hbm [shape: f32[1,128], index: 4, kind: input, shape index: {}]   ;;  %s7980_s5 = inlined_call_operand.hbm [shape: f32[2,128], index: 5, kind: output, shape index: {}]  }
   0x1   :  { %11 = vsyncpa [#allocation6], 0 }
   0x2   :  { %12 = vsyncpa [#allocation9], 0 }
   0x3   :  { %13 = vsyncpa [#allocation4], 0  ;;  %s31_s20 = sshll.u32 %s7976_s1, 4  ;;  %s32_s20 = int_to_ptr.hbm [resolvable:$true] %s31_s20 }
   0x4   :  { %17 = vsyncadd [#allocation3], 768  ;;  %s7771_s21 = smov [#allocation5]   ;;  %s55_s25 = sshll.u32 %s7978_s3, 4  ;;  %s56_s25 = int_to_ptr.hbm [resolvable:$true] %s55_s25 }
   0x5   :  { %s33_s22 = sshll.u32 %s7771_s21, 4  ;;  %s7772_s26 = smov 512   ;;  %s34_s22 = int_to_ptr.vmem [resolvable:$true] %s33_s22 }
   0x6   :  { %s7773_s27 = smov 32   ;;  %s7774_s28 = smov [#allocation8]  }
   0x7   :  { %39 = dma.hbm_to_vmem [thread:$0]  %s32_s20, 65536, %s34_s22, [#allocation6], %s7772_s26, %s7772_s26, %s7773_s27  }
   0x8   :  { %s57_s29 = sshll.u32 %s7774_s28, 4  ;;  %s7775_s30 = smov 64   ;;  %s58_s29 = int_to_ptr.vmem [resolvable:$true] %s57_s29 }
   0x9   :  { %s7776_s6 = smov 4   ;;  %s18_s8 = sshll.u32 %s7975_s0, 4  ;;  %s19_s8 = int_to_ptr.hbm [resolvable:$true] %s18_s8 }
   0xa   :  { %63 = dma.hbm_to_vmem [thread:$0]  %s56_s25, 8192, %s58_s29, [#allocation9], %s7775_s30, %s7775_s30, %s7776_s6  }
   0xb   :  { %s7777_s9 = smov [#allocation2]   ;;  %s45_s12 = sshll.u32 %s7977_s2, 4  ;;  %s46_s12 = int_to_ptr.hbm [resolvable:$true] %s45_s12 }
   0xc   :  { %s20_s10 = sshll.u32 %s7777_s9, 4  ;;  %s7778_s13 = smov 256   ;;  %s21_s10 = int_to_ptr.vmem [resolvable:$true] %s20_s10 }
   0xd   :  { %s7779_s14 = smov 16   ;;  %s7780_s15 = smov [#allocation7]  }
   0xe   :  { %26 = dma.hbm_to_vmem [thread:$0]  %s19_s8, 256, %s21_s10, [#allocation3], %s7778_s13, %s7778_s13, %s7779_s14  }
   0xf   :  { %s47_s16 = sshll.u32 %s7780_s15, 4  ;;  %s69_s19 = sshll.u32 %s7979_s4, 4  ;;  %s48_s16 = int_to_ptr.vmem [resolvable:$true] %s47_s16  ;;  %s70_s19 = int_to_ptr.hbm [resolvable:$true] %s69_s19 }
  0x10   :  { %50 = dma.hbm_to_vmem [thread:$0]  %s46_s12, 128, %s48_s16, [#allocation6]  }
  0x11   :  { %s7781_s0 = smov [#allocation10]  }
  0x12   :  { %s71_s20 = sshll.u32 %s7781_s0, 4  ;;  %s72_s20 = int_to_ptr.vmem [resolvable:$true] %s71_s20 }
  0x13   :  { %74 = dma.hbm_to_vmem [thread:$0]  %s70_s19, 16, %s72_s20, [#allocation9]  }
  0x14   :  { %7763 = dma.done.wait [#allocation3], 1024  }
  0x15   :  { %7764 = vsyncadd [#allocation3], 4294966272 }
  0x16   :  { %7765 = dma.done.wait [#allocation6], 65664  }
  0x17   :  { %7766 = vsyncadd [#allocation6], 4294901632 }
  0x18   :  { %7767 = dma.done.wait [#allocation9], 8208  }
  0x19   :  { %7768 = vsyncadd [#allocation9], 4294959088  ;;  %v4948_v0 = vld [vmem:[#allocation5 + $0x1c0] sm:$0xf] }
  0x1a   :  { %v7086_v1 = vld [vmem:[#allocation5 + $0x1dc] sm:$0xf0] }
  0x1b   :  { %v5204_v2 = vld [vmem:[#allocation5 + $0x3c0] sm:$0xf]  ;;  %v4949_v3 = vor.u32 %v7086_v1, %v4948_v0 }
  0x1c   :  { %v7150_v4 = vld [vmem:[#allocation5 + $0x3dc] sm:$0xf0] }
  0x1d   :  { %v5460_v5 = vld [vmem:[#allocation5 + $0x5c0] sm:$0xf]  ;;  %v5205_v7 = vor.u32 %v7150_v4, %v5204_v2  ;;  %3240 = vmatpush.bf16.msra.mxu0 %v4949_v3 }
  0x1e   :  { %v7214_v6 = vld [vmem:[#allocation5 + $0x5dc] sm:$0xf0] }
  0x1f   :  { %v5461_v8 = vor.u32 %v7214_v6, %v5460_v5  ;;  %v5716_v9 = vld [vmem:[#allocation5 + $0x7c0] sm:$0xf]  ;;  %3253 = vmatpush.bf16.msra.mxu1 %v5205_v7 }
  0x20   :  { %v7278_v10 = vld [vmem:[#allocation5 + $0x7dc] sm:$0xf0] }
  0x21   :  { %v4916_v11 = vld [vmem:[#allocation5 + $0x180] sm:$0xf]  ;;  %v5717_v12 = vor.u32 %v7278_v10, %v5716_v9  ;;  %3266 = vmatpush.bf16.msra.mxu2 %v5461_v8 }
  0x22   :  { %v7078_v13 = vld [vmem:[#allocation5 + $0x19c] sm:$0xf0] }
  0x23   :  { %v5172_v14 = vld [vmem:[#allocation5 + $0x380] sm:$0xf]  ;;  %v4917_v16 = vor.u32 %v7078_v13, %v4916_v11  ;;  %3279 = vmatpush.bf16.msra.mxu3 %v5717_v12 }
  0x24   :  { %v7142_v15 = vld [vmem:[#allocation5 + $0x39c] sm:$0xf0] }
  0x25   :  { %v5173_v17 = vor.u32 %v7142_v15, %v5172_v14  ;;  %v5428_v18 = vld [vmem:[#allocation5 + $0x580] sm:$0xf]  ;;  %3241 = vmatpush.bf16.msra.mxu0 %v4917_v16 }
  0x26   :  { %v7206_v19 = vld [vmem:[#allocation5 + $0x59c] sm:$0xf0] }
  0x27   :  { %v5684_v20 = vld [vmem:[#allocation5 + $0x780] sm:$0xf]  ;;  %v5429_v21 = vor.u32 %v7206_v19, %v5428_v18  ;;  %3254 = vmatpush.bf16.msra.mxu1 %v5173_v17 }
  0x28   :  { %v7270_v22 = vld [vmem:[#allocation5 + $0x79c] sm:$0xf0] }
  0x29   :  { %v4884_v23 = vld [vmem:[#allocation5 + $0x140] sm:$0xf]  ;;  %v5685_v25 = vor.u32 %v7270_v22, %v5684_v20  ;;  %3267 = vmatpush.bf16.msra.mxu2 %v5429_v21 }
  0x2a   :  { %v7070_v24 = vld [vmem:[#allocation5 + $0x15c] sm:$0xf0] }
  0x2b   :  { %v5140_v26 = vld [vmem:[#allocation5 + $0x340] sm:$0xf]  ;;  %v4885_v29 = vor.u32 %v7070_v24, %v4884_v23  ;;  %3280 = vmatpush.bf16.msra.mxu3 %v5685_v25 }
  0x2c   :  { %v7134_v27 = vld [vmem:[#allocation5 + $0x35c] sm:$0xf0] }
  0x2d   :  { %v5396_v28 = vld [vmem:[#allocation5 + $0x540] sm:$0xf]  ;;  %v5141_v33 = vor.u32 %v7134_v27, %v5140_v26  ;;  %3242 = vmatpush.bf16.msra.mxu0 %v4885_v29 }
  0x2e   :  { %v7198_v30 = vld [vmem:[#allocation5 + $0x55c] sm:$0xf0] }
  0x2f   :  { %v5652_v31 = vld [vmem:[#allocation5 + $0x740] sm:$0xf]  ;;  %v5397_v34 = vor.u32 %v7198_v30, %v5396_v28  ;;  %3255 = vmatpush.bf16.msra.mxu1 %v5141_v33 }
  0x30   :  { %v7262_v32 = vld [vmem:[#allocation5 + $0x75c] sm:$0xf0] }
  0x31   :  { %v4852_v35 = vld [vmem:[#allocation5 + $0x100] sm:$0xf]  ;;  %v5653_v38 = vor.u32 %v7262_v32, %v5652_v31  ;;  %3268 = vmatpush.bf16.msra.mxu2 %v5397_v34 }
  0x32   :  { %v7062_v36 = vld [vmem:[#allocation5 + $0x11c] sm:$0xf0] }
  0x33   :  { %v5108_v37 = vld [vmem:[#allocation5 + $0x300] sm:$0xf]  ;;  %v4853_v44 = vor.u32 %v7062_v36, %v4852_v35  ;;  %3281 = vmatpush.bf16.msra.mxu3 %v5653_v38 }
  0x34   :  { %v7126_v39 = vld [vmem:[#allocation5 + $0x31c] sm:$0xf0] }
  0x35   :  { %v5364_v40 = vld [vmem:[#allocation5 + $0x500] sm:$0xf]  ;;  %v5109_v45 = vor.u32 %v7126_v39, %v5108_v37  ;;  %3243 = vmatpush.bf16.msra.mxu0 %v4853_v44 }
  0x36   :  { %v7190_v41 = vld [vmem:[#allocation5 + $0x51c] sm:$0xf0] }
  0x37   :  { %v5620_v42 = vld [vmem:[#allocation5 + $0x700] sm:$0xf]  ;;  %v5365_v46 = vor.u32 %v7190_v41, %v5364_v40  ;;  %3256 = vmatpush.bf16.msra.mxu1 %v5109_v45 }
  0x38   :  { %v7254_v43 = vld [vmem:[#allocation5 + $0x71c] sm:$0xf0] }
  0x39   :  { %v4820_v47 = vld [vmem:[#allocation5 + $0xc0] sm:$0xf]  ;;  %v5621_v50 = vor.u32 %v7254_v43, %v5620_v42  ;;  %3269 = vmatpush.bf16.msra.mxu2 %v5365_v46 }
  0x3a   :  { %v7054_v48 = vld [vmem:[#allocation5 + $0xdc] sm:$0xf0] }
  0x3b   :  { %v5076_v49 = vld [vmem:[#allocation5 + $0x2c0] sm:$0xf]  ;;  %v4821_v56 = vor.u32 %v7054_v48, %v4820_v47  ;;  %3282 = vmatpush.bf16.msra.mxu3 %v5621_v50 }
  0x3c   :  { %v7118_v51 = vld [vmem:[#allocation5 + $0x2dc] sm:$0xf0] }
  0x3d   :  { %v5332_v52 = vld [vmem:[#allocation5 + $0x4c0] sm:$0xf]  ;;  %v5077_v57 = vor.u32 %v7118_v51, %v5076_v49  ;;  %3244 = vmatpush.bf16.msra.mxu0 %v4821_v56 }
  0x3e   :  { %v7182_v53 = vld [vmem:[#allocation5 + $0x4dc] sm:$0xf0] }
  0x3f   :  { %v5588_v54 = vld [vmem:[#allocation5 + $0x6c0] sm:$0xf]  ;;  %v5333_v58 = vor.u32 %v7182_v53, %v5332_v52  ;;  %3257 = vmatpush.bf16.msra.mxu1 %v5077_v57 }
  0x40   :  { %v7246_v55 = vld [vmem:[#allocation5 + $0x6dc] sm:$0xf0] }
  0x41   :  { %v4788_v59 = vld [vmem:[#allocation5 + $0x80] sm:$0xf]  ;;  %v5589_v62 = vor.u32 %v7246_v55, %v5588_v54  ;;  %3270 = vmatpush.bf16.msra.mxu2 %v5333_v58 }
  0x42   :  { %v7046_v60 = vld [vmem:[#allocation5 + $0x9c] sm:$0xf0] }
  0x43   :  { %v5044_v61 = vld [vmem:[#allocation5 + $0x280] sm:$0xf]  ;;  %v4789_v4 = vor.u32 %v7046_v60, %v4788_v59  ;;  %3283 = vmatpush.bf16.msra.mxu3 %v5589_v62 }
  0x44   :  { %v7110_v63 = vld [vmem:[#allocation5 + $0x29c] sm:$0xf0] }
  0x45   :  { %v5300_v0 = vld [vmem:[#allocation5 + $0x480] sm:$0xf]  ;;  %v5045_v5 = vor.u32 %v7110_v63, %v5044_v61  ;;  %3245 = vmatpush.bf16.msra.mxu0 %v4789_v4 }
  0x46   :  { %v7174_v1 = vld [vmem:[#allocation5 + $0x49c] sm:$0xf0] }
  0x47   :  { %v5556_v2 = vld [vmem:[#allocation5 + $0x680] sm:$0xf]  ;;  %v5301_v6 = vor.u32 %v7174_v1, %v5300_v0  ;;  %3258 = vmatpush.bf16.msra.mxu1 %v5045_v5  ;;  %v97_v5 = vld [vmem:[#allocation2 + $0x10] sm:$0xff] }
  0x48   :  { %v7238_v3 = vld [vmem:[#allocation5 + $0x69c] sm:$0xf0]  ;;  %113 = vst [vmem:[#allocation1 + $0x1] ss:$4 sm:$0xff] %v97_v5  ;;  %v102_v5 = vld [vmem:[#allocation2 + $0x38] sm:$0xff] }
  0x49   :  { %v4756_v7 = vld [vmem:[#allocation5 + $0x40] sm:$0xf]  ;;  %v5557_v10 = vor.u32 %v7238_v3, %v5556_v2  ;;  %3271 = vmatpush.bf16.msra.mxu2 %v5301_v6  ;;  %125 = vst [vmem:[#allocation1 + $0x23] ss:$4 sm:$0xff] %v102_v5  ;;  %v5366_v5 = vld [vmem:[#allocation5 + $0x520] sm:$0xf0] }
  0x4a   :  { %v7038_v8 = vld [vmem:[#allocation5 + $0x5c] sm:$0xf0] }
  0x4b   :  { %v5012_v9 = vld [vmem:[#allocation5 + $0x240] sm:$0xf]  ;;  %v4757_v16 = vor.u32 %v7038_v8, %v4756_v7  ;;  %3284 = vmatpush.bf16.msra.mxu3 %v5557_v10  ;;  %v101_v10 = vld [vmem:[#allocation2 + $0x30] sm:$0xff] }
  0x4c   :  { %v7102_v11 = vld [vmem:[#allocation5 + $0x25c] sm:$0xf0]  ;;  %117 = vst [vmem:[#allocation1 + $0x3] ss:$4 sm:$0xff] %v101_v10 }
  0x4d   :  { %v5268_v12 = vld [vmem:[#allocation5 + $0x440] sm:$0xf]  ;;  %v5013_v19 = vor.u32 %v7102_v11, %v5012_v9  ;;  %3246 = vmatpush.bf16.msra.mxu0 %v4757_v16 }
  0x4e   :  { %v7166_v13 = vld [vmem:[#allocation5 + $0x45c] sm:$0xf0] }
  0x4f   :  { %v5524_v14 = vld [vmem:[#allocation5 + $0x640] sm:$0xf]  ;;  %v5269_v20 = vor.u32 %v7166_v13, %v5268_v12  ;;  %3259 = vmatpush.bf16.msra.mxu1 %v5013_v19 }
  0x50   :  { %v7230_v15 = vld [vmem:[#allocation5 + $0x65c] sm:$0xf0] }
  0x51   :  { %v4724_v17 = vld [vmem:[#allocation5] sm:$0xf]  ;;  %v5525_v24 = vor.u32 %v7230_v15, %v5524_v14  ;;  %3272 = vmatpush.bf16.msra.mxu2 %v5269_v20 }
  0x52   :  { %v7030_v18 = vld [vmem:[#allocation5 + $0x1c] sm:$0xf0] }
  0x53   :  { %v4980_v21 = vld [vmem:[#allocation5 + $0x200] sm:$0xf]  ;;  %v4725_v31 = vor.u32 %v7030_v18, %v4724_v17  ;;  %3285 = vmatpush.bf16.msra.mxu3 %v5525_v24 }
  0x54   :  { %v7094_v22 = vld [vmem:[#allocation5 + $0x21c] sm:$0xf0] }
  0x55   :  { %v5236_v23 = vld [vmem:[#allocation5 + $0x400] sm:$0xf]  ;;  %v4981_v35 = vor.u32 %v7094_v22, %v4980_v21  ;;  %3247 = vmatpush.bf16.msra.mxu0 %v4725_v31 }
  0x56   :  { %v7158_v25 = vld [vmem:[#allocation5 + $0x41c] sm:$0xf0] }
  0x57   :  { %v5492_v26 = vld [vmem:[#allocation5 + $0x600] sm:$0xf]  ;;  %v5237_v36 = vor.u32 %v7158_v25, %v5236_v23  ;;  %3260 = vmatpush.bf16.msra.mxu1 %v4981_v35 }
  0x58   :  { %v7222_v27 = vld [vmem:[#allocation5 + $0x61c] sm:$0xf0] }
  0x59   :  { %v5972_v28 = vld [vmem:[#allocation5 + $0x9c0] sm:$0xf]  ;;  %v5493_v39 = vor.u32 %v7222_v27, %v5492_v26  ;;  %3273 = vmatpush.bf16.msra.mxu2 %v5237_v36 }
  0x5a   :  { %v7342_v29 = vld [vmem:[#allocation5 + $0x9dc] sm:$0xf0] }
  0x5b   :  { %v6228_v30 = vld [vmem:[#allocation5 + $0xbc0] sm:$0xf]  ;;  %v5973_v40 = vor.u32 %v7342_v29, %v5972_v28  ;;  %3286 = vmatpush.bf16.msra.mxu3 %v5493_v39 }
  0x5c   :  { %v7406_v32 = vld [vmem:[#allocation5 + $0xbdc] sm:$0xf0] }
  0x5d   :  { %v6484_v33 = vld [vmem:[#allocation5 + $0xdc0] sm:$0xf]  ;;  %v6229_v41 = vor.u32 %v7406_v32, %v6228_v30  ;;  %3292 = vmatpush.bf16.msrb.mxu0 %v5973_v40 }
  0x5e   :  { %v7470_v34 = vld [vmem:[#allocation5 + $0xddc] sm:$0xf0] }
  0x5f   :  { %v6740_v37 = vld [vmem:[#allocation5 + $0xfc0] sm:$0xf]  ;;  %v6485_v42 = vor.u32 %v7470_v34, %v6484_v33  ;;  %3305 = vmatpush.bf16.msrb.mxu1 %v6229_v41 }
  0x60   :  { %v7534_v38 = vld [vmem:[#allocation5 + $0xfdc] sm:$0xf0] }
  0x61   :  { %v5940_v43 = vld [vmem:[#allocation5 + $0x980] sm:$0xf]  ;;  %v6741_v46 = vor.u32 %v7534_v38, %v6740_v37  ;;  %3318 = vmatpush.bf16.msrb.mxu2 %v6485_v42 }
  0x62   :  { %v7334_v44 = vld [vmem:[#allocation5 + $0x99c] sm:$0xf0] }
  0x63   :  { %v6196_v45 = vld [vmem:[#allocation5 + $0xb80] sm:$0xf]  ;;  %v5941_v52 = vor.u32 %v7334_v44, %v5940_v43  ;;  %3331 = vmatpush.bf16.msrb.mxu3 %v6741_v46 }
  0x64   :  { %v7398_v47 = vld [vmem:[#allocation5 + $0xb9c] sm:$0xf0] }
  0x65   :  { %v6452_v48 = vld [vmem:[#allocation5 + $0xd80] sm:$0xf]  ;;  %v6197_v54 = vor.u32 %v7398_v47, %v6196_v45  ;;  %3293 = vmatpush.bf16.msrb.mxu0 %v5941_v52 }
  0x66   :  { %v7462_v49 = vld [vmem:[#allocation5 + $0xd9c] sm:$0xf0] }
  0x67   :  { %v6708_v50 = vld [vmem:[#allocation5 + $0xf80] sm:$0xf]  ;;  %v6453_v55 = vor.u32 %v7462_v49, %v6452_v48  ;;  %3306 = vmatpush.bf16.msrb.mxu1 %v6197_v54 }
  0x68   :  { %v7526_v51 = vld [vmem:[#allocation5 + $0xf9c] sm:$0xf0] }
  0x69   :  { %v5908_v53 = vld [vmem:[#allocation5 + $0x940] sm:$0xf]  ;;  %v6709_v59 = vor.u32 %v7526_v51, %v6708_v50  ;;  %3319 = vmatpush.bf16.msrb.mxu2 %v6453_v55 }
  0x6a   :  { %v7326_v56 = vld [vmem:[#allocation5 + $0x95c] sm:$0xf0] }
  0x6b   :  { %v6164_v57 = vld [vmem:[#allocation5 + $0xb40] sm:$0xf]  ;;  %v5909_v2 = vor.u32 %v7326_v56, %v5908_v53  ;;  %3332 = vmatpush.bf16.msrb.mxu3 %v6709_v59 }
  0x6c   :  { %v7390_v58 = vld [vmem:[#allocation5 + $0xb5c] sm:$0xf0] }
  0x6d   :  { %v6420_v60 = vld [vmem:[#allocation5 + $0xd40] sm:$0xf]  ;;  %v6165_v6 = vor.u32 %v7390_v58, %v6164_v57  ;;  %3294 = vmatpush.bf16.msrb.mxu0 %v5909_v2 }
  0x6e   :  { %v7454_v61 = vld [vmem:[#allocation5 + $0xd5c] sm:$0xf0] }
  0x6f   :  { %v6676_v62 = vld [vmem:[#allocation5 + $0xf40] sm:$0xf]  ;;  %v6421_v7 = vor.u32 %v7454_v61, %v6420_v60  ;;  %3307 = vmatpush.bf16.msrb.mxu1 %v6165_v6 }
  0x70   :  { %v7518_v63 = vld [vmem:[#allocation5 + $0xf5c] sm:$0xf0] }
  0x71   :  { %v5876_v0 = vld [vmem:[#allocation5 + $0x900] sm:$0xf]  ;;  %v6677_v11 = vor.u32 %v7518_v63, %v6676_v62  ;;  %3320 = vmatpush.bf16.msrb.mxu2 %v6421_v7  ;;  %v96_v62 = vld [vmem:[#allocation2 + $0x8] sm:$0xff]  ;;  %v98_v63 = vld [vmem:[#allocation2 + $0x18] sm:$0xff] }
  0x72   :  { %v7318_v1 = vld [vmem:[#allocation5 + $0x91c] sm:$0xf0]  ;;  %119 = vst [vmem:[#allocation1 + $0x20] ss:$4 sm:$0xff] %v96_v62 }
  0x73   :  { %v6132_v3 = vld [vmem:[#allocation5 + $0xb00] sm:$0xf]  ;;  %v5877_v16 = vor.u32 %v7318_v1, %v5876_v0  ;;  %3333 = vmatpush.bf16.msrb.mxu3 %v6677_v11  ;;  %121 = vst [vmem:[#allocation1 + $0x21] ss:$4 sm:$0xff] %v98_v63  ;;  %v7058_v63 = vld [vmem:[#allocation5 + $0x104] sm:$0xf] }
  0x74   :  { %v95_v4 = vld [vmem:[#allocation2] sm:$0xff] }
  0x75   :  { %v7382_v8 = vld [vmem:[#allocation5 + $0xb1c] sm:$0xf0]  ;;  %111 = vst [vmem:[#allocation1] ss:$4 sm:$0xff] %v95_v4  ;;  %3295 = vmatpush.bf16.msrb.mxu0 %v5877_v16  ;;  %v100_v4 = vld [vmem:[#allocation2 + $0x28] sm:$0xff] }
  0x76   :  { %v99_v9 = vld [vmem:[#allocation2 + $0x20] sm:$0xff]  ;;  %v6133_v17 = vor.u32 %v7382_v8, %v6132_v3  ;;  %123 = vst [vmem:[#allocation1 + $0x22] ss:$4 sm:$0xff] %v100_v4 }
  0x77   :  { %v6388_v12 = vld [vmem:[#allocation5 + $0xd00] sm:$0xf]  ;;  %115 = vst [vmem:[#allocation1 + $0x2] ss:$4 sm:$0xff] %v99_v9  ;;  %v5206_v16 = vld [vmem:[#allocation5 + $0x3e0] sm:$0xf0] }
  0x78   :  { %v7446_v13 = vld [vmem:[#allocation5 + $0xd1c] sm:$0xf0]  ;;  %3308 = vmatpush.bf16.msrb.mxu1 %v6133_v17  ;;  %v7210_v17 = vld [vmem:[#allocation5 + $0x5c4] sm:$0xf] }
  0x79   :  { %v6644_v14 = vld [vmem:[#allocation5 + $0xf00] sm:$0xf]  ;;  %v6389_v18 = vor.u32 %v7446_v13, %v6388_v12  ;;  %v7082_v12 = vld [vmem:[#allocation5 + $0x1c4] sm:$0xf] }
  0x7a   :  { %v7510_v15 = vld [vmem:[#allocation5 + $0xf1c] sm:$0xf0]  ;;  %v4950_v13 = vld [vmem:[#allocation5 + $0x1e0] sm:$0xf0] }
  0x7b   :  { %v5844_v19 = vld [vmem:[#allocation5 + $0x8c0] sm:$0xf]  ;;  %v6645_v22 = vor.u32 %v7510_v15, %v6644_v14  ;;  %3321 = vmatpush.bf16.msrb.mxu2 %v6389_v18  ;;  %v7146_v14 = vld [vmem:[#allocation5 + $0x3c4] sm:$0xf] }
  0x7c   :  { %v7310_v20 = vld [vmem:[#allocation5 + $0x8dc] sm:$0xf0]  ;;  %v5462_v18 = vld [vmem:[#allocation5 + $0x5e0] sm:$0xf0] }
  0x7d   :  { %v6100_v21 = vld [vmem:[#allocation5 + $0xac0] sm:$0xf]  ;;  %v5845_v28 = vor.u32 %v7310_v20, %v5844_v19  ;;  %3334 = vmatpush.bf16.msrb.mxu3 %v6645_v22  ;;  %v5718_v22 = vld [vmem:[#allocation5 + $0x7e0] sm:$0xf0] }
  0x7e   :  { %v7374_v23 = vld [vmem:[#allocation5 + $0xadc] sm:$0xf0]  ;;  %v128_v40 = vld.sshfl [vmem:[#allocation1 + $0x10] sm:$0xff pattern:$0x73625140] }
  0x7f   :  { %v6356_v24 = vld [vmem:[#allocation5 + $0xcc0] sm:$0xf]  ;;  %v6101_v31 = vor.u32 %v7374_v23, %v6100_v21  ;;  %v126_v41 = vld.sshfl [vmem:[#allocation1] sm:$0xff pattern:$0x73625140]  ;;  %3296 = vmatpush.bf16.msrb.mxu0 %v5845_v28  ;;  %v7830_v46 = vpack.c.bf16 %v128_v40, %v128_v40 }
  0x80   :  { %v7438_v25 = vld [vmem:[#allocation5 + $0xcdc] sm:$0xf0]  ;;  %v7832_v47 = vpack.c.bf16 %v126_v41, %v126_v41  ;;  %v129_v48 = vld.sshfl [vmem:[#allocation1 + $0x18] sm:$0xff pattern:$0x73625140] }
  0x81   :  { %v6612_v26 = vld [vmem:[#allocation5 + $0xec0] sm:$0xf]  ;;  %v6357_v32 = vor.u32 %v7438_v25, %v6356_v24  ;;  %3309 = vmatpush.bf16.msrb.mxu1 %v6101_v31  ;;  %v7834_v51 = vpack.c.bf16 %v129_v48, %v129_v48  ;;  %3274 = vmatmul.bf16.vlgmr.msra.gmra.mxu2 %v7830_v46  ;;  %v7274_v21 = vld [vmem:[#allocation5 + $0x7c4] sm:$0xf]  ;;  %v4953_v24 = vor.u32 %v7082_v12, %v4950_v13 }
  0x82   :  { %v7502_v27 = vld [vmem:[#allocation5 + $0xedc] sm:$0xf0]  ;;  %3248 = vmatmul.bf16.vlgmr.msra.gmra.mxu0 %v7832_v47  ;;  %v7074_v25 = vld [vmem:[#allocation5 + $0x184] sm:$0xf]  ;;  %v5721_v31 = vor.u32 %v7274_v21, %v5718_v22 }
  0x83   :  { %v5812_v29 = vld [vmem:[#allocation5 + $0x880] sm:$0xf]  ;;  %v6613_v36 = vor.u32 %v7502_v27, %v6612_v26  ;;  %3322 = vmatpush.bf16.msrb.mxu2 %v6357_v32  ;;  %3287 = vmatmul.bf16.vlgmr.msra.gmra.mxu3 %v7834_v51  ;;  %v5209_v26 = vor.u32 %v7146_v14, %v5206_v16  ;;  %v5465_v27 = vor.u32 %v7210_v17, %v5462_v18  ;;  %v4918_v28 = vld [vmem:[#allocation5 + $0x1a0] sm:$0xf0] }
  0x84   :  { %v7302_v30 = vld [vmem:[#allocation5 + $0x89c] sm:$0xf0]  ;;  %v7202_v32 = vld [vmem:[#allocation5 + $0x584] sm:$0xf] }
  0x85   :  { %v6068_v33 = vld [vmem:[#allocation5 + $0xa80] sm:$0xf]  ;;  %v5813_v44 = vor.u32 %v7302_v30, %v5812_v29  ;;  %3335 = vmatpush.bf16.msrb.mxu3 %v6613_v36  ;;  %v7138_v29 = vld [vmem:[#allocation5 + $0x384] sm:$0xf] }
  0x86   :  { %v7366_v34 = vld [vmem:[#allocation5 + $0xa9c] sm:$0xf0]  ;;  %v5174_v30 = vld [vmem:[#allocation5 + $0x3a0] sm:$0xf0] }
  0x87   :  { %v6324_v35 = vld [vmem:[#allocation5 + $0xc80] sm:$0xf]  ;;  %v6069_v45 = vor.u32 %v7366_v34, %v6068_v33  ;;  %3297 = vmatpush.bf16.msrb.mxu0 %v5813_v44  ;;  %v5430_v33 = vld [vmem:[#allocation5 + $0x5a0] sm:$0xf0] }
  0x88   :  { %v7430_v37 = vld [vmem:[#allocation5 + $0xc9c] sm:$0xf0]  ;;  %v7266_v34 = vld [vmem:[#allocation5 + $0x784] sm:$0xf] }
  0x89   :  { %v6580_v38 = vld [vmem:[#allocation5 + $0xe80] sm:$0xf]  ;;  %v6325_v50 = vor.u32 %v7430_v37, %v6324_v35  ;;  %3310 = vmatpush.bf16.msrb.mxu1 %v6069_v45  ;;  %v5686_v35 = vld [vmem:[#allocation5 + $0x7a0] sm:$0xf0] }
  0x8a   :  { %v7494_v39 = vld [vmem:[#allocation5 + $0xe9c] sm:$0xf0]  ;;  %v7066_v36 = vld [vmem:[#allocation5 + $0x144] sm:$0xf] }
  0x8b   :  { %v5780_v42 = vld [vmem:[#allocation5 + $0x840] sm:$0xf]  ;;  %v6581_v56 = vor.u32 %v7494_v39, %v6580_v38  ;;  %3323 = vmatpush.bf16.msrb.mxu2 %v6325_v50  ;;  %v4886_v37 = vld [vmem:[#allocation5 + $0x160] sm:$0xf0]  ;;  %v4921_v38 = vor.u32 %v7074_v25, %v4918_v28 }
  0x8c   :  { %v7294_v43 = vld [vmem:[#allocation5 + $0x85c] sm:$0xf0]  ;;  %v132_v39 = vld.sshfl [vmem:[#allocation1 + $0x30] sm:$0xff pattern:$0x73625140] }
  0x8d   :  { %v127_v49 = vld.sshfl [vmem:[#allocation1 + $0x8] sm:$0xff pattern:$0x73625140]  ;;  %v5781_v0 = vor.u32 %v7294_v43, %v5780_v42  ;;  %3336 = vmatpush.bf16.msrb.mxu3 %v6581_v56  ;;  %v130_v41 = vld.sshfl [vmem:[#allocation1 + $0x20] sm:$0xff pattern:$0x73625140]  ;;  %v5177_v42 = vor.u32 %v7138_v29, %v5174_v30  ;;  %v5433_v43 = vor.u32 %v7202_v32, %v5430_v33  ;;  %v7842_v44 = vpack.c.bf16 %v132_v39, %v132_v39 }
  0x8e   :  { %v6036_v52 = vld [vmem:[#allocation5 + $0xa40] sm:$0xf]  ;;  %v7836_v55 = vpack.c.bf16 %v127_v49, %v127_v49  ;;  %v7130_v40 = vld [vmem:[#allocation5 + $0x344] sm:$0xf]  ;;  %v5689_v49 = vor.u32 %v7266_v34, %v5686_v35 }
  0x8f   :  { %v7358_v53 = vld [vmem:[#allocation5 + $0xa5c] sm:$0xf0]  ;;  %3298 = vmatpush.bf16.msrb.mxu0 %v5781_v0  ;;  %v133_v45 = vld.sshfl [vmem:[#allocation1 + $0x38] sm:$0xff pattern:$0x73625140] }
  0x90   :  { %v6292_v54 = vld [vmem:[#allocation5 + $0xc40] sm:$0xf]  ;;  %3261 = vmatmul.bf16.vlgmr.msra.gmra.mxu1 %v7836_v55  ;;  %v6037_v6 = vor.u32 %v7358_v53, %v6036_v52  ;;  %v5142_v50 = vld [vmem:[#allocation5 + $0x360] sm:$0xf0] }
  0x91   :  { %v7422_v57 = vld [vmem:[#allocation5 + $0xc5c] sm:$0xf0]  ;;  %v7194_v52 = vld [vmem:[#allocation5 + $0x544] sm:$0xf] }
  0x92   :  { %v6548_v58 = vld [vmem:[#allocation5 + $0xe40] sm:$0xf]  ;;  %v6293_v7 = vor.u32 %v7422_v57, %v6292_v54  ;;  %3311 = vmatpush.bf16.msrb.mxu1 %v6037_v6  ;;  %v5398_v53 = vld [vmem:[#allocation5 + $0x560] sm:$0xf0]  ;;  %v7844_v54 = vpack.c.bf16 %v130_v41, %v130_v41 }
  0x93   :  { %v7486_v59 = vld [vmem:[#allocation5 + $0xe5c] sm:$0xf0]  ;;  %v7258_v56 = vld [vmem:[#allocation5 + $0x744] sm:$0xf]  ;;  %v5401_v62 = vor.u32 %v7194_v52, %v5398_v53 }
  0x94   :  { %v5748_v60 = vld [vmem:[#allocation5 + $0x800] sm:$0xf]  ;;  %v6549_v10 = vor.u32 %v7486_v59, %v6548_v58  ;;  %3324 = vmatpush.bf16.msrb.mxu2 %v6293_v7  ;;  %v5654_v57 = vld [vmem:[#allocation5 + $0x760] sm:$0xf0]  ;;  %v7846_v58 = vpack.c.bf16 %v133_v45, %v133_v45 }
  0x95   :  { %v7286_v61 = vld [vmem:[#allocation5 + $0x81c] sm:$0xf0]  ;;  %v4854_v0 = vld [vmem:[#allocation5 + $0x120] sm:$0xf0] }
  0x96   :  { %v6004_v1 = vld [vmem:[#allocation5 + $0xa00] sm:$0xf]  ;;  %v5749_v15 = vor.u32 %v7286_v61, %v5748_v60  ;;  %3337 = vmatpush.bf16.msrb.mxu3 %v6549_v10  ;;  %v4889_v60 = vor.u32 %v7066_v36, %v4886_v37  ;;  %v5145_v61 = vor.u32 %v7130_v40, %v5142_v50  ;;  %v7186_v4 = vld [vmem:[#allocation5 + $0x504] sm:$0xf] }
  0x97   :  { %v7350_v2 = vld [vmem:[#allocation5 + $0xa1c] sm:$0xf0]  ;;  %v7250_v6 = vld [vmem:[#allocation5 + $0x704] sm:$0xf]  ;;  %v5369_v10 = vor.u32 %v7186_v4, %v5366_v5 }
  0x98   :  { %v6260_v3 = vld [vmem:[#allocation5 + $0xc00] sm:$0xf]  ;;  %v6005_v19 = vor.u32 %v7350_v2, %v6004_v1  ;;  %3299 = vmatpush.bf16.msrb.mxu0 %v5749_v15  ;;  %v7122_v1 = vld [vmem:[#allocation5 + $0x304] sm:$0xf]  ;;  %v5657_v2 = vor.u32 %v7258_v56, %v5654_v57 }
  0x99   :  { %v7414_v8 = vld [vmem:[#allocation5 + $0xc1c] sm:$0xf0]  ;;  %v5622_v7 = vld [vmem:[#allocation5 + $0x720] sm:$0xf0] }
  0x9a   :  { %v6516_v9 = vld [vmem:[#allocation5 + $0xe00] sm:$0xf]  ;;  %v6261_v20 = vor.u32 %v7414_v8, %v6260_v3  ;;  %3312 = vmatpush.bf16.msrb.mxu1 %v6005_v19  ;;  %v5110_v3 = vld [vmem:[#allocation5 + $0x320] sm:$0xf0]  ;;  %v4857_v8 = vor.u32 %v7058_v63, %v4854_v0  ;;  %v5625_v14 = vor.u32 %v7250_v6, %v5622_v7 }
  0x9b   :  { %v7478_v11 = vld [vmem:[#allocation5 + $0xe1c] sm:$0xf0]  ;;  %3300 = vmatmul.bf16.vlgmr.msrb.gmra.mxu0 %v7844_v54  ;;  %v4822_v12 = vld [vmem:[#allocation5 + $0xe0] sm:$0xf0] }
  0x9c   :  { %v6517_v23 = vor.u32 %v7478_v11, %v6516_v9  ;;  %3325 = vmatpush.bf16.msrb.mxu2 %v6261_v20  ;;  %3344 = vmatpush.bf16.msra.mxu0 %v4953_v24  ;;  %v131_v48 = vld.sshfl [vmem:[#allocation1 + $0x28] sm:$0xff pattern:$0x73625140]  ;;  %v5113_v9 = vor.u32 %v7122_v1, %v5110_v3 }
  0x9d   :  { %v7848_v59 = vpack.c.bf16 %v131_v48, %v131_v48  ;;  %v7050_v11 = vld [vmem:[#allocation5 + $0xc4] sm:$0xf] }
  0x9e   :  { %3338 = vmatpush.bf16.msrb.mxu3 %v6517_v23  ;;  %3357 = vmatpush.bf16.msra.mxu1 %v5209_v26  ;;  %v7114_v13 = vld [vmem:[#allocation5 + $0x2c4] sm:$0xf]  ;;  %v4825_v20 = vor.u32 %v7050_v11, %v4822_v12 }
  0x9f   :  { %3326 = vmatmul.bf16.vlgmr.msrb.gmra.mxu2 %v7842_v44  ;;  %v5078_v15 = vld [vmem:[#allocation5 + $0x2e0] sm:$0xf0] }
  0xa0   :  { %3370 = vmatpush.bf16.msra.mxu2 %v5465_v27  ;;  %3345 = vmatpush.bf16.msra.mxu0 %v4921_v38  ;;  %v7178_v16 = vld [vmem:[#allocation5 + $0x4c4] sm:$0xf]  ;;  %v5081_v21 = vor.u32 %v7114_v13, %v5078_v15 }
  0xa1   :  { %3339 = vmatmul.bf16.vlgmr.msrb.gmra.mxu3 %v7846_v58  ;;  %3313 = vmatmul.bf16.vlgmr.msrb.gmra.mxu1 %v7848_v59  ;;  %v5334_v17 = vld [vmem:[#allocation5 + $0x4e0] sm:$0xf0] }
  0xa2   :  { %3383 = vmatpush.bf16.msra.mxu3 %v5721_v31  ;;  %3358 = vmatpush.bf16.msra.mxu1 %v5177_v42  ;;  %v7242_v18 = vld [vmem:[#allocation5 + $0x6c4] sm:$0xf]  ;;  %v5337_v22 = vor.u32 %v7178_v16, %v5334_v17 }
  0xa3   :  { %v5590_v19 = vld [vmem:[#allocation5 + $0x6e0] sm:$0xf0] }
  0xa4   :  { %3371 = vmatpush.bf16.msra.mxu2 %v5433_v43  ;;  %3346 = vmatpush.bf16.msra.mxu0 %v4889_v60  ;;  %v7042_v23 = vld [vmem:[#allocation5 + $0x84] sm:$0xf]  ;;  %v5593_v26 = vor.u32 %v7242_v18, %v5590_v19 }
  0xa5   :  { %v4790_v24 = vld [vmem:[#allocation5 + $0xa0] sm:$0xf0] }
  0xa6   :  { %3384 = vmatpush.bf16.msra.mxu3 %v5689_v49  ;;  %3359 = vmatpush.bf16.msra.mxu1 %v5145_v61  ;;  %v7106_v25 = vld [vmem:[#allocation5 + $0x284] sm:$0xf]  ;;  %v4793_v32 = vor.u32 %v7042_v23, %v4790_v24 }
  0xa7   :  { %v5046_v27 = vld [vmem:[#allocation5 + $0x2a0] sm:$0xf0] }
  0xa8   :  { %3372 = vmatpush.bf16.msra.mxu2 %v5401_v62  ;;  %3347 = vmatpush.bf16.msra.mxu0 %v4857_v8  ;;  %v7170_v28 = vld [vmem:[#allocation5 + $0x484] sm:$0xf]  ;;  %v5049_v33 = vor.u32 %v7106_v25, %v5046_v27 }
  0xa9   :  { %v5302_v29 = vld [vmem:[#allocation5 + $0x4a0] sm:$0xf0] }
  0xaa   :  { %3385 = vmatpush.bf16.msra.mxu3 %v5657_v2  ;;  %3360 = vmatpush.bf16.msra.mxu1 %v5113_v9  ;;  %v7234_v30 = vld [vmem:[#allocation5 + $0x684] sm:$0xf]  ;;  %v5305_v34 = vor.u32 %v7170_v28, %v5302_v29 }
  0xab   :  { %v5558_v31 = vld [vmem:[#allocation5 + $0x6a0] sm:$0xf0] }
  0xac   :  { %3373 = vmatpush.bf16.msra.mxu2 %v5369_v10  ;;  %3348 = vmatpush.bf16.msra.mxu0 %v4825_v20  ;;  %v7034_v35 = vld [vmem:[#allocation5 + $0x44] sm:$0xf]  ;;  %v5561_v38 = vor.u32 %v7234_v30, %v5558_v31 }
  0xad   :  { %v4758_v36 = vld [vmem:[#allocation5 + $0x60] sm:$0xf0] }
  0xae   :  { %3386 = vmatpush.bf16.msra.mxu3 %v5625_v14  ;;  %3361 = vmatpush.bf16.msra.mxu1 %v5081_v21  ;;  %v7098_v37 = vld [vmem:[#allocation5 + $0x244] sm:$0xf]  ;;  %v4761_v45 = vor.u32 %v7034_v35, %v4758_v36 }
  0xaf   :  { %v5014_v39 = vld [vmem:[#allocation5 + $0x260] sm:$0xf0] }
  0xb0   :  { %3374 = vmatpush.bf16.msra.mxu2 %v5337_v22  ;;  %v7162_v40 = vld [vmem:[#allocation5 + $0x444] sm:$0xf]  ;;  %3349 = vmatpush.bf16.msra.mxu0 %v4793_v32  ;;  %v5017_v50 = vor.u32 %v7098_v37, %v5014_v39 }
  0xb1   :  { %v5270_v41 = vld [vmem:[#allocation5 + $0x460] sm:$0xf0] }
  0xb2   :  { %3387 = vmatpush.bf16.msra.mxu3 %v5593_v26  ;;  %v7226_v42 = vld [vmem:[#allocation5 + $0x644] sm:$0xf]  ;;  %3362 = vmatpush.bf16.msra.mxu1 %v5049_v33  ;;  %v5273_v52 = vor.u32 %v7162_v40, %v5270_v41 }
  0xb3   :  { %v5526_v43 = vld [vmem:[#allocation5 + $0x660] sm:$0xf0] }
  0xb4   :  { %v7026_v48 = vld [vmem:[#allocation5 + $0x4] sm:$0xf]  ;;  %3375 = vmatpush.bf16.msra.mxu2 %v5305_v34  ;;  %v5529_v60 = vor.u32 %v7226_v42, %v5526_v43  ;;  %3350 = vmatpush.bf16.msra.mxu0 %v4761_v45 }
  0xb5   :  { %v4726_v49 = vld [vmem:[#allocation5 + $0x20] sm:$0xf0] }
  0xb6   :  { %v7090_v53 = vld [vmem:[#allocation5 + $0x204] sm:$0xf]  ;;  %3388 = vmatpush.bf16.msra.mxu3 %v5561_v38  ;;  %v4729_v3 = vor.u32 %v7026_v48, %v4726_v49  ;;  %3363 = vmatpush.bf16.msra.mxu1 %v5017_v50 }
  0xb7   :  { %v4982_v56 = vld [vmem:[#allocation5 + $0x220] sm:$0xf0] }
  0xb8   :  { %v7154_v57 = vld [vmem:[#allocation5 + $0x404] sm:$0xf]  ;;  %3376 = vmatpush.bf16.msra.mxu2 %v5273_v52  ;;  %v4985_v7 = vor.u32 %v7090_v53, %v4982_v56  ;;  %3351 = vmatpush.bf16.msra.mxu0 %v4729_v3 }
  0xb9   :  { %v5238_v61 = vld [vmem:[#allocation5 + $0x420] sm:$0xf0] }
  0xba   :  { %v7218_v62 = vld [vmem:[#allocation5 + $0x604] sm:$0xf]  ;;  %v5241_v8 = vor.u32 %v7154_v57, %v5238_v61  ;;  %3389 = vmatpush.bf16.msra.mxu3 %v5529_v60  ;;  %3364 = vmatpush.bf16.msra.mxu1 %v4985_v7 }
  0xbb   :  { %v5494_v63 = vld [vmem:[#allocation5 + $0x620] sm:$0xf0]  ;;  %3352 = vmatmul.bf16.vlgmr.msra.gmra.mxu0 %v7832_v47 }
  0xbc   :  { %v7338_v0 = vld [vmem:[#allocation5 + $0x9c4] sm:$0xf]  ;;  %v5497_v11 = vor.u32 %v7218_v62, %v5494_v63  ;;  %3377 = vmatpush.bf16.msra.mxu2 %v5241_v8 }
  0xbd   :  { %v5974_v1 = vld [vmem:[#allocation5 + $0x9e0] sm:$0xf0]  ;;  %3365 = vmatmul.bf16.vlgmr.msra.gmra.mxu1 %v7836_v55 }
  0xbe   :  { %v7402_v2 = vld [vmem:[#allocation5 + $0xbc4] sm:$0xf]  ;;  %v5977_v12 = vor.u32 %v7338_v0, %v5974_v1  ;;  %3390 = vmatpush.bf16.msra.mxu3 %v5497_v11 }
  0xbf   :  { %v6230_v4 = vld [vmem:[#allocation5 + $0xbe0] sm:$0xf0]  ;;  %3378 = vmatmul.bf16.vlgmr.msra.gmra.mxu2 %v7830_v46 }
  0xc0   :  { %v7466_v5 = vld [vmem:[#allocation5 + $0xdc4] sm:$0xf]  ;;  %v6233_v13 = vor.u32 %v7402_v2, %v6230_v4  ;;  %3396 = vmatpush.bf16.msrb.mxu0 %v5977_v12 }
  0xc1   :  { %v6486_v6 = vld [vmem:[#allocation5 + $0xde0] sm:$0xf0]  ;;  %3391 = vmatmul.bf16.vlgmr.msra.gmra.mxu3 %v7834_v51 }
  0xc2   :  { %v7530_v9 = vld [vmem:[#allocation5 + $0xfc4] sm:$0xf]  ;;  %v6489_v14 = vor.u32 %v7466_v5, %v6486_v6  ;;  %3409 = vmatpush.bf16.msrb.mxu1 %v6233_v13 }
  0xc3   :  { %v6742_v10 = vld [vmem:[#allocation5 + $0xfe0] sm:$0xf0] }
  0xc4   :  { %v7330_v15 = vld [vmem:[#allocation5 + $0x984] sm:$0xf]  ;;  %v6745_v18 = vor.u32 %v7530_v9, %v6742_v10  ;;  %3422 = vmatpush.bf16.msrb.mxu2 %v6489_v14 }
  0xc5   :  { %v5942_v16 = vld [vmem:[#allocation5 + $0x9a0] sm:$0xf0] }
  0xc6   :  { %v7394_v17 = vld [vmem:[#allocation5 + $0xb84] sm:$0xf]  ;;  %v5945_v24 = vor.u32 %v7330_v15, %v5942_v16  ;;  %3435 = vmatpush.bf16.msrb.mxu3 %v6745_v18 }
  0xc7   :  { %v6198_v19 = vld [vmem:[#allocation5 + $0xba0] sm:$0xf0] }
  0xc8   :  { %v7458_v20 = vld [vmem:[#allocation5 + $0xd84] sm:$0xf]  ;;  %v6201_v25 = vor.u32 %v7394_v17, %v6198_v19  ;;  %3397 = vmatpush.bf16.msrb.mxu0 %v5945_v24 }
  0xc9   :  { %v6454_v21 = vld [vmem:[#allocation5 + $0xda0] sm:$0xf0] }
  0xca   :  { %v7522_v22 = vld [vmem:[#allocation5 + $0xf84] sm:$0xf]  ;;  %v6457_v26 = vor.u32 %v7458_v20, %v6454_v21  ;;  %3410 = vmatpush.bf16.msrb.mxu1 %v6201_v25 }
  0xcb   :  { %v6710_v23 = vld [vmem:[#allocation5 + $0xfa0] sm:$0xf0] }
  0xcc   :  { %v7322_v27 = vld [vmem:[#allocation5 + $0x944] sm:$0xf]  ;;  %v6713_v30 = vor.u32 %v7522_v22, %v6710_v23  ;;  %3423 = vmatpush.bf16.msrb.mxu2 %v6457_v26 }
  0xcd   :  { %v5910_v28 = vld [vmem:[#allocation5 + $0x960] sm:$0xf0] }
  0xce   :  { %v7386_v29 = vld [vmem:[#allocation5 + $0xb44] sm:$0xf]  ;;  %v5913_v36 = vor.u32 %v7322_v27, %v5910_v28  ;;  %3436 = vmatpush.bf16.msrb.mxu3 %v6713_v30 }
  0xcf   :  { %v6166_v31 = vld [vmem:[#allocation5 + $0xb60] sm:$0xf0] }
  0xd0   :  { %v7450_v32 = vld [vmem:[#allocation5 + $0xd44] sm:$0xf]  ;;  %v6169_v37 = vor.u32 %v7386_v29, %v6166_v31  ;;  %3398 = vmatpush.bf16.msrb.mxu0 %v5913_v36 }
  0xd1   :  { %v6422_v33 = vld [vmem:[#allocation5 + $0xd60] sm:$0xf0] }
  0xd2   :  { %v7514_v34 = vld [vmem:[#allocation5 + $0xf44] sm:$0xf]  ;;  %v6425_v38 = vor.u32 %v7450_v32, %v6422_v33  ;;  %3411 = vmatpush.bf16.msrb.mxu1 %v6169_v37 }
  0xd3   :  { %v6678_v35 = vld [vmem:[#allocation5 + $0xf60] sm:$0xf0] }
  0xd4   :  { %v7314_v39 = vld [vmem:[#allocation5 + $0x904] sm:$0xf]  ;;  %v6681_v42 = vor.u32 %v7514_v34, %v6678_v35  ;;  %3424 = vmatpush.bf16.msrb.mxu2 %v6425_v38 }
  0xd5   :  { %v5878_v40 = vld [vmem:[#allocation5 + $0x920] sm:$0xf0] }
  0xd6   :  { %v7378_v41 = vld [vmem:[#allocation5 + $0xb04] sm:$0xf]  ;;  %v5881_v52 = vor.u32 %v7314_v39, %v5878_v40  ;;  %3437 = vmatpush.bf16.msrb.mxu3 %v6681_v42  ;;  %v4956_v40 = vld [vmem:[#allocation5 + $0x1c8] sm:$0xf] }
  0xd7   :  { %v6134_v43 = vld [vmem:[#allocation5 + $0xb20] sm:$0xf0]  ;;  %v5212_v42 = vld [vmem:[#allocation5 + $0x3c8] sm:$0xf] }
  0xd8   :  { %v7442_v45 = vld [vmem:[#allocation5 + $0xd04] sm:$0xf]  ;;  %v6137_v53 = vor.u32 %v7378_v41, %v6134_v43  ;;  %3399 = vmatpush.bf16.msrb.mxu0 %v5881_v52  ;;  %v7087_v41 = vld [vmem:[#allocation5 + $0x1e4] sm:$0xf0] }
  0xd9   :  { %v6390_v48 = vld [vmem:[#allocation5 + $0xd20] sm:$0xf0] }
  0xda   :  { %v7506_v49 = vld [vmem:[#allocation5 + $0xf04] sm:$0xf]  ;;  %v6393_v56 = vor.u32 %v7442_v45, %v6390_v48  ;;  %3412 = vmatpush.bf16.msrb.mxu1 %v6137_v53  ;;  %v7151_v45 = vld [vmem:[#allocation5 + $0x3e4] sm:$0xf0] }
  0xdb   :  { %v6646_v50 = vld [vmem:[#allocation5 + $0xf20] sm:$0xf0]  ;;  %v5468_v48 = vld [vmem:[#allocation5 + $0x5c8] sm:$0xf] }
  0xdc   :  { %v7306_v57 = vld [vmem:[#allocation5 + $0x8c4] sm:$0xf]  ;;  %v6649_v62 = vor.u32 %v7506_v49, %v6646_v50  ;;  %3425 = vmatpush.bf16.msrb.mxu2 %v6393_v56  ;;  %v7215_v49 = vld [vmem:[#allocation5 + $0x5e4] sm:$0xf0] }
  0xdd   :  { %v5846_v60 = vld [vmem:[#allocation5 + $0x8e0] sm:$0xf0]  ;;  %v5724_v53 = vld [vmem:[#allocation5 + $0x7c8] sm:$0xf] }
  0xde   :  { %v7370_v61 = vld [vmem:[#allocation5 + $0xac4] sm:$0xf]  ;;  %v5849_v4 = vor.u32 %v7306_v57, %v5846_v60  ;;  %3438 = vmatpush.bf16.msrb.mxu3 %v6649_v62  ;;  %v7279_v56 = vld [vmem:[#allocation5 + $0x7e4] sm:$0xf0]  ;;  %v4957_v60 = vor.u32 %v7087_v41, %v4956_v40  ;;  %v5469_v62 = vor.u32 %v7215_v49, %v5468_v48 }
  0xdf   :  { %v6102_v63 = vld [vmem:[#allocation5 + $0xae0] sm:$0xf0]  ;;  %v5340_v40 = vld [vmem:[#allocation5 + $0x4c8] sm:$0xf] }
  0xe0   :  { %v7434_v0 = vld [vmem:[#allocation5 + $0xcc4] sm:$0xf]  ;;  %v6105_v5 = vor.u32 %v7370_v61, %v6102_v63  ;;  %3400 = vmatpush.bf16.msrb.mxu0 %v5849_v4  ;;  %v5213_v61 = vor.u32 %v7151_v45, %v5212_v42  ;;  %v4924_v63 = vld [vmem:[#allocation5 + $0x188] sm:$0xf] }
  0xe1   :  { %v6358_v1 = vld [vmem:[#allocation5 + $0xce0] sm:$0xf0]  ;;  %v5436_v4 = vld [vmem:[#allocation5 + $0x588] sm:$0xf] }
  0xe2   :  { %v7498_v2 = vld [vmem:[#allocation5 + $0xec4] sm:$0xf]  ;;  %v6361_v6 = vor.u32 %v7434_v0, %v6358_v1  ;;  %3413 = vmatpush.bf16.msrb.mxu1 %v6105_v5  ;;  %v7079_v0 = vld [vmem:[#allocation5 + $0x1a4] sm:$0xf0] }
  0xe3   :  { %v6614_v3 = vld [vmem:[#allocation5 + $0xee0] sm:$0xf0]  ;;  %v5180_v1 = vld [vmem:[#allocation5 + $0x388] sm:$0xf] }
  0xe4   :  { %v7298_v7 = vld [vmem:[#allocation5 + $0x884] sm:$0xf]  ;;  %v6617_v10 = vor.u32 %v7498_v2, %v6614_v3  ;;  %3426 = vmatpush.bf16.msrb.mxu2 %v6361_v6  ;;  %v5725_v2 = vor.u32 %v7279_v56, %v5724_v53  ;;  %v7143_v3 = vld [vmem:[#allocation5 + $0x3a4] sm:$0xf0] }
  0xe5   :  { %v5814_v8 = vld [vmem:[#allocation5 + $0x8a0] sm:$0xf0]  ;;  %v7207_v5 = vld [vmem:[#allocation5 + $0x5a4] sm:$0xf0] }
  0xe6   :  { %v7362_v9 = vld [vmem:[#allocation5 + $0xa84] sm:$0xf]  ;;  %v5817_v16 = vor.u32 %v7298_v7, %v5814_v8  ;;  %3439 = vmatpush.bf16.msrb.mxu3 %v6617_v10  ;;  %v5692_v6 = vld [vmem:[#allocation5 + $0x788] sm:$0xf]  ;;  %v4925_v8 = vor.u32 %v7079_v0, %v4924_v63  ;;  %v5437_v10 = vor.u32 %v7207_v5, %v5436_v4 }
  0xe7   :  { %v6070_v11 = vld [vmem:[#allocation5 + $0xaa0] sm:$0xf0]  ;;  %v7271_v7 = vld [vmem:[#allocation5 + $0x7a4] sm:$0xf0] }
  0xe8   :  { %v7426_v12 = vld [vmem:[#allocation5 + $0xc84] sm:$0xf]  ;;  %v6073_v17 = vor.u32 %v7362_v9, %v6070_v11  ;;  %3401 = vmatpush.bf16.msrb.mxu0 %v5817_v16  ;;  %v5181_v9 = vor.u32 %v7143_v3, %v5180_v1  ;;  %v4892_v11 = vld [vmem:[#allocation5 + $0x148] sm:$0xf] }
  0xe9   :  { %v6326_v13 = vld [vmem:[#allocation5 + $0xca0] sm:$0xf0]  ;;  %v5404_v16 = vld [vmem:[#allocation5 + $0x548] sm:$0xf] }
  0xea   :  { %v7490_v14 = vld [vmem:[#allocation5 + $0xe84] sm:$0xf]  ;;  %v6329_v18 = vor.u32 %v7426_v12, %v6326_v13  ;;  %3414 = vmatpush.bf16.msrb.mxu1 %v6073_v17  ;;  %v7071_v12 = vld [vmem:[#allocation5 + $0x164] sm:$0xf0] }
  0xeb   :  { %v6582_v15 = vld [vmem:[#allocation5 + $0xea0] sm:$0xf0]  ;;  %v5148_v13 = vld [vmem:[#allocation5 + $0x348] sm:$0xf] }
  0xec   :  { %v7290_v19 = vld [vmem:[#allocation5 + $0x844] sm:$0xf]  ;;  %v6585_v22 = vor.u32 %v7490_v14, %v6582_v15  ;;  %3427 = vmatpush.bf16.msrb.mxu2 %v6329_v18  ;;  %v5693_v14 = vor.u32 %v7271_v7, %v5692_v6  ;;  %v7135_v15 = vld [vmem:[#allocation5 + $0x364] sm:$0xf0] }
  0xed   :  { %v5782_v20 = vld [vmem:[#allocation5 + $0x860] sm:$0xf0]  ;;  %v7199_v17 = vld [vmem:[#allocation5 + $0x564] sm:$0xf0] }
  0xee   :  { %v7354_v21 = vld [vmem:[#allocation5 + $0xa44] sm:$0xf]  ;;  %v5785_v28 = vor.u32 %v7290_v19, %v5782_v20  ;;  %3440 = vmatpush.bf16.msrb.mxu3 %v6585_v22  ;;  %v5660_v18 = vld [vmem:[#allocation5 + $0x748] sm:$0xf]  ;;  %v4893_v20 = vor.u32 %v7071_v12, %v4892_v11  ;;  %v5405_v22 = vor.u32 %v7199_v17, %v5404_v16 }
  0xef   :  { %v6038_v23 = vld [vmem:[#allocation5 + $0xa60] sm:$0xf0]  ;;  %v7263_v19 = vld [vmem:[#allocation5 + $0x764] sm:$0xf0] }
  0xf0   :  { %v7418_v24 = vld [vmem:[#allocation5 + $0xc44] sm:$0xf]  ;;  %v6041_v31 = vor.u32 %v7354_v21, %v6038_v23  ;;  %3402 = vmatpush.bf16.msrb.mxu0 %v5785_v28  ;;  %v5149_v21 = vor.u32 %v7135_v15, %v5148_v13  ;;  %v4860_v23 = vld [vmem:[#allocation5 + $0x108] sm:$0xf] }
  0xf1   :  { %v6294_v25 = vld [vmem:[#allocation5 + $0xc60] sm:$0xf0]  ;;  %v5372_v28 = vld [vmem:[#allocation5 + $0x508] sm:$0xf] }
  0xf2   :  { %v7482_v26 = vld [vmem:[#allocation5 + $0xe44] sm:$0xf]  ;;  %v6297_v32 = vor.u32 %v7418_v24, %v6294_v25  ;;  %3415 = vmatpush.bf16.msrb.mxu1 %v6041_v31  ;;  %v7063_v24 = vld [vmem:[#allocation5 + $0x124] sm:$0xf0] }
  0xf3   :  { %v6550_v27 = vld [vmem:[#allocation5 + $0xe60] sm:$0xf0]  ;;  %v5116_v25 = vld [vmem:[#allocation5 + $0x308] sm:$0xf] }
  0xf4   :  { %v7282_v29 = vld [vmem:[#allocation5 + $0x804] sm:$0xf]  ;;  %v6553_v36 = vor.u32 %v7482_v26, %v6550_v27  ;;  %3428 = vmatpush.bf16.msrb.mxu2 %v6297_v32  ;;  %v5661_v26 = vor.u32 %v7263_v19, %v5660_v18  ;;  %v7127_v27 = vld [vmem:[#allocation5 + $0x324] sm:$0xf0]  ;;  %v4861_v32 = vor.u32 %v7063_v24, %v4860_v23 }
  0xf5   :  { %v5750_v30 = vld [vmem:[#allocation5 + $0x820] sm:$0xf0]  ;;  %v7255_v31 = vld [vmem:[#allocation5 + $0x724] sm:$0xf0] }
  0xf6   :  { %v7346_v33 = vld [vmem:[#allocation5 + $0xa04] sm:$0xf]  ;;  %v5753_v43 = vor.u32 %v7282_v29, %v5750_v30  ;;  %3441 = vmatpush.bf16.msrb.mxu3 %v6553_v36  ;;  %v7191_v29 = vld [vmem:[#allocation5 + $0x524] sm:$0xf0] }
  0xf7   :  { %v6006_v34 = vld [vmem:[#allocation5 + $0xa20] sm:$0xf0]  ;;  %v5628_v30 = vld [vmem:[#allocation5 + $0x708] sm:$0xf] }
  0xf8   :  { %v7410_v35 = vld [vmem:[#allocation5 + $0xc04] sm:$0xf]  ;;  %v6009_v50 = vor.u32 %v7346_v33, %v6006_v34  ;;  %3403 = vmatpush.bf16.msrb.mxu0 %v5753_v43  ;;  %v5117_v33 = vor.u32 %v7127_v27, %v5116_v25  ;;  %v5373_v34 = vor.u32 %v7191_v29, %v5372_v28  ;;  %v7055_v36 = vld [vmem:[#allocation5 + $0xe4] sm:$0xf0] }
  0xf9   :  { %v6262_v37 = vld [vmem:[#allocation5 + $0xc20] sm:$0xf0]  ;;  %v7183_v41 = vld [vmem:[#allocation5 + $0x4e4] sm:$0xf0] }
  0xfa   :  { %v7474_v38 = vld [vmem:[#allocation5 + $0xe04] sm:$0xf]  ;;  %v6265_v52 = vor.u32 %v7410_v35, %v6262_v37  ;;  %3416 = vmatpush.bf16.msrb.mxu1 %v6009_v50  ;;  %v4828_v35 = vld [vmem:[#allocation5 + $0xc8] sm:$0xf]  ;;  %v5341_v49 = vor.u32 %v7183_v41, %v5340_v40 }
  0xfb   :  { %v6518_v39 = vld [vmem:[#allocation5 + $0xe20] sm:$0xf0]  ;;  %3404 = vmatmul.bf16.vlgmr.msrb.gmra.mxu0 %v7844_v54  ;;  %v5084_v37 = vld [vmem:[#allocation5 + $0x2c8] sm:$0xf]  ;;  %v4829_v45 = vor.u32 %v7055_v36, %v4828_v35 }
  0xfc   :  { %v6521_v57 = vor.u32 %v7474_v38, %v6518_v39  ;;  %3429 = vmatpush.bf16.msrb.mxu2 %v6265_v52  ;;  %3448 = vmatpush.bf16.msra.mxu0 %v4957_v60  ;;  %v5629_v38 = vor.u32 %v7255_v31, %v5628_v30  ;;  %v7119_v39 = vld [vmem:[#allocation5 + $0x2e4] sm:$0xf0] }
  0xfd   :  { %3417 = vmatmul.bf16.vlgmr.msrb.gmra.mxu1 %v7848_v59  ;;  %v5596_v42 = vld [vmem:[#allocation5 + $0x6c8] sm:$0xf]  ;;  %v5085_v48 = vor.u32 %v7119_v39, %v5084_v37 }
  0xfe   :  { %3442 = vmatpush.bf16.msrb.mxu3 %v6521_v57  ;;  %3461 = vmatpush.bf16.msra.mxu1 %v5213_v61  ;;  %v7247_v43 = vld [vmem:[#allocation5 + $0x6e4] sm:$0xf0] }
  0xff   :  { %3430 = vmatmul.bf16.vlgmr.msrb.gmra.mxu2 %v7842_v44  ;;  %v4796_v50 = vld [vmem:[#allocation5 + $0x88] sm:$0xf]  ;;  %v5597_v56 = vor.u32 %v7247_v43, %v5596_v42 }
 0x100   :  { %3474 = vmatpush.bf16.msra.mxu2 %v5469_v62  ;;  %3449 = vmatpush.bf16.msra.mxu0 %v4925_v8  ;;  %v7047_v52 = vld [vmem:[#allocation5 + $0xa4] sm:$0xf0] }
 0x101   :  { %3443 = vmatmul.bf16.vlgmr.msrb.gmra.mxu3 %v7846_v58  ;;  %v5052_v53 = vld [vmem:[#allocation5 + $0x288] sm:$0xf]  ;;  %v4797_v0 = vor.u32 %v7047_v52, %v4796_v50 }
 0x102   :  { %3487 = vmatpush.bf16.msra.mxu3 %v5725_v2  ;;  %3462 = vmatpush.bf16.msra.mxu1 %v5181_v9  ;;  %v7111_v57 = vld [vmem:[#allocation5 + $0x2a4] sm:$0xf0] }
 0x103   :  { %v5308_v60 = vld [vmem:[#allocation5 + $0x488] sm:$0xf]  ;;  %v5053_v1 = vor.u32 %v7111_v57, %v5052_v53 }
 0x104   :  { %3475 = vmatpush.bf16.msra.mxu2 %v5437_v10  ;;  %3450 = vmatpush.bf16.msra.mxu0 %v4893_v20  ;;  %v7175_v61 = vld [vmem:[#allocation5 + $0x4a4] sm:$0xf0] }
 0x105   :  { %v5564_v62 = vld [vmem:[#allocation5 + $0x688] sm:$0xf]  ;;  %v5309_v2 = vor.u32 %v7175_v61, %v5308_v60 }
 0x106   :  { %3488 = vmatpush.bf16.msra.mxu3 %v5693_v14  ;;  %3463 = vmatpush.bf16.msra.mxu1 %v5149_v21  ;;  %v7239_v63 = vld [vmem:[#allocation5 + $0x6a4] sm:$0xf0] }
 0x107   :  { %v4764_v3 = vld [vmem:[#allocation5 + $0x48] sm:$0xf]  ;;  %v5565_v6 = vor.u32 %v7239_v63, %v5564_v62 }
 0x108   :  { %3476 = vmatpush.bf16.msra.mxu2 %v5405_v22  ;;  %3451 = vmatpush.bf16.msra.mxu0 %v4861_v32  ;;  %v7039_v4 = vld [vmem:[#allocation5 + $0x64] sm:$0xf0] }
 0x109   :  { %v5020_v5 = vld [vmem:[#allocation5 + $0x248] sm:$0xf]  ;;  %v4765_v12 = vor.u32 %v7039_v4, %v4764_v3 }
 0x10a   :  { %3489 = vmatpush.bf16.msra.mxu3 %v5661_v26  ;;  %3464 = vmatpush.bf16.msra.mxu1 %v5117_v33  ;;  %v7103_v7 = vld [vmem:[#allocation5 + $0x264] sm:$0xf0] }
 0x10b   :  { %v5276_v8 = vld [vmem:[#allocation5 + $0x448] sm:$0xf]  ;;  %v5021_v15 = vor.u32 %v7103_v7, %v5020_v5 }
 0x10c   :  { %3477 = vmatpush.bf16.msra.mxu2 %v5373_v34  ;;  %3452 = vmatpush.bf16.msra.mxu0 %v4829_v45  ;;  %v7167_v9 = vld [vmem:[#allocation5 + $0x464] sm:$0xf0] }
 0x10d   :  { %v5532_v10 = vld [vmem:[#allocation5 + $0x648] sm:$0xf]  ;;  %v5277_v16 = vor.u32 %v7167_v9, %v5276_v8 }
 0x10e   :  { %3490 = vmatpush.bf16.msra.mxu3 %v5629_v38  ;;  %3465 = vmatpush.bf16.msra.mxu1 %v5085_v48  ;;  %v7231_v11 = vld [vmem:[#allocation5 + $0x664] sm:$0xf0] }
 0x10f   :  { %v4732_v13 = vld [vmem:[#allocation5 + $0x8] sm:$0xf]  ;;  %v5533_v20 = vor.u32 %v7231_v11, %v5532_v10 }
 0x110   :  { %3478 = vmatpush.bf16.msra.mxu2 %v5341_v49  ;;  %3453 = vmatpush.bf16.msra.mxu0 %v4797_v0  ;;  %v7031_v14 = vld [vmem:[#allocation5 + $0x24] sm:$0xf0] }
 0x111   :  { %v4988_v17 = vld [vmem:[#allocation5 + $0x208] sm:$0xf]  ;;  %v4733_v27 = vor.u32 %v7031_v14, %v4732_v13 }
 0x112   :  { %3491 = vmatpush.bf16.msra.mxu3 %v5597_v56  ;;  %3466 = vmatpush.bf16.msra.mxu1 %v5053_v1  ;;  %v7095_v18 = vld [vmem:[#allocation5 + $0x224] sm:$0xf0] }
 0x113   :  { %v5244_v19 = vld [vmem:[#allocation5 + $0x408] sm:$0xf]  ;;  %v4989_v31 = vor.u32 %v7095_v18, %v4988_v17 }
 0x114   :  { %3479 = vmatpush.bf16.msra.mxu2 %v5309_v2  ;;  %v7159_v21 = vld [vmem:[#allocation5 + $0x424] sm:$0xf0]  ;;  %3454 = vmatpush.bf16.msra.mxu0 %v4765_v12 }
 0x115   :  { %v5500_v22 = vld [vmem:[#allocation5 + $0x608] sm:$0xf]  ;;  %v5245_v32 = vor.u32 %v7159_v21, %v5244_v19 }
 0x116   :  { %3492 = vmatpush.bf16.msra.mxu3 %v5565_v6  ;;  %v7223_v23 = vld [vmem:[#allocation5 + $0x624] sm:$0xf0]  ;;  %3467 = vmatpush.bf16.msra.mxu1 %v5021_v15 }
 0x117   :  { %v5980_v24 = vld [vmem:[#allocation5 + $0x9c8] sm:$0xf]  ;;  %v5501_v35 = vor.u32 %v7223_v23, %v5500_v22 }
 0x118   :  { %v7343_v25 = vld [vmem:[#allocation5 + $0x9e4] sm:$0xf0]  ;;  %3480 = vmatpush.bf16.msra.mxu2 %v5277_v16  ;;  %3455 = vmatpush.bf16.msra.mxu0 %v4733_v27 }
 0x119   :  { %v6236_v26 = vld [vmem:[#allocation5 + $0xbc8] sm:$0xf]  ;;  %v5981_v36 = vor.u32 %v7343_v25, %v5980_v24 }
 0x11a   :  { %v7407_v28 = vld [vmem:[#allocation5 + $0xbe4] sm:$0xf0]  ;;  %3493 = vmatpush.bf16.msra.mxu3 %v5533_v20  ;;  %3468 = vmatpush.bf16.msra.mxu1 %v4989_v31 }
 0x11b   :  { %v6492_v29 = vld [vmem:[#allocation5 + $0xdc8] sm:$0xf]  ;;  %v6237_v37 = vor.u32 %v7407_v28, %v6236_v26  ;;  %3456 = vmatmul.bf16.vlgmr.msra.gmra.mxu0 %v7832_v47 }
 0x11c   :  { %v7471_v30 = vld [vmem:[#allocation5 + $0xde4] sm:$0xf0]  ;;  %3481 = vmatpush.bf16.msra.mxu2 %v5245_v32  ;;  %3500 = vmatpush.bf16.msrb.mxu0 %v5981_v36 }
 0x11d   :  { %v6748_v33 = vld [vmem:[#allocation5 + $0xfc8] sm:$0xf]  ;;  %v6493_v38 = vor.u32 %v7471_v30, %v6492_v29  ;;  %3469 = vmatmul.bf16.vlgmr.msra.gmra.mxu1 %v7836_v55 }
 0x11e   :  { %v7535_v34 = vld [vmem:[#allocation5 + $0xfe4] sm:$0xf0]  ;;  %3494 = vmatpush.bf16.msra.mxu3 %v5501_v35  ;;  %3513 = vmatpush.bf16.msrb.mxu1 %v6237_v37 }
 0x11f   :  { %v5948_v39 = vld [vmem:[#allocation5 + $0x988] sm:$0xf]  ;;  %v6749_v42 = vor.u32 %v7535_v34, %v6748_v33  ;;  %3482 = vmatmul.bf16.vlgmr.msra.gmra.mxu2 %v7830_v46 }
 0x120   :  { %v7335_v40 = vld [vmem:[#allocation5 + $0x9a4] sm:$0xf0]  ;;  %3526 = vmatpush.bf16.msrb.mxu2 %v6493_v38 }
 0x121   :  { %v6204_v41 = vld [vmem:[#allocation5 + $0xb88] sm:$0xf]  ;;  %v5949_v52 = vor.u32 %v7335_v40, %v5948_v39  ;;  %3495 = vmatmul.bf16.vlgmr.msra.gmra.mxu3 %v7834_v51 }
 0x122   :  { %v7399_v43 = vld [vmem:[#allocation5 + $0xba4] sm:$0xf0]  ;;  %3539 = vmatpush.bf16.msrb.mxu3 %v6749_v42 }
 0x123   :  { %v6460_v45 = vld [vmem:[#allocation5 + $0xd88] sm:$0xf]  ;;  %v6205_v53 = vor.u32 %v7399_v43, %v6204_v41  ;;  %3501 = vmatpush.bf16.msrb.mxu0 %v5949_v52 }
 0x124   :  { %v7463_v48 = vld [vmem:[#allocation5 + $0xda4] sm:$0xf0] }
 0x125   :  { %v6716_v49 = vld [vmem:[#allocation5 + $0xf88] sm:$0xf]  ;;  %v6461_v56 = vor.u32 %v7463_v48, %v6460_v45  ;;  %3514 = vmatpush.bf16.msrb.mxu1 %v6205_v53 }
 0x126   :  { %v7527_v50 = vld [vmem:[#allocation5 + $0xfa4] sm:$0xf0] }
 0x127   :  { %v5916_v57 = vld [vmem:[#allocation5 + $0x948] sm:$0xf]  ;;  %v6717_v62 = vor.u32 %v7527_v50, %v6716_v49  ;;  %3527 = vmatpush.bf16.msrb.mxu2 %v6461_v56  ;;  %v7866_v56 = vld [vmem:[#allocation7] sm:$0xff] }
 0x128   :  { %v7327_v60 = vld [vmem:[#allocation5 + $0x964] sm:$0xf0] }
 0x129   :  { %v6172_v61 = vld [vmem:[#allocation5 + $0xb48] sm:$0xf]  ;;  %v5917_v4 = vor.u32 %v7327_v60, %v5916_v57  ;;  %3540 = vmatpush.bf16.msrb.mxu3 %v6717_v62 }
 0x12a   :  { %v7391_v63 = vld [vmem:[#allocation5 + $0xb64] sm:$0xf0] }
 0x12b   :  { %v6428_v0 = vld [vmem:[#allocation5 + $0xd48] sm:$0xf]  ;;  %v6173_v5 = vor.u32 %v7391_v63, %v6172_v61  ;;  %3502 = vmatpush.bf16.msrb.mxu0 %v5917_v4 }
 0x12c   :  { %v7455_v1 = vld [vmem:[#allocation5 + $0xd64] sm:$0xf0] }
 0x12d   :  { %v6684_v2 = vld [vmem:[#allocation5 + $0xf48] sm:$0xf]  ;;  %v6429_v6 = vor.u32 %v7455_v1, %v6428_v0  ;;  %3515 = vmatpush.bf16.msrb.mxu1 %v6173_v5  ;;  %v664_v5 = vperm.slane %v7866_v56, 0 }
 0x12e   :  { %v7519_v3 = vld [vmem:[#allocation5 + $0xf64] sm:$0xf0] }
 0x12f   :  { %v5884_v7 = vld [vmem:[#allocation5 + $0x908] sm:$0xf]  ;;  %v6685_v10 = vor.u32 %v7519_v3, %v6684_v2  ;;  %3528 = vmatpush.bf16.msrb.mxu2 %v6429_v6 }
 0x130   :  { %v7319_v8 = vld [vmem:[#allocation5 + $0x924] sm:$0xf0] }
 0x131   :  { %v6140_v9 = vld [vmem:[#allocation5 + $0xb08] sm:$0xf]  ;;  %v5885_v16 = vor.u32 %v7319_v8, %v5884_v7  ;;  %3541 = vmatpush.bf16.msrb.mxu3 %v6685_v10  ;;  %v7083_v10 = vld [vmem:[#allocation5 + $0x1cc] sm:$0xf] }
 0x132   :  { %v7383_v11 = vld [vmem:[#allocation5 + $0xb24] sm:$0xf0] }
 0x133   :  { %v6396_v12 = vld [vmem:[#allocation5 + $0xd08] sm:$0xf]  ;;  %v6141_v17 = vor.u32 %v7383_v11, %v6140_v9  ;;  %3503 = vmatpush.bf16.msrb.mxu0 %v5885_v16  ;;  %v4958_v11 = vld [vmem:[#allocation5 + $0x1e8] sm:$0xf0] }
 0x134   :  { %v7447_v13 = vld [vmem:[#allocation5 + $0xd24] sm:$0xf0]  ;;  %v5470_v16 = vld [vmem:[#allocation5 + $0x5e8] sm:$0xf0] }
 0x135   :  { %v6652_v14 = vld [vmem:[#allocation5 + $0xf08] sm:$0xf]  ;;  %v6397_v18 = vor.u32 %v7447_v13, %v6396_v12  ;;  %3516 = vmatpush.bf16.msrb.mxu1 %v6141_v17  ;;  %v7147_v12 = vld [vmem:[#allocation5 + $0x3cc] sm:$0xf]  ;;  %v3249_v17 = vpop.f32.mrf.mxu0 }
 0x136   :  { %v7511_v15 = vld [vmem:[#allocation5 + $0xf24] sm:$0xf0] }
 0x137   :  { %v5852_v19 = vld [vmem:[#allocation5 + $0x8c8] sm:$0xf]  ;;  %v6653_v22 = vor.u32 %v7511_v15, %v6652_v14  ;;  %3529 = vmatpush.bf16.msrb.mxu2 %v6397_v18  ;;  %v5214_v14 = vld [vmem:[#allocation5 + $0x3e8] sm:$0xf0] }
 0x138   :  { %v7311_v20 = vld [vmem:[#allocation5 + $0x8e4] sm:$0xf0]  ;;  %v7211_v15 = vld [vmem:[#allocation5 + $0x5cc] sm:$0xf] }
 0x139   :  { %v6108_v21 = vld [vmem:[#allocation5 + $0xac8] sm:$0xf]  ;;  %v5853_v28 = vor.u32 %v7311_v20, %v5852_v19  ;;  %3542 = vmatpush.bf16.msrb.mxu3 %v6653_v22  ;;  %v7275_v20 = vld [vmem:[#allocation5 + $0x7cc] sm:$0xf]  ;;  %v3250_v22 = vadd.f32 %v3249_v17, %v664_v5 }
 0x13a   :  { %v7375_v23 = vld [vmem:[#allocation5 + $0xae4] sm:$0xf0]  ;;  %v4862_v5 = vld [vmem:[#allocation5 + $0x128] sm:$0xf0] }
 0x13b   :  { %v6364_v24 = vld [vmem:[#allocation5 + $0xcc8] sm:$0xf]  ;;  %v6109_v29 = vor.u32 %v7375_v23, %v6108_v21  ;;  %3504 = vmatpush.bf16.msrb.mxu0 %v5853_v28  ;;  %v5726_v21 = vld [vmem:[#allocation5 + $0x7e8] sm:$0xf0]  ;;  %v3262_v23 = vpop.f32.mrf.mxu1 }
 0x13c   :  { %v7439_v25 = vld [vmem:[#allocation5 + $0xce4] sm:$0xf0]  ;;  %v7075_v28 = vld [vmem:[#allocation5 + $0x18c] sm:$0xf] }
 0x13d   :  { %v6620_v26 = vld [vmem:[#allocation5 + $0xec8] sm:$0xf]  ;;  %v6365_v30 = vor.u32 %v7439_v25, %v6364_v24  ;;  %3517 = vmatpush.bf16.msrb.mxu1 %v6109_v29  ;;  %v4961_v25 = vor.u32 %v7083_v10, %v4958_v11  ;;  %v4926_v29 = vld [vmem:[#allocation5 + $0x1a8] sm:$0xf0] }
 0x13e   :  { %v7503_v27 = vld [vmem:[#allocation5 + $0xee4] sm:$0xf0]  ;;  %v5374_v10 = vld [vmem:[#allocation5 + $0x528] sm:$0xf0] }
 0x13f   :  { %v5820_v31 = vld [vmem:[#allocation5 + $0x888] sm:$0xf]  ;;  %v6621_v34 = vor.u32 %v7503_v27, %v6620_v26  ;;  %3530 = vmatpush.bf16.msrb.mxu2 %v6365_v30  ;;  %v5217_v26 = vor.u32 %v7147_v12, %v5214_v14  ;;  %v5473_v27 = vor.u32 %v7211_v15, %v5470_v16  ;;  %v7139_v30 = vld [vmem:[#allocation5 + $0x38c] sm:$0xf] }
 0x140   :  { %v7303_v32 = vld [vmem:[#allocation5 + $0x8a4] sm:$0xf0]  ;;  %v7251_v11 = vld [vmem:[#allocation5 + $0x70c] sm:$0xf] }
 0x141   :  { %v6076_v33 = vld [vmem:[#allocation5 + $0xa88] sm:$0xf]  ;;  %v5821_v40 = vor.u32 %v7303_v32, %v5820_v31  ;;  %3543 = vmatpush.bf16.msrb.mxu3 %v6621_v34  ;;  %v3263_v31 = vadd.f32 %v3262_v23, %v3250_v22  ;;  %v5729_v32 = vor.u32 %v7275_v20, %v5726_v21  ;;  %v7203_v34 = vld [vmem:[#allocation5 + $0x58c] sm:$0xf] }
 0x142   :  { %v7367_v35 = vld [vmem:[#allocation5 + $0xaa4] sm:$0xf0]  ;;  %v5630_v12 = vld [vmem:[#allocation5 + $0x728] sm:$0xf0] }
 0x143   :  { %v6332_v36 = vld [vmem:[#allocation5 + $0xc88] sm:$0xf]  ;;  %v6077_v42 = vor.u32 %v7367_v35, %v6076_v33  ;;  %3505 = vmatpush.bf16.msrb.mxu0 %v5821_v40  ;;  %v5182_v33 = vld [vmem:[#allocation5 + $0x3a8] sm:$0xf0]  ;;  %v5633_v21 = vor.u32 %v7251_v11, %v5630_v12 }
 0x144   :  { %v7431_v37 = vld [vmem:[#allocation5 + $0xca4] sm:$0xf0]  ;;  %v5438_v35 = vld [vmem:[#allocation5 + $0x5a8] sm:$0xf0] }
 0x145   :  { %v6588_v38 = vld [vmem:[#allocation5 + $0xe88] sm:$0xf]  ;;  %v6333_v43 = vor.u32 %v7431_v37, %v6332_v36  ;;  %3518 = vmatpush.bf16.msrb.mxu1 %v6077_v42  ;;  %v7267_v36 = vld [vmem:[#allocation5 + $0x78c] sm:$0xf]  ;;  %v5185_v42 = vor.u32 %v7139_v30, %v5182_v33 }
 0x146   :  { %v7495_v39 = vld [vmem:[#allocation5 + $0xea4] sm:$0xf0]  ;;  %v5694_v37 = vld [vmem:[#allocation5 + $0x7a8] sm:$0xf0] }
 0x147   :  { %v5788_v41 = vld [vmem:[#allocation5 + $0x848] sm:$0xf]  ;;  %v6589_v50 = vor.u32 %v7495_v39, %v6588_v38  ;;  %3531 = vmatpush.bf16.msrb.mxu2 %v6333_v43  ;;  %v3275_v38 = vpop.f32.mrf.mxu2  ;;  %v4929_v39 = vor.u32 %v7075_v28, %v4926_v29  ;;  %v5441_v43 = vor.u32 %v7203_v34, %v5438_v35  ;;  %v7115_v20 = vld [vmem:[#allocation5 + $0x2cc] sm:$0xf] }
 0x148   :  { %v7295_v45 = vld [vmem:[#allocation5 + $0x864] sm:$0xf0]  ;;  %v3276_v40 = vadd.f32 %v3275_v38, %v3263_v31  ;;  %v5086_v22 = vld [vmem:[#allocation5 + $0x2e8] sm:$0xf0] }
 0x149   :  { %v6044_v48 = vld [vmem:[#allocation5 + $0xa48] sm:$0xf]  ;;  %v5789_v61 = vor.u32 %v7295_v45, %v5788_v41  ;;  %3544 = vmatpush.bf16.msrb.mxu3 %v6589_v50  ;;  %v3288_v41 = vpop.f32.mrf.mxu3  ;;  %v7067_v45 = vld [vmem:[#allocation5 + $0x14c] sm:$0xf]  ;;  %v5697_v50 = vor.u32 %v7267_v36, %v5694_v37  ;;  %v5089_v31 = vor.u32 %v7115_v20, %v5086_v22 }
 0x14a   :  { %v7359_v49 = vld [vmem:[#allocation5 + $0xa64] sm:$0xf0]  ;;  %v7179_v23 = vld [vmem:[#allocation5 + $0x4cc] sm:$0xf] }
 0x14b   :  { %v6300_v52 = vld [vmem:[#allocation5 + $0xc48] sm:$0xf]  ;;  %v6045_v1 = vor.u32 %v7359_v49, %v6044_v48  ;;  %3506 = vmatpush.bf16.msrb.mxu0 %v5789_v61  ;;  %v4894_v48 = vld [vmem:[#allocation5 + $0x168] sm:$0xf0]  ;;  %v3251_v61 = vpop.f32.mrf.mxu0 }
 0x14c   :  { %v7423_v53 = vld [vmem:[#allocation5 + $0xc64] sm:$0xf0]  ;;  %v7131_v49 = vld [vmem:[#allocation5 + $0x34c] sm:$0xf] }
 0x14d   :  { %v6556_v57 = vld [vmem:[#allocation5 + $0xe48] sm:$0xf]  ;;  %v6301_v2 = vor.u32 %v7423_v53, %v6300_v52  ;;  %3519 = vmatpush.bf16.msrb.mxu1 %v6045_v1  ;;  %v5150_v52 = vld [vmem:[#allocation5 + $0x368] sm:$0xf0]  ;;  %v4897_v1 = vor.u32 %v7067_v45, %v4894_v48 }
 0x14e   :  { %v7487_v60 = vld [vmem:[#allocation5 + $0xe64] sm:$0xf0]  ;;  %v7195_v53 = vld [vmem:[#allocation5 + $0x54c] sm:$0xf] }
 0x14f   :  { %v5756_v62 = vld [vmem:[#allocation5 + $0x808] sm:$0xf]  ;;  %v6557_v6 = vor.u32 %v7487_v60, %v6556_v57  ;;  %3532 = vmatpush.bf16.msrb.mxu2 %v6301_v2  ;;  %v5406_v57 = vld [vmem:[#allocation5 + $0x568] sm:$0xf0]  ;;  %v3289_v60 = vadd.f32 %v3288_v41, %v3276_v40  ;;  %v5153_v2 = vor.u32 %v7131_v49, %v5150_v52 }
 0x150   :  { %v7287_v63 = vld [vmem:[#allocation5 + $0x824] sm:$0xf0]  ;;  %v7043_v33 = vld [vmem:[#allocation5 + $0x8c] sm:$0xf] }
 0x151   :  { %v6012_v0 = vld [vmem:[#allocation5 + $0xa08] sm:$0xf]  ;;  %v5757_v13 = vor.u32 %v7287_v63, %v5756_v62  ;;  %3545 = vmatpush.bf16.msrb.mxu3 %v6557_v6  ;;  %v7259_v62 = vld [vmem:[#allocation5 + $0x74c] sm:$0xf]  ;;  %v3290_v15 = vpop.f32.mrf.mxu3 }
 0x152   :  { %v7351_v3 = vld [vmem:[#allocation5 + $0xa24] sm:$0xf0]  ;;  %v5662_v63 = vld [vmem:[#allocation5 + $0x768] sm:$0xf0] }
 0x153   :  { %v6268_v4 = vld [vmem:[#allocation5 + $0xc08] sm:$0xf]  ;;  %v6013_v18 = vor.u32 %v7351_v3, %v6012_v0  ;;  %3507 = vmatpush.bf16.msrb.mxu0 %v5757_v13  ;;  %v3264_v0 = vpop.f32.mrf.mxu1  ;;  %v5409_v3 = vor.u32 %v7195_v53, %v5406_v57  ;;  %v7123_v6 = vld [vmem:[#allocation5 + $0x30c] sm:$0xf]  ;;  %v3277_v13 = vpop.f32.mrf.mxu2 }
 0x154   :  { %v7415_v7 = vld [vmem:[#allocation5 + $0xc24] sm:$0xf0]  ;;  %v4798_v34 = vld [vmem:[#allocation5 + $0xa8] sm:$0xf0] }
 0x155   :  { %v6524_v8 = vld [vmem:[#allocation5 + $0xe08] sm:$0xf]  ;;  %v6269_v19 = vor.u32 %v7415_v7, %v6268_v4  ;;  %3520 = vmatpush.bf16.msrb.mxu1 %v6013_v18  ;;  %v7059_v4 = vld [vmem:[#allocation5 + $0x10c] sm:$0xf]  ;;  %v5665_v7 = vor.u32 %v7259_v62, %v5662_v63  ;;  %v4801_v45 = vor.u32 %v7043_v33, %v4798_v34 }
 0x156   :  { %v7479_v9 = vld [vmem:[#allocation5 + $0xe24] sm:$0xf0]  ;;  %3508 = vmatmul.bf16.vlgmr.msrb.gmra.mxu0 %v7844_v54  ;;  %v4865_v14 = vor.u32 %v7059_v4, %v4862_v5  ;;  %v7051_v18 = vld [vmem:[#allocation5 + $0xcc] sm:$0xf] }
 0x157   :  { %v6525_v24 = vor.u32 %v7479_v9, %v6524_v8  ;;  %3533 = vmatpush.bf16.msrb.mxu2 %v6269_v19  ;;  %3552 = vmatpush.bf16.msra.mxu0 %v4961_v25  ;;  %v5118_v8 = vld [vmem:[#allocation5 + $0x328] sm:$0xf0] }
 0x158   :  { %3521 = vmatmul.bf16.vlgmr.msrb.gmra.mxu1 %v7848_v59  ;;  %v7187_v9 = vld [vmem:[#allocation5 + $0x50c] sm:$0xf]  ;;  %v5121_v16 = vor.u32 %v7123_v6, %v5118_v8 }
 0x159   :  { %3546 = vmatpush.bf16.msrb.mxu3 %v6525_v24  ;;  %3565 = vmatpush.bf16.msra.mxu1 %v5217_v26  ;;  %v5377_v17 = vor.u32 %v7187_v9, %v5374_v10  ;;  %v4830_v19 = vld [vmem:[#allocation5 + $0xe8] sm:$0xf0]  ;;  %v3340_v0 = vpop.f32.mrf.mxu3 }
 0x15a   :  { %3534 = vmatmul.bf16.vlgmr.msrb.gmra.mxu2 %v7842_v44  ;;  %v5342_v24 = vld [vmem:[#allocation5 + $0x4e8] sm:$0xf0]  ;;  %v4833_v28 = vor.u32 %v7051_v18, %v4830_v19 }
 0x15b   :  { %3578 = vmatpush.bf16.msra.mxu2 %v5473_v27  ;;  %3553 = vmatpush.bf16.msra.mxu0 %v4929_v39  ;;  %v7243_v25 = vld [vmem:[#allocation5 + $0x6cc] sm:$0xf]  ;;  %v3301_v27 = vpop.f32.mrf.mxu0  ;;  %v3314_v30 = vpop.f32.mrf.mxu1 }
 0x15c   :  { %3547 = vmatmul.bf16.vlgmr.msrb.gmra.mxu3 %v7846_v58  ;;  %v5598_v26 = vld [vmem:[#allocation5 + $0x6e8] sm:$0xf0]  ;;  %v3302_v29 = vadd.f32 %v3301_v27, %v3289_v60 }
 0x15d   :  { %3591 = vmatpush.bf16.msra.mxu3 %v5729_v32  ;;  %3566 = vmatpush.bf16.msra.mxu1 %v5185_v42  ;;  %v5345_v32 = vor.u32 %v7179_v23, %v5342_v24  ;;  %v7107_v35 = vld [vmem:[#allocation5 + $0x28c] sm:$0xf]  ;;  %v5601_v36 = vor.u32 %v7243_v25, %v5598_v26 }
 0x15e   :  { %v5054_v37 = vld [vmem:[#allocation5 + $0x2a8] sm:$0xf0]  ;;  %v3315_v40 = vadd.f32 %v3314_v30, %v3302_v29 }
 0x15f   :  { %3579 = vmatpush.bf16.msra.mxu2 %v5441_v43  ;;  %3554 = vmatpush.bf16.msra.mxu0 %v4897_v1  ;;  %v7171_v38 = vld [vmem:[#allocation5 + $0x48c] sm:$0xf]  ;;  %v3327_v43 = vpop.f32.mrf.mxu2  ;;  %v5057_v49 = vor.u32 %v7107_v35, %v5054_v37 }
 0x160   :  { %v5310_v39 = vld [vmem:[#allocation5 + $0x4a8] sm:$0xf0]  ;;  %v3328_v48 = vadd.f32 %v3327_v43, %v3315_v40 }
 0x161   :  { %3592 = vmatpush.bf16.msra.mxu3 %v5697_v50  ;;  %3567 = vmatpush.bf16.msra.mxu1 %v5153_v2  ;;  %v7235_v41 = vld [vmem:[#allocation5 + $0x68c] sm:$0xf]  ;;  %v5313_v50 = vor.u32 %v7171_v38, %v5310_v39 }
 0x162   :  { %v5566_v42 = vld [vmem:[#allocation5 + $0x6a8] sm:$0xf0] }
 0x163   :  { %3580 = vmatpush.bf16.msra.mxu2 %v5409_v3  ;;  %3555 = vmatpush.bf16.msra.mxu0 %v4865_v14  ;;  %v7035_v52 = vld [vmem:[#allocation5 + $0x4c] sm:$0xf]  ;;  %v5569_v60 = vor.u32 %v7235_v41, %v5566_v42  ;;  %v7873_v3 = vadd.f32 %v3340_v0, %v3328_v48  ;;  %v3303_v4 = vpop.f32.mrf.mxu0  ;;  %v3316_v8 = vpop.f32.mrf.mxu1 }
 0x164   :  { %v4766_v53 = vld [vmem:[#allocation5 + $0x68] sm:$0xf0]  ;;  %v665_v8 = vperm.slane %v7866_v56, 1 }
 0x165   :  { %3593 = vmatpush.bf16.msra.mxu3 %v5665_v7  ;;  %3568 = vmatpush.bf16.msra.mxu1 %v5121_v16  ;;  %v7099_v57 = vld [vmem:[#allocation5 + $0x24c] sm:$0xf]  ;;  %v4769_v5 = vor.u32 %v7035_v52, %v4766_v53 }
 0x166   :  { %v5022_v61 = vld [vmem:[#allocation5 + $0x268] sm:$0xf0] }
 0x167   :  { %3581 = vmatpush.bf16.msra.mxu2 %v5377_v17  ;;  %3556 = vmatpush.bf16.msra.mxu0 %v4833_v28  ;;  %v7163_v62 = vld [vmem:[#allocation5 + $0x44c] sm:$0xf]  ;;  %v5025_v9 = vor.u32 %v7099_v57, %v5022_v61 }
 0x168   :  { %v5278_v63 = vld [vmem:[#allocation5 + $0x468] sm:$0xf0] }
 0x169   :  { %3594 = vmatpush.bf16.msra.mxu3 %v5633_v21  ;;  %3569 = vmatpush.bf16.msra.mxu1 %v5089_v31  ;;  %v7227_v1 = vld [vmem:[#allocation5 + $0x64c] sm:$0xf]  ;;  %v5281_v10 = vor.u32 %v7163_v62, %v5278_v63  ;;  %v3329_v21 = vpop.f32.mrf.mxu2 }
 0x16a   :  { %v5534_v2 = vld [vmem:[#allocation5 + $0x668] sm:$0xf0] }
 0x16b   :  { %3582 = vmatpush.bf16.msra.mxu2 %v5345_v32  ;;  %3557 = vmatpush.bf16.msra.mxu0 %v4801_v45  ;;  %v7027_v6 = vld [vmem:[#allocation5 + $0xc] sm:$0xf]  ;;  %v5537_v14 = vor.u32 %v7227_v1, %v5534_v2  ;;  %v3342_v32 = vpop.f32.mrf.mxu3 }
 0x16c   :  { %v4734_v7 = vld [vmem:[#allocation5 + $0x28] sm:$0xf0] }
 0x16d   :  { %3595 = vmatpush.bf16.msra.mxu3 %v5601_v36  ;;  %3570 = vmatpush.bf16.msra.mxu1 %v5057_v49  ;;  %v7091_v11 = vld [vmem:[#allocation5 + $0x20c] sm:$0xf]  ;;  %v4737_v22 = vor.u32 %v7027_v6, %v4734_v7 }
 0x16e   :  { %v4990_v12 = vld [vmem:[#allocation5 + $0x228] sm:$0xf0] }
 0x16f   :  { %3583 = vmatpush.bf16.msra.mxu2 %v5313_v50  ;;  %v7155_v13 = vld [vmem:[#allocation5 + $0x40c] sm:$0xf]  ;;  %3558 = vmatpush.bf16.msra.mxu0 %v4769_v5  ;;  %v4993_v26 = vor.u32 %v7091_v11, %v4990_v12 }
 0x170   :  { %v5246_v15 = vld [vmem:[#allocation5 + $0x428] sm:$0xf0] }
 0x171   :  { %3596 = vmatpush.bf16.msra.mxu3 %v5569_v60  ;;  %v7219_v16 = vld [vmem:[#allocation5 + $0x60c] sm:$0xf]  ;;  %3571 = vmatpush.bf16.msra.mxu1 %v5025_v9  ;;  %v5249_v27 = vor.u32 %v7155_v13, %v5246_v15 }
 0x172   :  { %v5502_v17 = vld [vmem:[#allocation5 + $0x628] sm:$0xf0] }
 0x173   :  { %v7339_v18 = vld [vmem:[#allocation5 + $0x9cc] sm:$0xf]  ;;  %3584 = vmatpush.bf16.msra.mxu2 %v5281_v10  ;;  %v5505_v30 = vor.u32 %v7219_v16, %v5502_v17  ;;  %3559 = vmatpush.bf16.msra.mxu0 %v4737_v22  ;;  %v3353_v16 = vpop.f32.mrf.mxu0 }
 0x174   :  { %v5982_v19 = vld [vmem:[#allocation5 + $0x9e8] sm:$0xf0]  ;;  %v3354_v22 = vadd.f32 %v3353_v16, %v665_v8 }
 0x175   :  { %v7403_v20 = vld [vmem:[#allocation5 + $0xbcc] sm:$0xf]  ;;  %3597 = vmatpush.bf16.msra.mxu3 %v5537_v14  ;;  %v5985_v31 = vor.u32 %v7339_v18, %v5982_v19  ;;  %3572 = vmatpush.bf16.msra.mxu1 %v4993_v26 }
 0x176   :  { %v6238_v23 = vld [vmem:[#allocation5 + $0xbe8] sm:$0xf0]  ;;  %3560 = vmatmul.bf16.vlgmr.msra.gmra.mxu0 %v7832_v47 }
 0x177   :  { %v7467_v24 = vld [vmem:[#allocation5 + $0xdcc] sm:$0xf]  ;;  %v6241_v33 = vor.u32 %v7403_v20, %v6238_v23  ;;  %3585 = vmatpush.bf16.msra.mxu2 %v5249_v27  ;;  %3604 = vmatpush.bf16.msrb.mxu0 %v5985_v31  ;;  %v3366_v23 = vpop.f32.mrf.mxu1 }
 0x178   :  { %v6494_v25 = vld [vmem:[#allocation5 + $0xde8] sm:$0xf0]  ;;  %3573 = vmatmul.bf16.vlgmr.msra.gmra.mxu1 %v7836_v55 }
 0x179   :  { %v7531_v28 = vld [vmem:[#allocation5 + $0xfcc] sm:$0xf]  ;;  %v6497_v34 = vor.u32 %v7467_v24, %v6494_v25  ;;  %3598 = vmatpush.bf16.msra.mxu3 %v5505_v30  ;;  %3617 = vmatpush.bf16.msrb.mxu1 %v6241_v33 }
 0x17a   :  { %v6750_v29 = vld [vmem:[#allocation5 + $0xfe8] sm:$0xf0]  ;;  %3586 = vmatmul.bf16.vlgmr.msra.gmra.mxu2 %v7830_v46 }
 0x17b   :  { %v7331_v35 = vld [vmem:[#allocation5 + $0x98c] sm:$0xf]  ;;  %v6753_v38 = vor.u32 %v7531_v28, %v6750_v29  ;;  %3630 = vmatpush.bf16.msrb.mxu2 %v6497_v34  ;;  %v3367_v29 = vadd.f32 %v3366_v23, %v3354_v22  ;;  %v5220_v22 = vld [vmem:[#allocation5 + $0x3d0] sm:$0xf] }
 0x17c   :  { %v5950_v36 = vld [vmem:[#allocation5 + $0x9a8] sm:$0xf0]  ;;  %3599 = vmatmul.bf16.vlgmr.msra.gmra.mxu3 %v7834_v51 }
 0x17d   :  { %v7395_v37 = vld [vmem:[#allocation5 + $0xb8c] sm:$0xf]  ;;  %v5953_v45 = vor.u32 %v7331_v35, %v5950_v36  ;;  %3643 = vmatpush.bf16.msrb.mxu3 %v6753_v38  ;;  %v3379_v36 = vpop.f32.mrf.mxu2 }
 0x17e   :  { %v6206_v39 = vld [vmem:[#allocation5 + $0xba8] sm:$0xf0] }
 0x17f   :  { %v7459_v40 = vld [vmem:[#allocation5 + $0xd8c] sm:$0xf]  ;;  %v6209_v48 = vor.u32 %v7395_v37, %v6206_v39  ;;  %3605 = vmatpush.bf16.msrb.mxu0 %v5953_v45 }
 0x180   :  { %v6462_v41 = vld [vmem:[#allocation5 + $0xda8] sm:$0xf0] }
 0x181   :  { %v7523_v42 = vld [vmem:[#allocation5 + $0xf8c] sm:$0xf]  ;;  %v6465_v49 = vor.u32 %v7459_v40, %v6462_v41  ;;  %3618 = vmatpush.bf16.msrb.mxu1 %v6209_v48  ;;  %v3380_v41 = vadd.f32 %v3379_v36, %v3367_v29  ;;  %v7280_v29 = vld [vmem:[#allocation5 + $0x7ec] sm:$0xf0] }
 0x182   :  { %v6718_v43 = vld [vmem:[#allocation5 + $0xfa8] sm:$0xf0]  ;;  %v5188_v36 = vld [vmem:[#allocation5 + $0x390] sm:$0xf] }
 0x183   :  { %v7323_v50 = vld [vmem:[#allocation5 + $0x94c] sm:$0xf]  ;;  %v6721_v57 = vor.u32 %v7523_v42, %v6718_v43  ;;  %3631 = vmatpush.bf16.msrb.mxu2 %v6465_v49  ;;  %v3392_v42 = vpop.f32.mrf.mxu3 }
 0x184   :  { %v5918_v52 = vld [vmem:[#allocation5 + $0x968] sm:$0xf0]  ;;  %v7880_v49 = vadd.f32 %v3392_v42, %v3380_v41  ;;  %v5700_v41 = vld [vmem:[#allocation5 + $0x790] sm:$0xf] }
 0x185   :  { %v7387_v53 = vld [vmem:[#allocation5 + $0xb4c] sm:$0xf]  ;;  %v5921_v1 = vor.u32 %v7323_v50, %v5918_v52  ;;  %3644 = vmatpush.bf16.msrb.mxu3 %v6721_v57  ;;  %v3355_v50 = vpop.f32.mrf.mxu0  ;;  %v7272_v42 = vld [vmem:[#allocation5 + $0x7ac] sm:$0xf0] }
 0x186   :  { %v6174_v60 = vld [vmem:[#allocation5 + $0xb68] sm:$0xf0]  ;;  %v4900_v50 = vld [vmem:[#allocation5 + $0x150] sm:$0xf] }
 0x187   :  { %v7451_v61 = vld [vmem:[#allocation5 + $0xd4c] sm:$0xf]  ;;  %v6177_v4 = vor.u32 %v7387_v53, %v6174_v60  ;;  %3606 = vmatpush.bf16.msrb.mxu0 %v5921_v1 }
 0x188   :  { %v6430_v62 = vld [vmem:[#allocation5 + $0xd68] sm:$0xf0] }
 0x189   :  { %v7515_v63 = vld [vmem:[#allocation5 + $0xf4c] sm:$0xf]  ;;  %v6433_v5 = vor.u32 %v7451_v61, %v6430_v62  ;;  %3619 = vmatpush.bf16.msrb.mxu1 %v6177_v4  ;;  %v3368_v62 = vpop.f32.mrf.mxu1 }
 0x18a   :  { %v6686_v0 = vld [vmem:[#allocation5 + $0xf68] sm:$0xf0]  ;;  %v7200_v62 = vld [vmem:[#allocation5 + $0x56c] sm:$0xf0] }
 0x18b   :  { %v7315_v2 = vld [vmem:[#allocation5 + $0x90c] sm:$0xf]  ;;  %v6689_v9 = vor.u32 %v7515_v63, %v6686_v0  ;;  %3632 = vmatpush.bf16.msrb.mxu2 %v6433_v5 }
 0x18c   :  { %v5886_v6 = vld [vmem:[#allocation5 + $0x928] sm:$0xf0] }
 0x18d   :  { %v7379_v7 = vld [vmem:[#allocation5 + $0xb0c] sm:$0xf]  ;;  %v5889_v15 = vor.u32 %v7315_v2, %v5886_v6  ;;  %3645 = vmatpush.bf16.msrb.mxu3 %v6689_v9 }
 0x18e   :  { %v6142_v10 = vld [vmem:[#allocation5 + $0xb28] sm:$0xf0] }
 0x18f   :  { %v7443_v11 = vld [vmem:[#allocation5 + $0xd0c] sm:$0xf]  ;;  %v6145_v17 = vor.u32 %v7379_v7, %v6142_v10  ;;  %3607 = vmatpush.bf16.msrb.mxu0 %v5889_v15 }
 0x190   :  { %v6398_v12 = vld [vmem:[#allocation5 + $0xd28] sm:$0xf0] }
 0x191   :  { %v7507_v13 = vld [vmem:[#allocation5 + $0xf0c] sm:$0xf]  ;;  %v6401_v18 = vor.u32 %v7443_v11, %v6398_v12  ;;  %3620 = vmatpush.bf16.msrb.mxu1 %v6145_v17 }
 0x192   :  { %v6654_v14 = vld [vmem:[#allocation5 + $0xf28] sm:$0xf0] }
 0x193   :  { %v7307_v19 = vld [vmem:[#allocation5 + $0x8cc] sm:$0xf]  ;;  %v6657_v56 = vor.u32 %v7507_v13, %v6654_v14  ;;  %3633 = vmatpush.bf16.msrb.mxu2 %v6401_v18  ;;  %v3381_v14 = vpop.f32.mrf.mxu2 }
 0x194   :  { %v5854_v20 = vld [vmem:[#allocation5 + $0x8e8] sm:$0xf0] }
 0x195   :  { %v7371_v21 = vld [vmem:[#allocation5 + $0xacc] sm:$0xf]  ;;  %v5857_v30 = vor.u32 %v7307_v19, %v5854_v20  ;;  %3646 = vmatpush.bf16.msrb.mxu3 %v6657_v56  ;;  %v3394_v19 = vpop.f32.mrf.mxu3  ;;  %v4964_v20 = vld [vmem:[#allocation5 + $0x1d0] sm:$0xf] }
 0x196   :  { %v6110_v24 = vld [vmem:[#allocation5 + $0xae8] sm:$0xf0]  ;;  %v7152_v56 = vld [vmem:[#allocation5 + $0x3ec] sm:$0xf0] }
 0x197   :  { %v7435_v25 = vld [vmem:[#allocation5 + $0xccc] sm:$0xf]  ;;  %v6113_v31 = vor.u32 %v7371_v21, %v6110_v24  ;;  %3608 = vmatpush.bf16.msrb.mxu0 %v5857_v30  ;;  %v7088_v21 = vld [vmem:[#allocation5 + $0x1ec] sm:$0xf0] }
 0x198   :  { %v6366_v26 = vld [vmem:[#allocation5 + $0xce8] sm:$0xf0]  ;;  %v5476_v24 = vld [vmem:[#allocation5 + $0x5d0] sm:$0xf] }
 0x199   :  { %v7499_v27 = vld [vmem:[#allocation5 + $0xecc] sm:$0xf]  ;;  %v6369_v32 = vor.u32 %v7435_v25, %v6366_v26  ;;  %3621 = vmatpush.bf16.msrb.mxu1 %v6113_v31  ;;  %v7216_v25 = vld [vmem:[#allocation5 + $0x5ec] sm:$0xf0]  ;;  %v4965_v31 = vor.u32 %v7088_v21, %v4964_v20 }
 0x19a   :  { %v6622_v28 = vld [vmem:[#allocation5 + $0xee8] sm:$0xf0]  ;;  %v7056_v19 = vld [vmem:[#allocation5 + $0xec] sm:$0xf0] }
 0x19b   :  { %v7299_v33 = vld [vmem:[#allocation5 + $0x88c] sm:$0xf]  ;;  %v6625_v37 = vor.u32 %v7499_v27, %v6622_v28  ;;  %3634 = vmatpush.bf16.msrb.mxu2 %v6369_v32  ;;  %v5732_v28 = vld [vmem:[#allocation5 + $0x7d0] sm:$0xf]  ;;  %v5221_v32 = vor.u32 %v7152_v56, %v5220_v22  ;;  %v3418_v22 = vpop.f32.mrf.mxu1 }
 0x19c   :  { %v5822_v34 = vld [vmem:[#allocation5 + $0x8a8] sm:$0xf0]  ;;  %v5092_v20 = vld [vmem:[#allocation5 + $0x2d0] sm:$0xf] }
 0x19d   :  { %v7363_v35 = vld [vmem:[#allocation5 + $0xa8c] sm:$0xf]  ;;  %v5825_v48 = vor.u32 %v7299_v33, %v5822_v34  ;;  %3647 = vmatpush.bf16.msrb.mxu3 %v6625_v37  ;;  %v5477_v33 = vor.u32 %v7216_v25, %v5476_v24  ;;  %v4932_v34 = vld [vmem:[#allocation5 + $0x190] sm:$0xf]  ;;  %v5733_v37 = vor.u32 %v7280_v29, %v5732_v28 }
 0x19e   :  { %v6078_v38 = vld [vmem:[#allocation5 + $0xaa8] sm:$0xf0]  ;;  %v7120_v56 = vld [vmem:[#allocation5 + $0x2ec] sm:$0xf0] }
 0x19f   :  { %v7427_v39 = vld [vmem:[#allocation5 + $0xc8c] sm:$0xf]  ;;  %v6081_v52 = vor.u32 %v7363_v35, %v6078_v38  ;;  %3609 = vmatpush.bf16.msrb.mxu0 %v5825_v48  ;;  %v7080_v35 = vld [vmem:[#allocation5 + $0x1ac] sm:$0xf0] }
 0x1a0   :  { %v6334_v40 = vld [vmem:[#allocation5 + $0xca8] sm:$0xf0]  ;;  %v7144_v38 = vld [vmem:[#allocation5 + $0x3ac] sm:$0xf0] }
 0x1a1   :  { %v7491_v43 = vld [vmem:[#allocation5 + $0xe8c] sm:$0xf]  ;;  %v6337_v53 = vor.u32 %v7427_v39, %v6334_v40  ;;  %3622 = vmatpush.bf16.msrb.mxu1 %v6081_v52  ;;  %v5444_v39 = vld [vmem:[#allocation5 + $0x590] sm:$0xf] }
 0x1a2   :  { %v6590_v45 = vld [vmem:[#allocation5 + $0xea8] sm:$0xf0]  ;;  %v7208_v40 = vld [vmem:[#allocation5 + $0x5ac] sm:$0xf0] }
 0x1a3   :  { %v7291_v57 = vld [vmem:[#allocation5 + $0x84c] sm:$0xf]  ;;  %v6593_v63 = vor.u32 %v7491_v43, %v6590_v45  ;;  %3635 = vmatpush.bf16.msrb.mxu2 %v6337_v53  ;;  %v4933_v43 = vor.u32 %v7080_v35, %v4932_v34  ;;  %v5189_v45 = vor.u32 %v7144_v38, %v5188_v36  ;;  %v5445_v48 = vor.u32 %v7208_v40, %v5444_v39  ;;  %v7072_v52 = vld [vmem:[#allocation5 + $0x16c] sm:$0xf0]  ;;  %v3431_v35 = vpop.f32.mrf.mxu2  ;;  %v3444_v40 = vpop.f32.mrf.mxu3 }
 0x1a4   :  { %v5790_v60 = vld [vmem:[#allocation5 + $0x868] sm:$0xf0]  ;;  %v5156_v53 = vld [vmem:[#allocation5 + $0x350] sm:$0xf] }
 0x1a5   :  { %v7355_v61 = vld [vmem:[#allocation5 + $0xa4c] sm:$0xf]  ;;  %v5793_v6 = vor.u32 %v7291_v57, %v5790_v60  ;;  %3648 = vmatpush.bf16.msrb.mxu3 %v6593_v63  ;;  %v5701_v57 = vor.u32 %v7272_v42, %v5700_v41  ;;  %v7136_v60 = vld [vmem:[#allocation5 + $0x36c] sm:$0xf0] }
 0x1a6   :  { %v6046_v0 = vld [vmem:[#allocation5 + $0xa68] sm:$0xf0]  ;;  %v5668_v63 = vld [vmem:[#allocation5 + $0x750] sm:$0xf] }
 0x1a7   :  { %v7419_v1 = vld [vmem:[#allocation5 + $0xc4c] sm:$0xf]  ;;  %v6049_v9 = vor.u32 %v7355_v61, %v6046_v0  ;;  %3610 = vmatpush.bf16.msrb.mxu0 %v5793_v6  ;;  %v5412_v61 = vld [vmem:[#allocation5 + $0x550] sm:$0xf] }
 0x1a8   :  { %v6302_v2 = vld [vmem:[#allocation5 + $0xc68] sm:$0xf0]  ;;  %v7264_v0 = vld [vmem:[#allocation5 + $0x76c] sm:$0xf0] }
 0x1a9   :  { %v7483_v4 = vld [vmem:[#allocation5 + $0xe4c] sm:$0xf]  ;;  %v6305_v10 = vor.u32 %v7419_v1, %v6302_v2  ;;  %3623 = vmatpush.bf16.msrb.mxu1 %v6049_v9  ;;  %v4901_v1 = vor.u32 %v7072_v52, %v4900_v50  ;;  %v5157_v2 = vor.u32 %v7136_v60, %v5156_v53  ;;  %v7064_v6 = vld [vmem:[#allocation5 + $0x12c] sm:$0xf0] }
 0x1aa   :  { %v6558_v5 = vld [vmem:[#allocation5 + $0xe68] sm:$0xf0]  ;;  %v7128_v9 = vld [vmem:[#allocation5 + $0x32c] sm:$0xf0] }
 0x1ab   :  { %v7283_v7 = vld [vmem:[#allocation5 + $0x80c] sm:$0xf]  ;;  %v6561_v15 = vor.u32 %v7483_v4, %v6558_v5  ;;  %3636 = vmatpush.bf16.msrb.mxu2 %v6305_v10  ;;  %v5413_v4 = vor.u32 %v7200_v62, %v5412_v61  ;;  %v4868_v5 = vld [vmem:[#allocation5 + $0x110] sm:$0xf]  ;;  %v3420_v61 = vpop.f32.mrf.mxu1 }
 0x1ac   :  { %v5758_v8 = vld [vmem:[#allocation5 + $0x828] sm:$0xf0]  ;;  %v5380_v10 = vld [vmem:[#allocation5 + $0x510] sm:$0xf]  ;;  %v4869_v14 = vor.u32 %v7064_v6, %v4868_v5 }
 0x1ad   :  { %v7347_v11 = vld [vmem:[#allocation5 + $0xa0c] sm:$0xf]  ;;  %v5761_v23 = vor.u32 %v7283_v7, %v5758_v8  ;;  %3649 = vmatpush.bf16.msrb.mxu3 %v6561_v15  ;;  %v5124_v7 = vld [vmem:[#allocation5 + $0x310] sm:$0xf]  ;;  %v5669_v8 = vor.u32 %v7264_v0, %v5668_v63  ;;  %v3405_v15 = vpop.f32.mrf.mxu0 }
 0x1ae   :  { %v6014_v12 = vld [vmem:[#allocation5 + $0xa28] sm:$0xf0]  ;;  %v3406_v21 = vadd.f32 %v3405_v15, %v7880_v49  ;;  %v5348_v24 = vld [vmem:[#allocation5 + $0x4d0] sm:$0xf] }
 0x1af   :  { %v7411_v13 = vld [vmem:[#allocation5 + $0xc0c] sm:$0xf]  ;;  %v6017_v26 = vor.u32 %v7347_v11, %v6014_v12  ;;  %3611 = vmatpush.bf16.msrb.mxu0 %v5761_v23  ;;  %v7192_v11 = vld [vmem:[#allocation5 + $0x52c] sm:$0xf0] }
 0x1b0   :  { %v6270_v16 = vld [vmem:[#allocation5 + $0xc28] sm:$0xf0]  ;;  %v5636_v12 = vld [vmem:[#allocation5 + $0x710] sm:$0xf]  ;;  %v3419_v28 = vadd.f32 %v3418_v22, %v3406_v21 }
 0x1b1   :  { %v7475_v17 = vld [vmem:[#allocation5 + $0xe0c] sm:$0xf]  ;;  %v6273_v27 = vor.u32 %v7411_v13, %v6270_v16  ;;  %3624 = vmatpush.bf16.msrb.mxu1 %v6017_v26  ;;  %v7256_v13 = vld [vmem:[#allocation5 + $0x72c] sm:$0xf0]  ;;  %v5125_v16 = vor.u32 %v7128_v9, %v5124_v7 }
 0x1b2   :  { %v6526_v18 = vld [vmem:[#allocation5 + $0xe28] sm:$0xf0]  ;;  %3612 = vmatmul.bf16.vlgmr.msrb.gmra.mxu0 %v7844_v54  ;;  %v5637_v23 = vor.u32 %v7256_v13, %v5636_v12  ;;  %v7184_v25 = vld [vmem:[#allocation5 + $0x4ec] sm:$0xf0]  ;;  %v3432_v39 = vadd.f32 %v3431_v35, %v3419_v28  ;;  %v3433_v13 = vpop.f32.mrf.mxu2 }
 0x1b3   :  { %v6529_v30 = vor.u32 %v7475_v17, %v6526_v18  ;;  %3637 = vmatpush.bf16.msrb.mxu2 %v6273_v27  ;;  %3656 = vmatpush.bf16.msra.mxu0 %v4965_v31  ;;  %v5381_v17 = vor.u32 %v7192_v11, %v5380_v10  ;;  %v4836_v18 = vld [vmem:[#allocation5 + $0xd0] sm:$0xf]  ;;  %v5349_v31 = vor.u32 %v7184_v25, %v5348_v24 }
 0x1b4   :  { %3625 = vmatmul.bf16.vlgmr.msrb.gmra.mxu1 %v7848_v59  ;;  %v5604_v26 = vld [vmem:[#allocation5 + $0x6d0] sm:$0xf]  ;;  %v4837_v29 = vor.u32 %v7056_v19, %v4836_v18  ;;  %v3446_v18 = vpop.f32.mrf.mxu3 }
 0x1b5   :  { %3650 = vmatpush.bf16.msrb.mxu3 %v6529_v30  ;;  %3669 = vmatpush.bf16.msra.mxu1 %v5221_v32  ;;  %v7248_v27 = vld [vmem:[#allocation5 + $0x6ec] sm:$0xf0]  ;;  %v5093_v30 = vor.u32 %v7120_v56, %v5092_v20 }
 0x1b6   :  { %3638 = vmatmul.bf16.vlgmr.msrb.gmra.mxu2 %v7842_v44  ;;  %v4804_v32 = vld [vmem:[#allocation5 + $0x90] sm:$0xf]  ;;  %v5605_v49 = vor.u32 %v7248_v27, %v5604_v26 }
 0x1b7   :  { %3682 = vmatpush.bf16.msra.mxu2 %v5477_v33  ;;  %3657 = vmatpush.bf16.msra.mxu0 %v4933_v43  ;;  %v7048_v33 = vld [vmem:[#allocation5 + $0xac] sm:$0xf0] }
 0x1b8   :  { %3651 = vmatmul.bf16.vlgmr.msrb.gmra.mxu3 %v7846_v58  ;;  %v5060_v34 = vld [vmem:[#allocation5 + $0x290] sm:$0xf]  ;;  %v4805_v43 = vor.u32 %v7048_v33, %v4804_v32 }
 0x1b9   :  { %3695 = vmatpush.bf16.msra.mxu3 %v5733_v37  ;;  %3670 = vmatpush.bf16.msra.mxu1 %v5189_v45  ;;  %v7112_v36 = vld [vmem:[#allocation5 + $0x2ac] sm:$0xf0]  ;;  %v7887_v45 = vadd.f32 %v3444_v40, %v3432_v39 }
 0x1ba   :  { %v5316_v37 = vld [vmem:[#allocation5 + $0x490] sm:$0xf]  ;;  %v5061_v50 = vor.u32 %v7112_v36, %v5060_v34 }
 0x1bb   :  { %3683 = vmatpush.bf16.msra.mxu2 %v5445_v48  ;;  %3658 = vmatpush.bf16.msra.mxu0 %v4901_v1  ;;  %v7176_v38 = vld [vmem:[#allocation5 + $0x4ac] sm:$0xf0]  ;;  %v3407_v48 = vpop.f32.mrf.mxu0 }
 0x1bc   :  { %v5572_v41 = vld [vmem:[#allocation5 + $0x690] sm:$0xf]  ;;  %v5317_v52 = vor.u32 %v7176_v38, %v5316_v37 }
 0x1bd   :  { %3696 = vmatpush.bf16.msra.mxu3 %v5701_v57  ;;  %3671 = vmatpush.bf16.msra.mxu1 %v5157_v2  ;;  %v7240_v42 = vld [vmem:[#allocation5 + $0x6ac] sm:$0xf0] }
 0x1be   :  { %v4772_v53 = vld [vmem:[#allocation5 + $0x50] sm:$0xf]  ;;  %v5573_v62 = vor.u32 %v7240_v42, %v5572_v41 }
 0x1bf   :  { %3684 = vmatpush.bf16.msra.mxu2 %v5413_v4  ;;  %3659 = vmatpush.bf16.msra.mxu0 %v4869_v14  ;;  %v7040_v57 = vld [vmem:[#allocation5 + $0x6c] sm:$0xf0] }
 0x1c0   :  { %v5028_v60 = vld [vmem:[#allocation5 + $0x250] sm:$0xf]  ;;  %v4773_v5 = vor.u32 %v7040_v57, %v4772_v53 }
 0x1c1   :  { %3697 = vmatpush.bf16.msra.mxu3 %v5669_v8  ;;  %3672 = vmatpush.bf16.msra.mxu1 %v5125_v16  ;;  %v7104_v63 = vld [vmem:[#allocation5 + $0x26c] sm:$0xf0] }
 0x1c2   :  { %v5284_v0 = vld [vmem:[#allocation5 + $0x450] sm:$0xf]  ;;  %v5029_v8 = vor.u32 %v7104_v63, %v5028_v60 }
 0x1c3   :  { %3685 = vmatpush.bf16.msra.mxu2 %v5381_v17  ;;  %3660 = vmatpush.bf16.msra.mxu0 %v4837_v29  ;;  %v7168_v1 = vld [vmem:[#allocation5 + $0x46c] sm:$0xf0] }
 0x1c4   :  { %v5540_v2 = vld [vmem:[#allocation5 + $0x650] sm:$0xf]  ;;  %v5285_v9 = vor.u32 %v7168_v1, %v5284_v0 }
 0x1c5   :  { %3698 = vmatpush.bf16.msra.mxu3 %v5637_v23  ;;  %3673 = vmatpush.bf16.msra.mxu1 %v5093_v30  ;;  %v7232_v4 = vld [vmem:[#allocation5 + $0x66c] sm:$0xf0] }
 0x1c6   :  { %v4740_v6 = vld [vmem:[#allocation5 + $0x10] sm:$0xf]  ;;  %v5541_v14 = vor.u32 %v7232_v4, %v5540_v2 }
 0x1c7   :  { %3686 = vmatpush.bf16.msra.mxu2 %v5349_v31  ;;  %3661 = vmatpush.bf16.msra.mxu0 %v4805_v43  ;;  %v7032_v7 = vld [vmem:[#allocation5 + $0x2c] sm:$0xf0] }
 0x1c8   :  { %v4996_v10 = vld [vmem:[#allocation5 + $0x210] sm:$0xf]  ;;  %v4741_v22 = vor.u32 %v7032_v7, %v4740_v6  ;;  %v7893_v7 = vld [vmem:[#allocation7] sm:$0xff] }
 0x1c9   :  { %3699 = vmatpush.bf16.msra.mxu3 %v5605_v49  ;;  %3674 = vmatpush.bf16.msra.mxu1 %v5061_v50  ;;  %v7096_v11 = vld [vmem:[#allocation5 + $0x22c] sm:$0xf0] }
 0x1ca   :  { %v5252_v12 = vld [vmem:[#allocation5 + $0x410] sm:$0xf]  ;;  %v4997_v25 = vor.u32 %v7096_v11, %v4996_v10 }
 0x1cb   :  { %3687 = vmatpush.bf16.msra.mxu2 %v5317_v52  ;;  %v7160_v15 = vld [vmem:[#allocation5 + $0x42c] sm:$0xf0]  ;;  %3662 = vmatpush.bf16.msra.mxu0 %v4773_v5 }
 0x1cc   :  { %v5508_v16 = vld [vmem:[#allocation5 + $0x610] sm:$0xf]  ;;  %v5253_v26 = vor.u32 %v7160_v15, %v5252_v12 }
 0x1cd   :  { %3700 = vmatpush.bf16.msra.mxu3 %v5573_v62  ;;  %v7224_v17 = vld [vmem:[#allocation5 + $0x62c] sm:$0xf0]  ;;  %3675 = vmatpush.bf16.msra.mxu1 %v5029_v8  ;;  %v666_v8 = vperm.slane %v7893_v7, 2 }
 0x1ce   :  { %v5988_v19 = vld [vmem:[#allocation5 + $0x9d0] sm:$0xf]  ;;  %v5509_v29 = vor.u32 %v7224_v17, %v5508_v16  ;;  %v3457_v16 = vpop.f32.mrf.mxu0 }
 0x1cf   :  { %v7344_v20 = vld [vmem:[#allocation5 + $0x9ec] sm:$0xf0]  ;;  %3688 = vmatpush.bf16.msra.mxu2 %v5285_v9  ;;  %3663 = vmatpush.bf16.msra.mxu0 %v4741_v22  ;;  %v3458_v22 = vadd.f32 %v3457_v16, %v666_v8 }
 0x1d0   :  { %v6244_v21 = vld [vmem:[#allocation5 + $0xbd0] sm:$0xf]  ;;  %v5989_v30 = vor.u32 %v7344_v20, %v5988_v19 }
 0x1d1   :  { %v7408_v23 = vld [vmem:[#allocation5 + $0xbec] sm:$0xf0]  ;;  %3701 = vmatpush.bf16.msra.mxu3 %v5541_v14  ;;  %3676 = vmatpush.bf16.msra.mxu1 %v4997_v25 }
 0x1d2   :  { %v6500_v56 = vld [vmem:[#allocation5 + $0xdd0] sm:$0xf]  ;;  %v6245_v31 = vor.u32 %v7408_v23, %v6244_v21  ;;  %3664 = vmatmul.bf16.vlgmr.msra.gmra.mxu0 %v7832_v47  ;;  %v3470_v23 = vpop.f32.mrf.mxu1 }
 0x1d3   :  { %v7472_v24 = vld [vmem:[#allocation5 + $0xdec] sm:$0xf0]  ;;  %3689 = vmatpush.bf16.msra.mxu2 %v5253_v26  ;;  %3708 = vmatpush.bf16.msrb.mxu0 %v5989_v30 }
 0x1d4   :  { %v6756_v27 = vld [vmem:[#allocation5 + $0xfd0] sm:$0xf]  ;;  %v6501_v32 = vor.u32 %v7472_v24, %v6500_v56  ;;  %3677 = vmatmul.bf16.vlgmr.msra.gmra.mxu1 %v7836_v55 }
 0x1d5   :  { %v7536_v28 = vld [vmem:[#allocation5 + $0xfec] sm:$0xf0]  ;;  %3702 = vmatpush.bf16.msra.mxu3 %v5509_v29  ;;  %3721 = vmatpush.bf16.msrb.mxu1 %v6245_v31  ;;  %v3471_v29 = vadd.f32 %v3470_v23, %v3458_v22  ;;  %v7084_v22 = vld [vmem:[#allocation5 + $0x1d4] sm:$0xf] }
 0x1d6   :  { %v5956_v33 = vld [vmem:[#allocation5 + $0x990] sm:$0xf]  ;;  %v6757_v49 = vor.u32 %v7536_v28, %v6756_v27  ;;  %3690 = vmatmul.bf16.vlgmr.msra.gmra.mxu2 %v7830_v46  ;;  %v4966_v23 = vld [vmem:[#allocation5 + $0x1f0] sm:$0xf0] }
 0x1d7   :  { %v7336_v34 = vld [vmem:[#allocation5 + $0x9ac] sm:$0xf0]  ;;  %3734 = vmatpush.bf16.msrb.mxu2 %v6501_v32 }
 0x1d8   :  { %v6212_v35 = vld [vmem:[#allocation5 + $0xb90] sm:$0xf]  ;;  %v5957_v41 = vor.u32 %v7336_v34, %v5956_v33  ;;  %3703 = vmatmul.bf16.vlgmr.msra.gmra.mxu3 %v7834_v51 }
 0x1d9   :  { %v7400_v36 = vld [vmem:[#allocation5 + $0xbac] sm:$0xf0]  ;;  %3747 = vmatpush.bf16.msrb.mxu3 %v6757_v49  ;;  %v3483_v49 = vpop.f32.mrf.mxu2 }
 0x1da   :  { %v6468_v37 = vld [vmem:[#allocation5 + $0xd90] sm:$0xf]  ;;  %v6213_v42 = vor.u32 %v7400_v36, %v6212_v35  ;;  %3709 = vmatpush.bf16.msrb.mxu0 %v5957_v41  ;;  %v3496_v41 = vpop.f32.mrf.mxu3 }
 0x1db   :  { %v7464_v38 = vld [vmem:[#allocation5 + $0xdac] sm:$0xf0] }
 0x1dc   :  { %v6724_v39 = vld [vmem:[#allocation5 + $0xf90] sm:$0xf]  ;;  %v6469_v43 = vor.u32 %v7464_v38, %v6468_v37  ;;  %3722 = vmatpush.bf16.msrb.mxu1 %v6213_v42 }
 0x1dd   :  { %v7528_v40 = vld [vmem:[#allocation5 + $0xfac] sm:$0xf0] }
 0x1de   :  { %v5924_v48 = vld [vmem:[#allocation5 + $0x950] sm:$0xf]  ;;  %v6725_v53 = vor.u32 %v7528_v40, %v6724_v39  ;;  %3735 = vmatpush.bf16.msrb.mxu2 %v6469_v43  ;;  %v3484_v40 = vadd.f32 %v3483_v49, %v3471_v29  ;;  %v7076_v49 = vld [vmem:[#allocation5 + $0x194] sm:$0xf] }
 0x1df   :  { %v7328_v50 = vld [vmem:[#allocation5 + $0x96c] sm:$0xf0] }
 0x1e0   :  { %v6180_v52 = vld [vmem:[#allocation5 + $0xb50] sm:$0xf]  ;;  %v5925_v0 = vor.u32 %v7328_v50, %v5924_v48  ;;  %3748 = vmatpush.bf16.msrb.mxu3 %v6725_v53  ;;  %v7896_v50 = vadd.f32 %v3496_v41, %v3484_v40  ;;  %v7204_v40 = vld [vmem:[#allocation5 + $0x594] sm:$0xf] }
 0x1e1   :  { %v7392_v57 = vld [vmem:[#allocation5 + $0xb6c] sm:$0xf0]  ;;  %v3485_v16 = vpop.f32.mrf.mxu2  ;;  %v5446_v41 = vld [vmem:[#allocation5 + $0x5b0] sm:$0xf0] }
 0x1e2   :  { %v6436_v60 = vld [vmem:[#allocation5 + $0xd50] sm:$0xf]  ;;  %v6181_v2 = vor.u32 %v7392_v57, %v6180_v52  ;;  %3710 = vmatpush.bf16.msrb.mxu0 %v5925_v0  ;;  %v3459_v52 = vpop.f32.mrf.mxu0  ;;  %v7252_v16 = vld [vmem:[#allocation5 + $0x714] sm:$0xf] }
 0x1e3   :  { %v7456_v61 = vld [vmem:[#allocation5 + $0xd6c] sm:$0xf0] }
 0x1e4   :  { %v6692_v62 = vld [vmem:[#allocation5 + $0xf50] sm:$0xf]  ;;  %v6437_v4 = vor.u32 %v7456_v61, %v6436_v60  ;;  %3723 = vmatpush.bf16.msrb.mxu1 %v6181_v2 }
 0x1e5   :  { %v7520_v63 = vld [vmem:[#allocation5 + $0xf6c] sm:$0xf0] }
 0x1e6   :  { %v5892_v1 = vld [vmem:[#allocation5 + $0x910] sm:$0xf]  ;;  %v6693_v9 = vor.u32 %v7520_v63, %v6692_v62  ;;  %3736 = vmatpush.bf16.msrb.mxu2 %v6437_v4  ;;  %v3472_v63 = vpop.f32.mrf.mxu1 }
 0x1e7   :  { %v7320_v5 = vld [vmem:[#allocation5 + $0x92c] sm:$0xf0]  ;;  %v5158_v63 = vld [vmem:[#allocation5 + $0x370] sm:$0xf0] }
 0x1e8   :  { %v6148_v6 = vld [vmem:[#allocation5 + $0xb10] sm:$0xf]  ;;  %v5893_v15 = vor.u32 %v7320_v5, %v5892_v1  ;;  %3749 = vmatpush.bf16.msrb.mxu3 %v6693_v9 }
 0x1e9   :  { %v7384_v10 = vld [vmem:[#allocation5 + $0xb2c] sm:$0xf0] }
 0x1ea   :  { %v6404_v11 = vld [vmem:[#allocation5 + $0xd10] sm:$0xf]  ;;  %v6149_v17 = vor.u32 %v7384_v10, %v6148_v6  ;;  %3711 = vmatpush.bf16.msrb.mxu0 %v5893_v15 }
 0x1eb   :  { %v7448_v12 = vld [vmem:[#allocation5 + $0xd2c] sm:$0xf0] }
 0x1ec   :  { %v6660_v13 = vld [vmem:[#allocation5 + $0xf10] sm:$0xf]  ;;  %v6405_v18 = vor.u32 %v7448_v12, %v6404_v11  ;;  %3724 = vmatpush.bf16.msrb.mxu1 %v6149_v17 }
 0x1ed   :  { %v7512_v14 = vld [vmem:[#allocation5 + $0xf2c] sm:$0xf0] }
 0x1ee   :  { %v5860_v19 = vld [vmem:[#allocation5 + $0x8d0] sm:$0xf]  ;;  %v6661_v56 = vor.u32 %v7512_v14, %v6660_v13  ;;  %3737 = vmatpush.bf16.msrb.mxu2 %v6405_v18 }
 0x1ef   :  { %v7312_v20 = vld [vmem:[#allocation5 + $0x8ec] sm:$0xf0] }
 0x1f0   :  { %v6116_v21 = vld [vmem:[#allocation5 + $0xad0] sm:$0xf]  ;;  %v5861_v30 = vor.u32 %v7312_v20, %v5860_v19  ;;  %3750 = vmatpush.bf16.msrb.mxu3 %v6661_v56  ;;  %v7148_v56 = vld [vmem:[#allocation5 + $0x3d4] sm:$0xf] }
 0x1f1   :  { %v7376_v24 = vld [vmem:[#allocation5 + $0xaec] sm:$0xf0] }
 0x1f2   :  { %v6372_v25 = vld [vmem:[#allocation5 + $0xcd0] sm:$0xf]  ;;  %v6117_v31 = vor.u32 %v7376_v24, %v6116_v21  ;;  %3712 = vmatpush.bf16.msrb.mxu0 %v5861_v30  ;;  %v3498_v21 = vpop.f32.mrf.mxu3  ;;  %v7276_v30 = vld [vmem:[#allocation5 + $0x7d4] sm:$0xf] }
 0x1f3   :  { %v7440_v26 = vld [vmem:[#allocation5 + $0xcec] sm:$0xf0] }
 0x1f4   :  { %v6628_v27 = vld [vmem:[#allocation5 + $0xed0] sm:$0xf]  ;;  %v6373_v32 = vor.u32 %v7440_v26, %v6372_v25  ;;  %3725 = vmatpush.bf16.msrb.mxu1 %v6117_v31  ;;  %v5222_v25 = vld [vmem:[#allocation5 + $0x3f0] sm:$0xf0] }
 0x1f5   :  { %v7504_v28 = vld [vmem:[#allocation5 + $0xeec] sm:$0xf0]  ;;  %v7212_v26 = vld [vmem:[#allocation5 + $0x5d4] sm:$0xf] }
 0x1f6   :  { %v5828_v33 = vld [vmem:[#allocation5 + $0x890] sm:$0xf]  ;;  %v6629_v36 = vor.u32 %v7504_v28, %v6628_v27  ;;  %3738 = vmatpush.bf16.msrb.mxu2 %v6373_v32  ;;  %v5478_v27 = vld [vmem:[#allocation5 + $0x5f0] sm:$0xf0] }
 0x1f7   :  { %v7304_v34 = vld [vmem:[#allocation5 + $0x8ac] sm:$0xf0]  ;;  %v5734_v31 = vld [vmem:[#allocation5 + $0x7f0] sm:$0xf0] }
 0x1f8   :  { %v6084_v35 = vld [vmem:[#allocation5 + $0xa90] sm:$0xf]  ;;  %v5829_v48 = vor.u32 %v7304_v34, %v5828_v33  ;;  %3751 = vmatpush.bf16.msrb.mxu3 %v6629_v36  ;;  %v4969_v33 = vor.u32 %v7084_v22, %v4966_v23  ;;  %v5225_v34 = vor.u32 %v7148_v56, %v5222_v25  ;;  %v4934_v36 = vld [vmem:[#allocation5 + $0x1b0] sm:$0xf0]  ;;  %v3522_v25 = vpop.f32.mrf.mxu1 }
 0x1f9   :  { %v7368_v37 = vld [vmem:[#allocation5 + $0xaac] sm:$0xf0]  ;;  %v7052_v22 = vld [vmem:[#allocation5 + $0xd4] sm:$0xf] }
 0x1fa   :  { %v6340_v38 = vld [vmem:[#allocation5 + $0xc90] sm:$0xf]  ;;  %v6085_v53 = vor.u32 %v7368_v37, %v6084_v35  ;;  %3713 = vmatpush.bf16.msrb.mxu0 %v5829_v48  ;;  %v5481_v35 = vor.u32 %v7212_v26, %v5478_v27  ;;  %v7140_v37 = vld [vmem:[#allocation5 + $0x394] sm:$0xf]  ;;  %v4937_v48 = vor.u32 %v7076_v49, %v4934_v36 }
 0x1fb   :  { %v7432_v39 = vld [vmem:[#allocation5 + $0xcac] sm:$0xf0]  ;;  %v4838_v23 = vld [vmem:[#allocation5 + $0xf0] sm:$0xf0] }
 0x1fc   :  { %v6596_v42 = vld [vmem:[#allocation5 + $0xe90] sm:$0xf]  ;;  %v6341_v57 = vor.u32 %v7432_v39, %v6340_v38  ;;  %3726 = vmatpush.bf16.msrb.mxu1 %v6085_v53  ;;  %v5737_v38 = vor.u32 %v7276_v30, %v5734_v31  ;;  %v5190_v39 = vld [vmem:[#allocation5 + $0x3b0] sm:$0xf0]  ;;  %v5449_v53 = vor.u32 %v7204_v40, %v5446_v41 }
 0x1fd   :  { %v7496_v43 = vld [vmem:[#allocation5 + $0xeac] sm:$0xf0]  ;;  %v5193_v52 = vor.u32 %v7140_v37, %v5190_v39  ;;  %v7116_v56 = vld [vmem:[#allocation5 + $0x2d4] sm:$0xf] }
 0x1fe   :  { %v5796_v60 = vld [vmem:[#allocation5 + $0x850] sm:$0xf]  ;;  %v6597_v0 = vor.u32 %v7496_v43, %v6596_v42  ;;  %3739 = vmatpush.bf16.msrb.mxu2 %v6341_v57  ;;  %v7268_v42 = vld [vmem:[#allocation5 + $0x794] sm:$0xf] }
 0x1ff   :  { %v7296_v61 = vld [vmem:[#allocation5 + $0x86c] sm:$0xf0]  ;;  %v5702_v43 = vld [vmem:[#allocation5 + $0x7b0] sm:$0xf0] }
 0x200   :  { %v6052_v62 = vld [vmem:[#allocation5 + $0xa50] sm:$0xf]  ;;  %v5797_v8 = vor.u32 %v7296_v61, %v5796_v60  ;;  %3752 = vmatpush.bf16.msrb.mxu3 %v6597_v0  ;;  %v7068_v57 = vld [vmem:[#allocation5 + $0x154] sm:$0xf] }
 0x201   :  { %v7360_v1 = vld [vmem:[#allocation5 + $0xa6c] sm:$0xf0]  ;;  %v4902_v60 = vld [vmem:[#allocation5 + $0x170] sm:$0xf0] }
 0x202   :  { %v6308_v2 = vld [vmem:[#allocation5 + $0xc50] sm:$0xf]  ;;  %v6053_v11 = vor.u32 %v7360_v1, %v6052_v62  ;;  %3714 = vmatpush.bf16.msrb.mxu0 %v5797_v8  ;;  %v7132_v61 = vld [vmem:[#allocation5 + $0x354] sm:$0xf]  ;;  %v5705_v62 = vor.u32 %v7268_v42, %v5702_v43  ;;  %v3548_v43 = vpop.f32.mrf.mxu3 }
 0x203   :  { %v7424_v4 = vld [vmem:[#allocation5 + $0xc6c] sm:$0xf0]  ;;  %v7196_v0 = vld [vmem:[#allocation5 + $0x554] sm:$0xf] }
 0x204   :  { %v6564_v5 = vld [vmem:[#allocation5 + $0xe50] sm:$0xf]  ;;  %v6309_v12 = vor.u32 %v7424_v4, %v6308_v2  ;;  %3727 = vmatpush.bf16.msrb.mxu1 %v6053_v11  ;;  %v5414_v1 = vld [vmem:[#allocation5 + $0x570] sm:$0xf0] }
 0x205   :  { %v7488_v6 = vld [vmem:[#allocation5 + $0xe6c] sm:$0xf0]  ;;  %v7260_v2 = vld [vmem:[#allocation5 + $0x754] sm:$0xf]  ;;  %v5417_v8 = vor.u32 %v7196_v0, %v5414_v1 }
 0x206   :  { %v5764_v9 = vld [vmem:[#allocation5 + $0x810] sm:$0xf]  ;;  %v6565_v17 = vor.u32 %v7488_v6, %v6564_v5  ;;  %3740 = vmatpush.bf16.msrb.mxu2 %v6309_v12  ;;  %v5670_v4 = vld [vmem:[#allocation5 + $0x770] sm:$0xf0]  ;;  %v4905_v5 = vor.u32 %v7068_v57, %v4902_v60  ;;  %v5161_v6 = vor.u32 %v7132_v61, %v5158_v63 }
 0x207   :  { %v7288_v10 = vld [vmem:[#allocation5 + $0x82c] sm:$0xf0]  ;;  %v7124_v11 = vld [vmem:[#allocation5 + $0x314] sm:$0xf]  ;;  %v5673_v12 = vor.u32 %v7260_v2, %v5670_v4  ;;  %v3524_v2 = vpop.f32.mrf.mxu1 }
 0x208   :  { %v6020_v13 = vld [vmem:[#allocation5 + $0xa10] sm:$0xf]  ;;  %v5765_v24 = vor.u32 %v7288_v10, %v5764_v9  ;;  %3753 = vmatpush.bf16.msrb.mxu3 %v6565_v17  ;;  %v7060_v9 = vld [vmem:[#allocation5 + $0x114] sm:$0xf] }
 0x209   :  { %v7352_v14 = vld [vmem:[#allocation5 + $0xa2c] sm:$0xf0]  ;;  %v4870_v10 = vld [vmem:[#allocation5 + $0x130] sm:$0xf0] }
 0x20a   :  { %v6276_v15 = vld [vmem:[#allocation5 + $0xc10] sm:$0xf]  ;;  %v6021_v28 = vor.u32 %v7352_v14, %v6020_v13  ;;  %3715 = vmatpush.bf16.msrb.mxu0 %v5765_v24  ;;  %v5126_v13 = vld [vmem:[#allocation5 + $0x330] sm:$0xf0] }
 0x20b   :  { %v7416_v18 = vld [vmem:[#allocation5 + $0xc2c] sm:$0xf0]  ;;  %v7188_v14 = vld [vmem:[#allocation5 + $0x514] sm:$0xf] }
 0x20c   :  { %v6532_v19 = vld [vmem:[#allocation5 + $0xe10] sm:$0xf]  ;;  %v6277_v29 = vor.u32 %v7416_v18, %v6276_v15  ;;  %3728 = vmatpush.bf16.msrb.mxu1 %v6021_v28  ;;  %v5382_v15 = vld [vmem:[#allocation5 + $0x530] sm:$0xf0]  ;;  %v4873_v18 = vor.u32 %v7060_v9, %v4870_v10 }
 0x20d   :  { %v7480_v20 = vld [vmem:[#allocation5 + $0xe2c] sm:$0xf0]  ;;  %3716 = vmatmul.bf16.vlgmr.msrb.gmra.mxu0 %v7844_v54  ;;  %v5638_v17 = vld [vmem:[#allocation5 + $0x730] sm:$0xf0]  ;;  %v5385_v21 = vor.u32 %v7188_v14, %v5382_v15 }
 0x20e   :  { %v6533_v32 = vor.u32 %v7480_v20, %v6532_v19  ;;  %3741 = vmatpush.bf16.msrb.mxu2 %v6277_v29  ;;  %3760 = vmatpush.bf16.msra.mxu0 %v4969_v33  ;;  %v3509_v19 = vpop.f32.mrf.mxu0  ;;  %v5129_v20 = vor.u32 %v7124_v11, %v5126_v13  ;;  %v5641_v26 = vor.u32 %v7252_v16, %v5638_v17  ;;  %v5094_v27 = vld [vmem:[#allocation5 + $0x2f0] sm:$0xf0] }
 0x20f   :  { %3729 = vmatmul.bf16.vlgmr.msrb.gmra.mxu1 %v7848_v59  ;;  %v3510_v24 = vadd.f32 %v3509_v19, %v7896_v50  ;;  %v7180_v28 = vld [vmem:[#allocation5 + $0x4d4] sm:$0xf]  ;;  %v4841_v33 = vor.u32 %v7052_v22, %v4838_v23 }
 0x210   :  { %3754 = vmatpush.bf16.msrb.mxu3 %v6533_v32  ;;  %3773 = vmatpush.bf16.msra.mxu1 %v5225_v34  ;;  %v5350_v29 = vld [vmem:[#allocation5 + $0x4f0] sm:$0xf0]  ;;  %v5097_v34 = vor.u32 %v7116_v56, %v5094_v27  ;;  %v3550_v56 = vpop.f32.mrf.mxu3 }
 0x211   :  { %3742 = vmatmul.bf16.vlgmr.msrb.gmra.mxu2 %v7842_v44  ;;  %v7244_v30 = vld [vmem:[#allocation5 + $0x6d4] sm:$0xf]  ;;  %v3523_v32 = vadd.f32 %v3522_v25, %v3510_v24 }
 0x212   :  { %3786 = vmatpush.bf16.msra.mxu2 %v5481_v35  ;;  %3761 = vmatpush.bf16.msra.mxu0 %v4937_v48  ;;  %v5606_v31 = vld [vmem:[#allocation5 + $0x6f0] sm:$0xf0]  ;;  %v5353_v35 = vor.u32 %v7180_v28, %v5350_v29 }
 0x213   :  { %3755 = vmatmul.bf16.vlgmr.msrb.gmra.mxu3 %v7846_v58  ;;  %v7044_v49 = vld [vmem:[#allocation5 + $0x94] sm:$0xf]  ;;  %v5609_v50 = vor.u32 %v7244_v30, %v5606_v31 }
 0x214   :  { %3799 = vmatpush.bf16.msra.mxu3 %v5737_v38  ;;  %3774 = vmatpush.bf16.msra.mxu1 %v5193_v52  ;;  %v4806_v36 = vld [vmem:[#allocation5 + $0xb0] sm:$0xf0]  ;;  %v3535_v38 = vpop.f32.mrf.mxu2 }
 0x215   :  { %v7108_v37 = vld [vmem:[#allocation5 + $0x294] sm:$0xf]  ;;  %v3536_v42 = vadd.f32 %v3535_v38, %v3523_v32 }
 0x216   :  { %3787 = vmatpush.bf16.msra.mxu2 %v5449_v53  ;;  %3762 = vmatpush.bf16.msra.mxu0 %v4905_v5  ;;  %v5062_v39 = vld [vmem:[#allocation5 + $0x2b0] sm:$0xf0]  ;;  %v4809_v53 = vor.u32 %v7044_v49, %v4806_v36  ;;  %v3511_v60 = vpop.f32.mrf.mxu0 }
 0x217   :  { %v7172_v40 = vld [vmem:[#allocation5 + $0x494] sm:$0xf]  ;;  %v7903_v57 = vadd.f32 %v3548_v43, %v3536_v42  ;;  %v5065_v61 = vor.u32 %v7108_v37, %v5062_v39 }
 0x218   :  { %3800 = vmatpush.bf16.msra.mxu3 %v5705_v62  ;;  %3775 = vmatpush.bf16.msra.mxu1 %v5161_v6  ;;  %v5318_v41 = vld [vmem:[#allocation5 + $0x4b0] sm:$0xf0] }
 0x219   :  { %v7236_v48 = vld [vmem:[#allocation5 + $0x694] sm:$0xf]  ;;  %v5321_v62 = vor.u32 %v7172_v40, %v5318_v41 }
 0x21a   :  { %3788 = vmatpush.bf16.msra.mxu2 %v5417_v8  ;;  %3763 = vmatpush.bf16.msra.mxu0 %v4873_v18  ;;  %v5574_v52 = vld [vmem:[#allocation5 + $0x6b0] sm:$0xf0] }
 0x21b   :  { %v7036_v63 = vld [vmem:[#allocation5 + $0x54] sm:$0xf]  ;;  %v5577_v4 = vor.u32 %v7236_v48, %v5574_v52 }
 0x21c   :  { %3801 = vmatpush.bf16.msra.mxu3 %v5673_v12  ;;  %3776 = vmatpush.bf16.msra.mxu1 %v5129_v20  ;;  %v4774_v0 = vld [vmem:[#allocation5 + $0x70] sm:$0xf0]  ;;  %v3537_v19 = vpop.f32.mrf.mxu2 }
 0x21d   :  { %v7100_v1 = vld [vmem:[#allocation5 + $0x254] sm:$0xf]  ;;  %v4777_v11 = vor.u32 %v7036_v63, %v4774_v0 }
 0x21e   :  { %3789 = vmatpush.bf16.msra.mxu2 %v5385_v21  ;;  %3764 = vmatpush.bf16.msra.mxu0 %v4841_v33  ;;  %v5030_v5 = vld [vmem:[#allocation5 + $0x270] sm:$0xf0] }
 0x21f   :  { %v7164_v6 = vld [vmem:[#allocation5 + $0x454] sm:$0xf]  ;;  %v5033_v14 = vor.u32 %v7100_v1, %v5030_v5 }
 0x220   :  { %3802 = vmatpush.bf16.msra.mxu3 %v5641_v26  ;;  %3777 = vmatpush.bf16.msra.mxu1 %v5097_v34  ;;  %v5286_v8 = vld [vmem:[#allocation5 + $0x470] sm:$0xf0] }
 0x221   :  { %v7228_v9 = vld [vmem:[#allocation5 + $0x654] sm:$0xf]  ;;  %v5289_v15 = vor.u32 %v7164_v6, %v5286_v8 }
 0x222   :  { %3790 = vmatpush.bf16.msra.mxu2 %v5353_v35  ;;  %v5542_v10 = vld [vmem:[#allocation5 + $0x670] sm:$0xf0]  ;;  %3765 = vmatpush.bf16.msra.mxu0 %v4809_v53 }
 0x223   :  { %v7028_v12 = vld [vmem:[#allocation5 + $0x14] sm:$0xf]  ;;  %v5545_v20 = vor.u32 %v7228_v9, %v5542_v10 }
 0x224   :  { %3803 = vmatpush.bf16.msra.mxu3 %v5609_v50  ;;  %v4742_v13 = vld [vmem:[#allocation5 + $0x30] sm:$0xf0]  ;;  %3778 = vmatpush.bf16.msra.mxu1 %v5065_v61 }
 0x225   :  { %v7092_v16 = vld [vmem:[#allocation5 + $0x214] sm:$0xf]  ;;  %v4745_v27 = vor.u32 %v7028_v12, %v4742_v13 }
 0x226   :  { %3791 = vmatpush.bf16.msra.mxu2 %v5321_v62  ;;  %v4998_v17 = vld [vmem:[#allocation5 + $0x230] sm:$0xf0]  ;;  %3766 = vmatpush.bf16.msra.mxu0 %v4777_v11 }
 0x227   :  { %v7156_v18 = vld [vmem:[#allocation5 + $0x414] sm:$0xf]  ;;  %v5001_v31 = vor.u32 %v7092_v16, %v4998_v17 }
 0x228   :  { %3804 = vmatpush.bf16.msra.mxu3 %v5577_v4  ;;  %v5254_v21 = vld [vmem:[#allocation5 + $0x430] sm:$0xf0]  ;;  %3779 = vmatpush.bf16.msra.mxu1 %v5033_v14 }
 0x229   :  { %v7220_v22 = vld [vmem:[#allocation5 + $0x614] sm:$0xf]  ;;  %v5257_v32 = vor.u32 %v7156_v18, %v5254_v21 }
 0x22a   :  { %v5510_v23 = vld [vmem:[#allocation5 + $0x630] sm:$0xf0]  ;;  %3792 = vmatpush.bf16.msra.mxu2 %v5289_v15  ;;  %3767 = vmatpush.bf16.msra.mxu0 %v4745_v27  ;;  %v667_v15 = vperm.slane %v7893_v7, 3 }
 0x22b   :  { %v7340_v24 = vld [vmem:[#allocation5 + $0x9d4] sm:$0xf]  ;;  %v5513_v35 = vor.u32 %v7220_v22, %v5510_v23  ;;  %v3561_v23 = vpop.f32.mrf.mxu0 }
 0x22c   :  { %v5990_v25 = vld [vmem:[#allocation5 + $0x9f0] sm:$0xf0]  ;;  %3805 = vmatpush.bf16.msra.mxu3 %v5545_v20  ;;  %3780 = vmatpush.bf16.msra.mxu1 %v5001_v31 }
 0x22d   :  { %v7404_v26 = vld [vmem:[#allocation5 + $0xbd4] sm:$0xf]  ;;  %v5993_v49 = vor.u32 %v7340_v24, %v5990_v25  ;;  %3768 = vmatmul.bf16.vlgmr.msra.gmra.mxu0 %v7832_v47 }
 0x22e   :  { %v6246_v28 = vld [vmem:[#allocation5 + $0xbf0] sm:$0xf0]  ;;  %3793 = vmatpush.bf16.msra.mxu2 %v5257_v32 }
 0x22f   :  { %v7468_v29 = vld [vmem:[#allocation5 + $0xdd4] sm:$0xf]  ;;  %v6249_v36 = vor.u32 %v7404_v26, %v6246_v28  ;;  %3812 = vmatpush.bf16.msrb.mxu0 %v5993_v49  ;;  %3781 = vmatmul.bf16.vlgmr.msra.gmra.mxu1 %v7836_v55  ;;  %v3562_v28 = vadd.f32 %v3561_v23, %v667_v15 }
 0x230   :  { %v6502_v30 = vld [vmem:[#allocation5 + $0xdf0] sm:$0xf0]  ;;  %3806 = vmatpush.bf16.msra.mxu3 %v5513_v35 }
 0x231   :  { %v7532_v33 = vld [vmem:[#allocation5 + $0xfd4] sm:$0xf]  ;;  %v6505_v37 = vor.u32 %v7468_v29, %v6502_v30  ;;  %3825 = vmatpush.bf16.msrb.mxu1 %v6249_v36  ;;  %3794 = vmatmul.bf16.vlgmr.msra.gmra.mxu2 %v7830_v46  ;;  %v3574_v29 = vpop.f32.mrf.mxu1 }
 0x232   :  { %v6758_v34 = vld [vmem:[#allocation5 + $0xff0] sm:$0xf0]  ;;  %v3575_v35 = vadd.f32 %v3574_v29, %v3562_v28  ;;  %v4972_v28 = vld [vmem:[#allocation5 + $0x1d8] sm:$0xf] }
 0x233   :  { %v7332_v38 = vld [vmem:[#allocation5 + $0x994] sm:$0xf]  ;;  %v6761_v40 = vor.u32 %v7532_v33, %v6758_v34  ;;  %3838 = vmatpush.bf16.msrb.mxu2 %v6505_v37  ;;  %3807 = vmatmul.bf16.vlgmr.msra.gmra.mxu3 %v7834_v51  ;;  %v7089_v29 = vld [vmem:[#allocation5 + $0x1f4] sm:$0xf0] }
 0x234   :  { %v5958_v50 = vld [vmem:[#allocation5 + $0x9b0] sm:$0xf0] }
 0x235   :  { %v7396_v39 = vld [vmem:[#allocation5 + $0xb94] sm:$0xf]  ;;  %v5961_v53 = vor.u32 %v7332_v38, %v5958_v50  ;;  %3851 = vmatpush.bf16.msrb.mxu3 %v6761_v40  ;;  %v3587_v40 = vpop.f32.mrf.mxu2 }
 0x236   :  { %v6214_v41 = vld [vmem:[#allocation5 + $0xbb0] sm:$0xf0] }
 0x237   :  { %v7460_v42 = vld [vmem:[#allocation5 + $0xd94] sm:$0xf]  ;;  %v6217_v60 = vor.u32 %v7396_v39, %v6214_v41  ;;  %3813 = vmatpush.bf16.msrb.mxu0 %v5961_v53  ;;  %v3600_v53 = vpop.f32.mrf.mxu3 }
 0x238   :  { %v6470_v43 = vld [vmem:[#allocation5 + $0xdb0] sm:$0xf0] }
 0x239   :  { %v7524_v48 = vld [vmem:[#allocation5 + $0xf94] sm:$0xf]  ;;  %v6473_v61 = vor.u32 %v7460_v42, %v6470_v43  ;;  %3826 = vmatpush.bf16.msrb.mxu1 %v6217_v60 }
 0x23a   :  { %v6726_v52 = vld [vmem:[#allocation5 + $0xfb0] sm:$0xf0] }
 0x23b   :  { %v7324_v62 = vld [vmem:[#allocation5 + $0x954] sm:$0xf]  ;;  %v6729_v1 = vor.u32 %v7524_v48, %v6726_v52  ;;  %3839 = vmatpush.bf16.msrb.mxu2 %v6473_v61  ;;  %v3588_v52 = vadd.f32 %v3587_v40, %v3575_v35  ;;  %v4940_v40 = vld [vmem:[#allocation5 + $0x198] sm:$0xf] }
 0x23c   :  { %v5926_v63 = vld [vmem:[#allocation5 + $0x970] sm:$0xf0] }
 0x23d   :  { %v7388_v0 = vld [vmem:[#allocation5 + $0xb54] sm:$0xf]  ;;  %v5929_v9 = vor.u32 %v7324_v62, %v5926_v63  ;;  %3852 = vmatpush.bf16.msrb.mxu3 %v6729_v1  ;;  %v7910_v63 = vadd.f32 %v3600_v53, %v3588_v52  ;;  %v3589_v23 = vpop.f32.mrf.mxu2  ;;  %v5452_v52 = vld [vmem:[#allocation5 + $0x598] sm:$0xf] }
 0x23e   :  { %v6182_v2 = vld [vmem:[#allocation5 + $0xb70] sm:$0xf0]  ;;  %v7209_v53 = vld [vmem:[#allocation5 + $0x5b4] sm:$0xf0] }
 0x23f   :  { %v7452_v4 = vld [vmem:[#allocation5 + $0xd54] sm:$0xf]  ;;  %v6185_v11 = vor.u32 %v7388_v0, %v6182_v2  ;;  %3814 = vmatpush.bf16.msrb.mxu0 %v5929_v9  ;;  %v3563_v0 = vpop.f32.mrf.mxu0  ;;  %v5644_v23 = vld [vmem:[#allocation5 + $0x718] sm:$0xf] }
 0x240   :  { %v6438_v5 = vld [vmem:[#allocation5 + $0xd70] sm:$0xf0] }
 0x241   :  { %v7516_v6 = vld [vmem:[#allocation5 + $0xf54] sm:$0xf]  ;;  %v6441_v12 = vor.u32 %v7452_v4, %v6438_v5  ;;  %3827 = vmatpush.bf16.msrb.mxu1 %v6185_v11 }
 0x242   :  { %v6694_v8 = vld [vmem:[#allocation5 + $0xf70] sm:$0xf0] }
 0x243   :  { %v7316_v10 = vld [vmem:[#allocation5 + $0x914] sm:$0xf]  ;;  %v6697_v16 = vor.u32 %v7516_v6, %v6694_v8  ;;  %3840 = vmatpush.bf16.msrb.mxu2 %v6441_v12  ;;  %v3576_v8 = vpop.f32.mrf.mxu1 }
 0x244   :  { %v5894_v13 = vld [vmem:[#allocation5 + $0x930] sm:$0xf0]  ;;  %v7137_v8 = vld [vmem:[#allocation5 + $0x374] sm:$0xf0] }
 0x245   :  { %v7380_v14 = vld [vmem:[#allocation5 + $0xb14] sm:$0xf]  ;;  %v5897_v22 = vor.u32 %v7316_v10, %v5894_v13  ;;  %3853 = vmatpush.bf16.msrb.mxu3 %v6697_v16 }
 0x246   :  { %v6150_v17 = vld [vmem:[#allocation5 + $0xb30] sm:$0xf0] }
 0x247   :  { %v7444_v18 = vld [vmem:[#allocation5 + $0xd14] sm:$0xf]  ;;  %v6153_v56 = vor.u32 %v7380_v14, %v6150_v17  ;;  %3815 = vmatpush.bf16.msrb.mxu0 %v5897_v22 }
 0x248   :  { %v6406_v19 = vld [vmem:[#allocation5 + $0xd30] sm:$0xf0] }
 0x249   :  { %v7508_v20 = vld [vmem:[#allocation5 + $0xf14] sm:$0xf]  ;;  %v6409_v24 = vor.u32 %v7444_v18, %v6406_v19  ;;  %3828 = vmatpush.bf16.msrb.mxu1 %v6153_v56 }
 0x24a   :  { %v6662_v21 = vld [vmem:[#allocation5 + $0xf30] sm:$0xf0] }
 0x24b   :  { %v7308_v25 = vld [vmem:[#allocation5 + $0x8d4] sm:$0xf]  ;;  %v6665_v7 = vor.u32 %v7508_v20, %v6662_v21  ;;  %3841 = vmatpush.bf16.msrb.mxu2 %v6409_v24 }
 0x24c   :  { %v5862_v26 = vld [vmem:[#allocation5 + $0x8f0] sm:$0xf0] }
 0x24d   :  { %v7372_v27 = vld [vmem:[#allocation5 + $0xad4] sm:$0xf]  ;;  %v5865_v49 = vor.u32 %v7308_v25, %v5862_v26  ;;  %3854 = vmatpush.bf16.msrb.mxu3 %v6665_v7  ;;  %v5228_v7 = vld [vmem:[#allocation5 + $0x3d8] sm:$0xf] }
 0x24e   :  { %v6118_v30 = vld [vmem:[#allocation5 + $0xaf0] sm:$0xf0] }
 0x24f   :  { %v7436_v31 = vld [vmem:[#allocation5 + $0xcd4] sm:$0xf]  ;;  %v6121_v36 = vor.u32 %v7372_v27, %v6118_v30  ;;  %3816 = vmatpush.bf16.msrb.mxu0 %v5865_v49  ;;  %v3602_v27 = vpop.f32.mrf.mxu3  ;;  %v5740_v49 = vld [vmem:[#allocation5 + $0x7d8] sm:$0xf] }
 0x250   :  { %v6374_v32 = vld [vmem:[#allocation5 + $0xcf0] sm:$0xf0] }
 0x251   :  { %v7500_v33 = vld [vmem:[#allocation5 + $0xed4] sm:$0xf]  ;;  %v6377_v37 = vor.u32 %v7436_v31, %v6374_v32  ;;  %3829 = vmatpush.bf16.msrb.mxu1 %v6121_v36  ;;  %v7153_v31 = vld [vmem:[#allocation5 + $0x3f4] sm:$0xf0] }
 0x252   :  { %v6630_v34 = vld [vmem:[#allocation5 + $0xef0] sm:$0xf0]  ;;  %v5484_v32 = vld [vmem:[#allocation5 + $0x5d8] sm:$0xf] }
 0x253   :  { %v7300_v38 = vld [vmem:[#allocation5 + $0x894] sm:$0xf]  ;;  %v6633_v41 = vor.u32 %v7500_v33, %v6630_v34  ;;  %3842 = vmatpush.bf16.msrb.mxu2 %v6377_v37  ;;  %v7217_v33 = vld [vmem:[#allocation5 + $0x5f4] sm:$0xf0] }
 0x254   :  { %v5830_v50 = vld [vmem:[#allocation5 + $0x8b0] sm:$0xf0]  ;;  %v7281_v36 = vld [vmem:[#allocation5 + $0x7f4] sm:$0xf0] }
 0x255   :  { %v7364_v39 = vld [vmem:[#allocation5 + $0xa94] sm:$0xf]  ;;  %v5833_v62 = vor.u32 %v7300_v38, %v5830_v50  ;;  %3855 = vmatpush.bf16.msrb.mxu3 %v6633_v41  ;;  %v4973_v38 = vor.u32 %v7089_v29, %v4972_v28  ;;  %v5229_v50 = vor.u32 %v7153_v31, %v5228_v7  ;;  %v7081_v41 = vld [vmem:[#allocation5 + $0x1b4] sm:$0xf0]  ;;  %v3626_v31 = vpop.f32.mrf.mxu1 }
 0x256   :  { %v6086_v42 = vld [vmem:[#allocation5 + $0xab0] sm:$0xf0]  ;;  %v4844_v28 = vld [vmem:[#allocation5 + $0xd8] sm:$0xf] }
 0x257   :  { %v7428_v43 = vld [vmem:[#allocation5 + $0xc94] sm:$0xf]  ;;  %v6089_v1 = vor.u32 %v7364_v39, %v6086_v42  ;;  %3817 = vmatpush.bf16.msrb.mxu0 %v5833_v62  ;;  %v5485_v39 = vor.u32 %v7217_v33, %v5484_v32  ;;  %v5196_v42 = vld [vmem:[#allocation5 + $0x398] sm:$0xf]  ;;  %v4941_v62 = vor.u32 %v7081_v41, %v4940_v40 }
 0x258   :  { %v6342_v48 = vld [vmem:[#allocation5 + $0xcb0] sm:$0xf0]  ;;  %v7057_v29 = vld [vmem:[#allocation5 + $0xf4] sm:$0xf0] }
 0x259   :  { %v7492_v60 = vld [vmem:[#allocation5 + $0xe94] sm:$0xf]  ;;  %v6345_v2 = vor.u32 %v7428_v43, %v6342_v48  ;;  %3830 = vmatpush.bf16.msrb.mxu1 %v6089_v1  ;;  %v5741_v43 = vor.u32 %v7281_v36, %v5740_v49  ;;  %v7145_v48 = vld [vmem:[#allocation5 + $0x3b4] sm:$0xf0]  ;;  %v5453_v1 = vor.u32 %v7209_v53, %v5452_v52 }
 0x25a   :  { %v6598_v61 = vld [vmem:[#allocation5 + $0xeb0] sm:$0xf0]  ;;  %v5197_v0 = vor.u32 %v7145_v48, %v5196_v42  ;;  %v5100_v7 = vld [vmem:[#allocation5 + $0x2d8] sm:$0xf] }
 0x25b   :  { %v7292_v4 = vld [vmem:[#allocation5 + $0x854] sm:$0xf]  ;;  %v6601_v9 = vor.u32 %v7492_v60, %v6598_v61  ;;  %3843 = vmatpush.bf16.msrb.mxu2 %v6345_v2  ;;  %v5708_v60 = vld [vmem:[#allocation5 + $0x798] sm:$0xf] }
 0x25c   :  { %v5798_v5 = vld [vmem:[#allocation5 + $0x870] sm:$0xf0]  ;;  %v7273_v61 = vld [vmem:[#allocation5 + $0x7b4] sm:$0xf0] }
 0x25d   :  { %v7356_v6 = vld [vmem:[#allocation5 + $0xa54] sm:$0xf]  ;;  %v5801_v15 = vor.u32 %v7292_v4, %v5798_v5  ;;  %3856 = vmatpush.bf16.msrb.mxu3 %v6601_v9  ;;  %v4908_v2 = vld [vmem:[#allocation5 + $0x158] sm:$0xf] }
 0x25e   :  { %v6054_v10 = vld [vmem:[#allocation5 + $0xa70] sm:$0xf0]  ;;  %v7073_v4 = vld [vmem:[#allocation5 + $0x174] sm:$0xf0] }
 0x25f   :  { %v7420_v11 = vld [vmem:[#allocation5 + $0xc54] sm:$0xf]  ;;  %v6057_v18 = vor.u32 %v7356_v6, %v6054_v10  ;;  %3818 = vmatpush.bf16.msrb.mxu0 %v5801_v15  ;;  %v5164_v5 = vld [vmem:[#allocation5 + $0x358] sm:$0xf]  ;;  %v5709_v6 = vor.u32 %v7273_v61, %v5708_v60  ;;  %v3652_v61 = vpop.f32.mrf.mxu3 }
 0x260   :  { %v6310_v12 = vld [vmem:[#allocation5 + $0xc70] sm:$0xf0]  ;;  %v5420_v9 = vld [vmem:[#allocation5 + $0x558] sm:$0xf] }
 0x261   :  { %v7484_v13 = vld [vmem:[#allocation5 + $0xe54] sm:$0xf]  ;;  %v6313_v19 = vor.u32 %v7420_v11, %v6310_v12  ;;  %3831 = vmatpush.bf16.msrb.mxu1 %v6057_v18  ;;  %v7201_v10 = vld [vmem:[#allocation5 + $0x574] sm:$0xf0] }
 0x262   :  { %v6566_v14 = vld [vmem:[#allocation5 + $0xe70] sm:$0xf0]  ;;  %v5676_v11 = vld [vmem:[#allocation5 + $0x758] sm:$0xf]  ;;  %v5421_v15 = vor.u32 %v7201_v10, %v5420_v9 }
 0x263   :  { %v7284_v16 = vld [vmem:[#allocation5 + $0x814] sm:$0xf]  ;;  %v6569_v56 = vor.u32 %v7484_v13, %v6566_v14  ;;  %3844 = vmatpush.bf16.msrb.mxu2 %v6313_v19  ;;  %v7265_v12 = vld [vmem:[#allocation5 + $0x774] sm:$0xf0]  ;;  %v4909_v13 = vor.u32 %v7073_v4, %v4908_v2  ;;  %v5165_v14 = vor.u32 %v7137_v8, %v5164_v5 }
 0x264   :  { %v5766_v17 = vld [vmem:[#allocation5 + $0x830] sm:$0xf0]  ;;  %v5132_v18 = vld [vmem:[#allocation5 + $0x318] sm:$0xf]  ;;  %v5677_v19 = vor.u32 %v7265_v12, %v5676_v11  ;;  %v3628_v11 = vpop.f32.mrf.mxu1 }
 0x265   :  { %v7348_v20 = vld [vmem:[#allocation5 + $0xa14] sm:$0xf]  ;;  %v5769_v30 = vor.u32 %v7284_v16, %v5766_v17  ;;  %3857 = vmatpush.bf16.msrb.mxu3 %v6569_v56  ;;  %v4876_v16 = vld [vmem:[#allocation5 + $0x118] sm:$0xf] }
 0x266   :  { %v6022_v21 = vld [vmem:[#allocation5 + $0xa30] sm:$0xf0]  ;;  %v7065_v17 = vld [vmem:[#allocation5 + $0x134] sm:$0xf0] }
 0x267   :  { %v7412_v22 = vld [vmem:[#allocation5 + $0xc14] sm:$0xf]  ;;  %v6025_v34 = vor.u32 %v7348_v20, %v6022_v21  ;;  %3819 = vmatpush.bf16.msrb.mxu0 %v5769_v30  ;;  %v7129_v20 = vld [vmem:[#allocation5 + $0x334] sm:$0xf0] }
 0x268   :  { %v6278_v24 = vld [vmem:[#allocation5 + $0xc30] sm:$0xf0]  ;;  %v5388_v21 = vld [vmem:[#allocation5 + $0x518] sm:$0xf] }
 0x269   :  { %v7476_v25 = vld [vmem:[#allocation5 + $0xe14] sm:$0xf]  ;;  %v6281_v35 = vor.u32 %v7412_v22, %v6278_v24  ;;  %3832 = vmatpush.bf16.msrb.mxu1 %v6025_v34  ;;  %v7193_v22 = vld [vmem:[#allocation5 + $0x534] sm:$0xf0]  ;;  %v4877_v24 = vor.u32 %v7065_v17, %v4876_v16 }
 0x26a   :  { %v6534_v26 = vld [vmem:[#allocation5 + $0xe30] sm:$0xf0]  ;;  %3820 = vmatmul.bf16.vlgmr.msrb.gmra.mxu0 %v7844_v54  ;;  %v7257_v56 = vld [vmem:[#allocation5 + $0x734] sm:$0xf0]  ;;  %v5389_v27 = vor.u32 %v7193_v22, %v5388_v21 }
 0x26b   :  { %v6537_v37 = vor.u32 %v7476_v25, %v6534_v26  ;;  %3845 = vmatpush.bf16.msrb.mxu2 %v6281_v35  ;;  %3864 = vmatpush.bf16.msra.mxu0 %v4973_v38  ;;  %v3613_v25 = vpop.f32.mrf.mxu0  ;;  %v5133_v26 = vor.u32 %v7129_v20, %v5132_v18  ;;  %v5645_v32 = vor.u32 %v7257_v56, %v5644_v23  ;;  %v7121_v33 = vld [vmem:[#allocation5 + $0x2f4] sm:$0xf0] }
 0x26c   :  { %3833 = vmatmul.bf16.vlgmr.msrb.gmra.mxu1 %v7848_v59  ;;  %v3614_v30 = vadd.f32 %v3613_v25, %v7910_v63  ;;  %v5356_v34 = vld [vmem:[#allocation5 + $0x4d8] sm:$0xf]  ;;  %v4845_v38 = vor.u32 %v7057_v29, %v4844_v28 }
 0x26d   :  { %3858 = vmatpush.bf16.msrb.mxu3 %v6537_v37  ;;  %3877 = vmatpush.bf16.msra.mxu1 %v5229_v50  ;;  %v7185_v35 = vld [vmem:[#allocation5 + $0x4f4] sm:$0xf0]  ;;  %v5101_v50 = vor.u32 %v7121_v33, %v5100_v7  ;;  %v3654_v7 = vpop.f32.mrf.mxu3 }
 0x26e   :  { %3846 = vmatmul.bf16.vlgmr.msrb.gmra.mxu2 %v7842_v44  ;;  %v5612_v49 = vld [vmem:[#allocation5 + $0x6d8] sm:$0xf]  ;;  %v3627_v37 = vadd.f32 %v3626_v31, %v3614_v30 }
 0x26f   :  { %3890 = vmatpush.bf16.msra.mxu2 %v5485_v39  ;;  %3865 = vmatpush.bf16.msra.mxu0 %v4941_v62  ;;  %v7249_v36 = vld [vmem:[#allocation5 + $0x6f4] sm:$0xf0]  ;;  %v5357_v39 = vor.u32 %v7185_v35, %v5356_v34 }
 0x270   :  { %3859 = vmatmul.bf16.vlgmr.msrb.gmra.mxu3 %v7846_v58  ;;  %v4812_v40 = vld [vmem:[#allocation5 + $0x98] sm:$0xf]  ;;  %v5613_v63 = vor.u32 %v7249_v36, %v5612_v49 }
 0x271   :  { %3903 = vmatpush.bf16.msra.mxu3 %v5741_v43  ;;  %3878 = vmatpush.bf16.msra.mxu1 %v5197_v0  ;;  %v7049_v41 = vld [vmem:[#allocation5 + $0xb4] sm:$0xf0]  ;;  %v3639_v43 = vpop.f32.mrf.mxu2 }
 0x272   :  { %v5068_v42 = vld [vmem:[#allocation5 + $0x298] sm:$0xf]  ;;  %v3640_v60 = vadd.f32 %v3639_v43, %v3627_v37 }
 0x273   :  { %3891 = vmatpush.bf16.msra.mxu2 %v5453_v1  ;;  %3866 = vmatpush.bf16.msra.mxu0 %v4909_v13  ;;  %v7113_v48 = vld [vmem:[#allocation5 + $0x2b4] sm:$0xf0]  ;;  %v4813_v1 = vor.u32 %v7049_v41, %v4812_v40  ;;  %v3615_v4 = vpop.f32.mrf.mxu0 }
 0x274   :  { %v5324_v52 = vld [vmem:[#allocation5 + $0x498] sm:$0xf]  ;;  %v7917_v2 = vadd.f32 %v3652_v61, %v3640_v60  ;;  %v5069_v5 = vor.u32 %v7113_v48, %v5068_v42 }
 0x275   :  { %3904 = vmatpush.bf16.msra.mxu3 %v5709_v6  ;;  %3879 = vmatpush.bf16.msra.mxu1 %v5165_v14  ;;  %v7177_v53 = vld [vmem:[#allocation5 + $0x4b4] sm:$0xf0] }
 0x276   :  { %v5580_v62 = vld [vmem:[#allocation5 + $0x698] sm:$0xf]  ;;  %v5325_v6 = vor.u32 %v7177_v53, %v5324_v52 }
 0x277   :  { %3892 = vmatpush.bf16.msra.mxu2 %v5421_v15  ;;  %3867 = vmatpush.bf16.msra.mxu0 %v4877_v24  ;;  %v7241_v0 = vld [vmem:[#allocation5 + $0x6b4] sm:$0xf0] }
 0x278   :  { %v4780_v8 = vld [vmem:[#allocation5 + $0x58] sm:$0xf]  ;;  %v5581_v12 = vor.u32 %v7241_v0, %v5580_v62 }
 0x279   :  { %3905 = vmatpush.bf16.msra.mxu3 %v5677_v19  ;;  %3880 = vmatpush.bf16.msra.mxu1 %v5133_v26  ;;  %v7041_v9 = vld [vmem:[#allocation5 + $0x74] sm:$0xf0]  ;;  %v3641_v25 = vpop.f32.mrf.mxu2 }
 0x27a   :  { %v5036_v10 = vld [vmem:[#allocation5 + $0x258] sm:$0xf]  ;;  %v4781_v18 = vor.u32 %v7041_v9, %v4780_v8 }
 0x27b   :  { %3893 = vmatpush.bf16.msra.mxu2 %v5389_v27  ;;  %3868 = vmatpush.bf16.msra.mxu0 %v4845_v38  ;;  %v7105_v13 = vld [vmem:[#allocation5 + $0x274] sm:$0xf0]  ;;  %v3665_v7 = vpop.f32.mrf.mxu0 }
 0x27c   :  { %v5292_v14 = vld [vmem:[#allocation5 + $0x458] sm:$0xf]  ;;  %v5037_v21 = vor.u32 %v7105_v13, %v5036_v10 }
 0x27d   :  { %3906 = vmatpush.bf16.msra.mxu3 %v5645_v32  ;;  %3881 = vmatpush.bf16.msra.mxu1 %v5101_v50  ;;  %v7169_v15 = vld [vmem:[#allocation5 + $0x474] sm:$0xf0] }
 0x27e   :  { %v5548_v16 = vld [vmem:[#allocation5 + $0x658] sm:$0xf]  ;;  %v5293_v22 = vor.u32 %v7169_v15, %v5292_v14 }
 0x27f   :  { %3894 = vmatpush.bf16.msra.mxu2 %v5357_v39  ;;  %v7233_v17 = vld [vmem:[#allocation5 + $0x674] sm:$0xf0]  ;;  %3869 = vmatpush.bf16.msra.mxu0 %v4813_v1 }
 0x280   :  { %v4748_v19 = vld [vmem:[#allocation5 + $0x18] sm:$0xf]  ;;  %v5549_v26 = vor.u32 %v7233_v17, %v5548_v16 }
 0x281   :  { %3907 = vmatpush.bf16.msra.mxu3 %v5613_v63  ;;  %v7033_v20 = vld [vmem:[#allocation5 + $0x34] sm:$0xf0]  ;;  %3882 = vmatpush.bf16.msra.mxu1 %v5069_v5 }
 0x282   :  { %v5004_v23 = vld [vmem:[#allocation5 + $0x218] sm:$0xf]  ;;  %v4749_v33 = vor.u32 %v7033_v20, %v4748_v19 }
 0x283   :  { %3895 = vmatpush.bf16.msra.mxu2 %v5325_v6  ;;  %v7097_v56 = vld [vmem:[#allocation5 + $0x234] sm:$0xf0]  ;;  %3870 = vmatpush.bf16.msra.mxu0 %v4781_v18 }
 0x284   :  { %v5260_v24 = vld [vmem:[#allocation5 + $0x418] sm:$0xf]  ;;  %v5005_v36 = vor.u32 %v7097_v56, %v5004_v23 }
 0x285   :  { %3908 = vmatpush.bf16.msra.mxu3 %v5581_v12  ;;  %v7161_v27 = vld [vmem:[#allocation5 + $0x434] sm:$0xf0]  ;;  %3883 = vmatpush.bf16.msra.mxu1 %v5037_v21 }
 0x286   :  { %v5516_v28 = vld [vmem:[#allocation5 + $0x618] sm:$0xf]  ;;  %v5261_v37 = vor.u32 %v7161_v27, %v5260_v24 }
 0x287   :  { %v7225_v29 = vld [vmem:[#allocation5 + $0x634] sm:$0xf0]  ;;  %3896 = vmatpush.bf16.msra.mxu2 %v5293_v22  ;;  %3871 = vmatpush.bf16.msra.mxu0 %v4749_v33  ;;  %v7923_v22 = vld [vmem:[#allocation7] sm:$0xff] }
 0x288   :  { %v5996_v30 = vld [vmem:[#allocation5 + $0x9d8] sm:$0xf]  ;;  %v5517_v39 = vor.u32 %v7225_v29, %v5516_v28  ;;  %v668_v23 = vperm.slane %v7923_v22, 4 }
 0x289   :  { %v7345_v31 = vld [vmem:[#allocation5 + $0x9f4] sm:$0xf0]  ;;  %3909 = vmatpush.bf16.msra.mxu3 %v5549_v26  ;;  %3884 = vmatpush.bf16.msra.mxu1 %v5005_v36 }
 0x28a   :  { %v6252_v32 = vld [vmem:[#allocation5 + $0xbd8] sm:$0xf]  ;;  %v5997_v40 = vor.u32 %v7345_v31, %v5996_v30  ;;  %3872 = vmatmul.bf16.vlgmr.msra.gmra.mxu0 %v7832_v47 }
 0x28b   :  { %v7409_v34 = vld [vmem:[#allocation5 + $0xbf4] sm:$0xf0]  ;;  %3897 = vmatpush.bf16.msra.mxu2 %v5261_v37 }
 0x28c   :  { %v6508_v35 = vld [vmem:[#allocation5 + $0xdd8] sm:$0xf]  ;;  %v6253_v41 = vor.u32 %v7409_v34, %v6252_v32  ;;  %3916 = vmatpush.bf16.msrb.mxu0 %v5997_v40  ;;  %3885 = vmatmul.bf16.vlgmr.msra.gmra.mxu1 %v7836_v55 }
 0x28d   :  { %v7473_v49 = vld [vmem:[#allocation5 + $0xdf4] sm:$0xf0]  ;;  %3910 = vmatpush.bf16.msra.mxu3 %v5517_v39 }
 0x28e   :  { %v6764_v38 = vld [vmem:[#allocation5 + $0xfd8] sm:$0xf]  ;;  %v6509_v42 = vor.u32 %v7473_v49, %v6508_v35  ;;  %3929 = vmatpush.bf16.msrb.mxu1 %v6253_v41  ;;  %3898 = vmatmul.bf16.vlgmr.msra.gmra.mxu2 %v7830_v46  ;;  %v3666_v35 = vadd.f32 %v3665_v7, %v668_v23  ;;  %v3678_v49 = vpop.f32.mrf.mxu1 }
 0x28f   :  { %v7537_v50 = vld [vmem:[#allocation5 + $0xff4] sm:$0xf0] }
 0x290   :  { %v5964_v43 = vld [vmem:[#allocation5 + $0x998] sm:$0xf]  ;;  %v6765_v52 = vor.u32 %v7537_v50, %v6764_v38  ;;  %3942 = vmatpush.bf16.msrb.mxu2 %v6509_v42  ;;  %3911 = vmatmul.bf16.vlgmr.msra.gmra.mxu3 %v7834_v51  ;;  %v3679_v41 = vadd.f32 %v3678_v49, %v3666_v35 }
 0x291   :  { %v7337_v63 = vld [vmem:[#allocation5 + $0x9b4] sm:$0xf0] }
 0x292   :  { %v6220_v48 = vld [vmem:[#allocation5 + $0xb98] sm:$0xf]  ;;  %v5965_v1 = vor.u32 %v7337_v63, %v5964_v43  ;;  %3955 = vmatpush.bf16.msrb.mxu3 %v6765_v52 }
 0x293   :  { %v7401_v53 = vld [vmem:[#allocation5 + $0xbb4] sm:$0xf0] }
 0x294   :  { %v6476_v60 = vld [vmem:[#allocation5 + $0xd98] sm:$0xf]  ;;  %v6221_v4 = vor.u32 %v7401_v53, %v6220_v48  ;;  %3917 = vmatpush.bf16.msrb.mxu0 %v5965_v1 }
 0x295   :  { %v7465_v61 = vld [vmem:[#allocation5 + $0xdb4] sm:$0xf0] }
 0x296   :  { %v6732_v62 = vld [vmem:[#allocation5 + $0xf98] sm:$0xf]  ;;  %v6477_v5 = vor.u32 %v7465_v61, %v6476_v60  ;;  %3930 = vmatpush.bf16.msrb.mxu1 %v6221_v4  ;;  %v3691_v60 = vpop.f32.mrf.mxu2 }
 0x297   :  { %v7529_v0 = vld [vmem:[#allocation5 + $0xfb4] sm:$0xf0]  ;;  %v3692_v4 = vadd.f32 %v3691_v60, %v3679_v41  ;;  %v5486_v41 = vld [vmem:[#allocation5 + $0x5f8] sm:$0xf0] }
 0x298   :  { %v5932_v6 = vld [vmem:[#allocation5 + $0x958] sm:$0xf]  ;;  %v6733_v10 = vor.u32 %v7529_v0, %v6732_v62  ;;  %3943 = vmatpush.bf16.msrb.mxu2 %v6477_v5  ;;  %v3704_v5 = vpop.f32.mrf.mxu3 }
 0x299   :  { %v7329_v8 = vld [vmem:[#allocation5 + $0x974] sm:$0xf0] }
 0x29a   :  { %v6188_v9 = vld [vmem:[#allocation5 + $0xb58] sm:$0xf]  ;;  %v5933_v16 = vor.u32 %v7329_v8, %v5932_v6  ;;  %3956 = vmatpush.bf16.msrb.mxu3 %v6733_v10  ;;  %v7926_v10 = vadd.f32 %v3704_v5, %v3692_v4  ;;  %v5198_v5 = vld [vmem:[#allocation5 + $0x3b8] sm:$0xf0] }
 0x29b   :  { %v7393_v11 = vld [vmem:[#allocation5 + $0xb74] sm:$0xf0] }
 0x29c   :  { %v6444_v12 = vld [vmem:[#allocation5 + $0xd58] sm:$0xf]  ;;  %v6189_v18 = vor.u32 %v7393_v11, %v6188_v9  ;;  %3918 = vmatpush.bf16.msrb.mxu0 %v5933_v16  ;;  %v3667_v11 = vpop.f32.mrf.mxu0 }
 0x29d   :  { %v7457_v13 = vld [vmem:[#allocation5 + $0xd74] sm:$0xf0]  ;;  %v5710_v11 = vld [vmem:[#allocation5 + $0x7b8] sm:$0xf0] }
 0x29e   :  { %v6700_v14 = vld [vmem:[#allocation5 + $0xf58] sm:$0xf]  ;;  %v6445_v19 = vor.u32 %v7457_v13, %v6444_v12  ;;  %3931 = vmatpush.bf16.msrb.mxu1 %v6189_v18 }
 0x29f   :  { %v7521_v15 = vld [vmem:[#allocation5 + $0xf74] sm:$0xf0] }
 0x2a0   :  { %v5900_v17 = vld [vmem:[#allocation5 + $0x918] sm:$0xf]  ;;  %v6701_v56 = vor.u32 %v7521_v15, %v6700_v14  ;;  %3944 = vmatpush.bf16.msrb.mxu2 %v6445_v19  ;;  %v3706_v49 = vpop.f32.mrf.mxu3 }
 0x2a1   :  { %v7321_v20 = vld [vmem:[#allocation5 + $0x934] sm:$0xf0] }
 0x2a2   :  { %v6156_v21 = vld [vmem:[#allocation5 + $0xb18] sm:$0xf]  ;;  %v5901_v29 = vor.u32 %v7321_v20, %v5900_v17  ;;  %3957 = vmatpush.bf16.msrb.mxu3 %v6701_v56  ;;  %v3680_v17 = vpop.f32.mrf.mxu1 }
 0x2a3   :  { %v7385_v24 = vld [vmem:[#allocation5 + $0xb34] sm:$0xf0]  ;;  %v7133_v17 = vld [vmem:[#allocation5 + $0x35c] sm:$0xf] }
 0x2a4   :  { %v6412_v25 = vld [vmem:[#allocation5 + $0xd18] sm:$0xf]  ;;  %v6157_v30 = vor.u32 %v7385_v24, %v6156_v21  ;;  %3919 = vmatpush.bf16.msrb.mxu0 %v5901_v29  ;;  %v3717_v49 = vpop.f32.mrf.mxu0 }
 0x2a5   :  { %v7449_v26 = vld [vmem:[#allocation5 + $0xd34] sm:$0xf0] }
 0x2a6   :  { %v6668_v27 = vld [vmem:[#allocation5 + $0xf18] sm:$0xf]  ;;  %v6413_v31 = vor.u32 %v7449_v26, %v6412_v25  ;;  %3932 = vmatpush.bf16.msrb.mxu1 %v6157_v30 }
 0x2a7   :  { %v7513_v28 = vld [vmem:[#allocation5 + $0xf34] sm:$0xf0] }
 0x2a8   :  { %v5868_v32 = vld [vmem:[#allocation5 + $0x8d8] sm:$0xf]  ;;  %v6669_v36 = vor.u32 %v7513_v28, %v6668_v27  ;;  %3945 = vmatpush.bf16.msrb.mxu2 %v6413_v31  ;;  %v3693_v31 = vpop.f32.mrf.mxu2 }
 0x2a9   :  { %v7313_v33 = vld [vmem:[#allocation5 + $0x8f4] sm:$0xf0]  ;;  %v7189_v31 = vld [vmem:[#allocation5 + $0x51c] sm:$0xf] }
 0x2aa   :  { %v6124_v34 = vld [vmem:[#allocation5 + $0xad8] sm:$0xf]  ;;  %v5869_v42 = vor.u32 %v7313_v33, %v5868_v32  ;;  %3958 = vmatpush.bf16.msrb.mxu3 %v6669_v36  ;;  %v7085_v36 = vld [vmem:[#allocation5 + $0x1dc] sm:$0xf] }
 0x2ab   :  { %v7377_v37 = vld [vmem:[#allocation5 + $0xaf4] sm:$0xf0] }
 0x2ac   :  { %v6380_v38 = vld [vmem:[#allocation5 + $0xcd8] sm:$0xf]  ;;  %v6125_v43 = vor.u32 %v7377_v37, %v6124_v34  ;;  %3920 = vmatpush.bf16.msrb.mxu0 %v5869_v42  ;;  %v4974_v37 = vld [vmem:[#allocation5 + $0x1f8] sm:$0xf0] }
 0x2ad   :  { %v7441_v50 = vld [vmem:[#allocation5 + $0xcf4] sm:$0xf0] }
 0x2ae   :  { %v6636_v39 = vld [vmem:[#allocation5 + $0xed8] sm:$0xf]  ;;  %v6381_v63 = vor.u32 %v7441_v50, %v6380_v38  ;;  %3933 = vmatpush.bf16.msrb.mxu1 %v6125_v43  ;;  %v7149_v38 = vld [vmem:[#allocation5 + $0x3dc] sm:$0xf] }
 0x2af   :  { %v7505_v40 = vld [vmem:[#allocation5 + $0xef4] sm:$0xf0] }
 0x2b0   :  { %v5836_v48 = vld [vmem:[#allocation5 + $0x898] sm:$0xf]  ;;  %v6637_v61 = vor.u32 %v7505_v40, %v6636_v39  ;;  %3946 = vmatpush.bf16.msrb.mxu2 %v6381_v63  ;;  %v5230_v39 = vld [vmem:[#allocation5 + $0x3f8] sm:$0xf0] }
 0x2b1   :  { %v7305_v52 = vld [vmem:[#allocation5 + $0x8b4] sm:$0xf0]  ;;  %v7213_v40 = vld [vmem:[#allocation5 + $0x5dc] sm:$0xf]  ;;  %v5233_v60 = vor.u32 %v7149_v38, %v5230_v39 }
 0x2b2   :  { %v6092_v53 = vld [vmem:[#allocation5 + $0xa98] sm:$0xf]  ;;  %v5837_v9 = vor.u32 %v7305_v52, %v5836_v48  ;;  %3959 = vmatpush.bf16.msrb.mxu3 %v6637_v61  ;;  %v7277_v63 = vld [vmem:[#allocation5 + $0x7dc] sm:$0xf]  ;;  %v5489_v61 = vor.u32 %v7213_v40, %v5486_v41  ;;  %v3718_v40 = vadd.f32 %v3717_v49, %v7926_v10  ;;  %v3730_v41 = vpop.f32.mrf.mxu1 }
 0x2b3   :  { %v7369_v62 = vld [vmem:[#allocation5 + $0xab4] sm:$0xf0]  ;;  %v5742_v48 = vld [vmem:[#allocation5 + $0x7f8] sm:$0xf0] }
 0x2b4   :  { %v6348_v0 = vld [vmem:[#allocation5 + $0xc98] sm:$0xf]  ;;  %v6093_v12 = vor.u32 %v7369_v62, %v6092_v53  ;;  %3921 = vmatpush.bf16.msrb.mxu0 %v5837_v9  ;;  %v4977_v53 = vor.u32 %v7085_v36, %v4974_v37  ;;  %v7077_v62 = vld [vmem:[#allocation5 + $0x19c] sm:$0xf]  ;;  %v5745_v4 = vor.u32 %v7277_v63, %v5742_v48 }
 0x2b5   :  { %v7433_v1 = vld [vmem:[#allocation5 + $0xcb4] sm:$0xf0]  ;;  %v7269_v9 = vld [vmem:[#allocation5 + $0x79c] sm:$0xf] }
 0x2b6   :  { %v6604_v6 = vld [vmem:[#allocation5 + $0xe98] sm:$0xf]  ;;  %v6349_v13 = vor.u32 %v7433_v1, %v6348_v0  ;;  %3934 = vmatpush.bf16.msrb.mxu1 %v6093_v12  ;;  %v4942_v0 = vld [vmem:[#allocation5 + $0x1b8] sm:$0xf0] }
 0x2b7   :  { %v7497_v8 = vld [vmem:[#allocation5 + $0xeb4] sm:$0xf0]  ;;  %v7141_v1 = vld [vmem:[#allocation5 + $0x39c] sm:$0xf]  ;;  %v4945_v12 = vor.u32 %v7077_v62, %v4942_v0 }
 0x2b8   :  { %v5804_v14 = vld [vmem:[#allocation5 + $0x858] sm:$0xf]  ;;  %v6605_v18 = vor.u32 %v7497_v8, %v6604_v6  ;;  %3947 = vmatpush.bf16.msrb.mxu2 %v6349_v13  ;;  %v7205_v6 = vld [vmem:[#allocation5 + $0x59c] sm:$0xf]  ;;  %v5201_v13 = vor.u32 %v7141_v1, %v5198_v5 }
 0x2b9   :  { %v7297_v15 = vld [vmem:[#allocation5 + $0x874] sm:$0xf0]  ;;  %v5454_v8 = vld [vmem:[#allocation5 + $0x5b8] sm:$0xf0] }
 0x2ba   :  { %v6060_v16 = vld [vmem:[#allocation5 + $0xa58] sm:$0xf]  ;;  %v5805_v24 = vor.u32 %v7297_v15, %v5804_v14  ;;  %3960 = vmatpush.bf16.msrb.mxu3 %v6605_v18  ;;  %v5457_v14 = vor.u32 %v7205_v6, %v5454_v8  ;;  %v7069_v15 = vld [vmem:[#allocation5 + $0x15c] sm:$0xf]  ;;  %v5713_v18 = vor.u32 %v7269_v9, %v5710_v11  ;;  %v3743_v6 = vpop.f32.mrf.mxu2 }
 0x2bb   :  { %v7361_v19 = vld [vmem:[#allocation5 + $0xa74] sm:$0xf0]  ;;  %v7053_v38 = vld [vmem:[#allocation5 + $0xdc] sm:$0xf] }
 0x2bc   :  { %v6316_v20 = vld [vmem:[#allocation5 + $0xc58] sm:$0xf]  ;;  %v6061_v27 = vor.u32 %v7361_v19, %v6060_v16  ;;  %3922 = vmatpush.bf16.msrb.mxu0 %v5805_v24  ;;  %v4910_v16 = vld [vmem:[#allocation5 + $0x178] sm:$0xf0] }
 0x2bd   :  { %v7425_v21 = vld [vmem:[#allocation5 + $0xc74] sm:$0xf0]  ;;  %v5166_v19 = vld [vmem:[#allocation5 + $0x378] sm:$0xf0]  ;;  %v4913_v24 = vor.u32 %v7069_v15, %v4910_v16 }
 0x2be   :  { %v6572_v23 = vld [vmem:[#allocation5 + $0xe58] sm:$0xf]  ;;  %v6317_v28 = vor.u32 %v7425_v21, %v6316_v20  ;;  %3935 = vmatpush.bf16.msrb.mxu1 %v6061_v27  ;;  %v7197_v20 = vld [vmem:[#allocation5 + $0x55c] sm:$0xf] }
 0x2bf   :  { %v7489_v56 = vld [vmem:[#allocation5 + $0xe74] sm:$0xf0]  ;;  %v5422_v21 = vld [vmem:[#allocation5 + $0x578] sm:$0xf0] }
 0x2c0   :  { %v5772_v25 = vld [vmem:[#allocation5 + $0x818] sm:$0xf]  ;;  %v6573_v32 = vor.u32 %v7489_v56, %v6572_v23  ;;  %3948 = vmatpush.bf16.msrb.mxu2 %v6317_v28  ;;  %v7261_v23 = vld [vmem:[#allocation5 + $0x75c] sm:$0xf] }
 0x2c1   :  { %v7289_v26 = vld [vmem:[#allocation5 + $0x834] sm:$0xf0]  ;;  %v5678_v56 = vld [vmem:[#allocation5 + $0x778] sm:$0xf0] }
 0x2c2   :  { %v6028_v29 = vld [vmem:[#allocation5 + $0xa18] sm:$0xf]  ;;  %v5773_v50 = vor.u32 %v7289_v26, %v5772_v25  ;;  %3961 = vmatpush.bf16.msrb.mxu3 %v6573_v32  ;;  %v5169_v25 = vor.u32 %v7133_v17, %v5166_v19  ;;  %v5425_v26 = vor.u32 %v7197_v20, %v5422_v21  ;;  %v7061_v27 = vld [vmem:[#allocation5 + $0x11c] sm:$0xf] }
 0x2c3   :  { %v7353_v7 = vld [vmem:[#allocation5 + $0xa34] sm:$0xf0]  ;;  %v4878_v28 = vld [vmem:[#allocation5 + $0x138] sm:$0xf0] }
 0x2c4   :  { %v6284_v30 = vld [vmem:[#allocation5 + $0xc18] sm:$0xf]  ;;  %v6029_v42 = vor.u32 %v7353_v7, %v6028_v29  ;;  %3923 = vmatpush.bf16.msrb.mxu0 %v5773_v50  ;;  %v7125_v29 = vld [vmem:[#allocation5 + $0x31c] sm:$0xf]  ;;  %v5681_v7 = vor.u32 %v7261_v23, %v5678_v56 }
 0x2c5   :  { %v7417_v33 = vld [vmem:[#allocation5 + $0xc34] sm:$0xf0]  ;;  %v5390_v32 = vld [vmem:[#allocation5 + $0x538] sm:$0xf0] }
 0x2c6   :  { %v6540_v34 = vld [vmem:[#allocation5 + $0xe18] sm:$0xf]  ;;  %v6285_v43 = vor.u32 %v7417_v33, %v6284_v30  ;;  %3936 = vmatpush.bf16.msrb.mxu1 %v6029_v42  ;;  %v5134_v30 = vld [vmem:[#allocation5 + $0x338] sm:$0xf0]  ;;  %v5393_v37 = vor.u32 %v7189_v31, %v5390_v32 }
 0x2c7   :  { %v7481_v35 = vld [vmem:[#allocation5 + $0xe34] sm:$0xf0]  ;;  %3924 = vmatmul.bf16.vlgmr.msrb.gmra.mxu0 %v7844_v54  ;;  %v7253_v33 = vld [vmem:[#allocation5 + $0x71c] sm:$0xf]  ;;  %v5137_v36 = vor.u32 %v7125_v29, %v5134_v30 }
 0x2c8   :  { %v6541_v52 = vor.u32 %v7481_v35, %v6540_v34  ;;  %3949 = vmatpush.bf16.msrb.mxu2 %v6285_v43  ;;  %3968 = vmatpush.bf16.msra.mxu0 %v4977_v53  ;;  %v5646_v34 = vld [vmem:[#allocation5 + $0x738] sm:$0xf0]  ;;  %v4881_v35 = vor.u32 %v7061_v27, %v4878_v28 }
 0x2c9   :  { %3937 = vmatmul.bf16.vlgmr.msrb.gmra.mxu1 %v7848_v59  ;;  %v4846_v50 = vld [vmem:[#allocation5 + $0xf8] sm:$0xf0]  ;;  %v5649_v42 = vor.u32 %v7253_v33, %v5646_v34 }
 0x2ca   :  { %3962 = vmatpush.bf16.msrb.mxu3 %v6541_v52  ;;  %3981 = vmatpush.bf16.msra.mxu1 %v5233_v60  ;;  %v7117_v39 = vld [vmem:[#allocation5 + $0x2dc] sm:$0xf]  ;;  %v3731_v60 = vadd.f32 %v3730_v41, %v3718_v40 }
 0x2cb   :  { %3950 = vmatmul.bf16.vlgmr.msrb.gmra.mxu2 %v7842_v44  ;;  %v5102_v43 = vld [vmem:[#allocation5 + $0x2f8] sm:$0xf0] }
 0x2cc   :  { %3994 = vmatpush.bf16.msra.mxu2 %v5489_v61  ;;  %3969 = vmatpush.bf16.msra.mxu0 %v4945_v12  ;;  %v7181_v63 = vld [vmem:[#allocation5 + $0x4dc] sm:$0xf]  ;;  %v4849_v61 = vor.u32 %v7053_v38, %v4846_v50  ;;  %v5105_v62 = vor.u32 %v7117_v39, %v5102_v43  ;;  %v3744_v12 = vadd.f32 %v3743_v6, %v3731_v60 }
 0x2cd   :  { %3963 = vmatmul.bf16.vlgmr.msrb.gmra.mxu3 %v7846_v58  ;;  %v5358_v48 = vld [vmem:[#allocation5 + $0x4f8] sm:$0xf0] }
 0x2ce   :  { %4007 = vmatpush.bf16.msra.mxu3 %v5745_v4  ;;  %3982 = vmatpush.bf16.msra.mxu1 %v5201_v13  ;;  %v7245_v52 = vld [vmem:[#allocation5 + $0x6dc] sm:$0xf]  ;;  %v5361_v0 = vor.u32 %v7181_v63, %v5358_v48  ;;  %v3756_v13 = vpop.f32.mrf.mxu3 }
 0x2cf   :  { %v5614_v53 = vld [vmem:[#allocation5 + $0x6f8] sm:$0xf0]  ;;  %v7933_v17 = vadd.f32 %v3756_v13, %v3744_v12 }
 0x2d0   :  { %3995 = vmatpush.bf16.msra.mxu2 %v5457_v14  ;;  %3970 = vmatpush.bf16.msra.mxu0 %v4913_v24  ;;  %v7045_v1 = vld [vmem:[#allocation5 + $0x9c] sm:$0xf]  ;;  %v5617_v10 = vor.u32 %v7245_v52, %v5614_v53  ;;  %v3732_v24 = vpop.f32.mrf.mxu1 }
 0x2d1   :  { %v4814_v4 = vld [vmem:[#allocation5 + $0xb8] sm:$0xf0] }
 0x2d2   :  { %4008 = vmatpush.bf16.msra.mxu3 %v5713_v18  ;;  %3983 = vmatpush.bf16.msra.mxu1 %v5169_v25  ;;  %v7109_v5 = vld [vmem:[#allocation5 + $0x29c] sm:$0xf]  ;;  %v4817_v16 = vor.u32 %v7045_v1, %v4814_v4  ;;  %v3719_v18 = vpop.f32.mrf.mxu0 }
 0x2d3   :  { %v5070_v8 = vld [vmem:[#allocation5 + $0x2b8] sm:$0xf0] }
 0x2d4   :  { %3996 = vmatpush.bf16.msra.mxu2 %v5425_v26  ;;  %3971 = vmatpush.bf16.msra.mxu0 %v4881_v35  ;;  %v7173_v9 = vld [vmem:[#allocation5 + $0x49c] sm:$0xf]  ;;  %v5073_v19 = vor.u32 %v7109_v5, %v5070_v8 }
 0x2d5   :  { %v5326_v11 = vld [vmem:[#allocation5 + $0x4b8] sm:$0xf0] }
 0x2d6   :  { %4009 = vmatpush.bf16.msra.mxu3 %v5681_v7  ;;  %3984 = vmatpush.bf16.msra.mxu1 %v5137_v36  ;;  %v7237_v14 = vld [vmem:[#allocation5 + $0x69c] sm:$0xf]  ;;  %v5329_v20 = vor.u32 %v7173_v9, %v5326_v11  ;;  %v3758_v41 = vpop.f32.mrf.mxu3 }
 0x2d7   :  { %v5582_v15 = vld [vmem:[#allocation5 + $0x6b8] sm:$0xf0] }
 0x2d8   :  { %3997 = vmatpush.bf16.msra.mxu2 %v5393_v37  ;;  %3972 = vmatpush.bf16.msra.mxu0 %v4849_v61  ;;  %v7037_v21 = vld [vmem:[#allocation5 + $0x5c] sm:$0xf]  ;;  %v5585_v25 = vor.u32 %v7237_v14, %v5582_v15  ;;  %v3745_v37 = vpop.f32.mrf.mxu2 }
 0x2d9   :  { %v4782_v23 = vld [vmem:[#allocation5 + $0x78] sm:$0xf0] }
 0x2da   :  { %4010 = vmatpush.bf16.msra.mxu3 %v5649_v42  ;;  %3985 = vmatpush.bf16.msra.mxu1 %v5105_v62  ;;  %v7101_v56 = vld [vmem:[#allocation5 + $0x25c] sm:$0xf]  ;;  %v4785_v30 = vor.u32 %v7037_v21, %v4782_v23 }
 0x2db   :  { %v5038_v26 = vld [vmem:[#allocation5 + $0x278] sm:$0xf0] }
 0x2dc   :  { %3998 = vmatpush.bf16.msra.mxu2 %v5361_v0  ;;  %v7165_v27 = vld [vmem:[#allocation5 + $0x45c] sm:$0xf]  ;;  %3973 = vmatpush.bf16.msra.mxu0 %v4817_v16  ;;  %v5041_v33 = vor.u32 %v7101_v56, %v5038_v26 }
 0x2dd   :  { %v5294_v28 = vld [vmem:[#allocation5 + $0x478] sm:$0xf0] }
 0x2de   :  { %4011 = vmatpush.bf16.msra.mxu3 %v5617_v10  ;;  %v7229_v29 = vld [vmem:[#allocation5 + $0x65c] sm:$0xf]  ;;  %3986 = vmatpush.bf16.msra.mxu1 %v5073_v19  ;;  %v5297_v34 = vor.u32 %v7165_v27, %v5294_v28 }
 0x2df   :  { %v5550_v7 = vld [vmem:[#allocation5 + $0x678] sm:$0xf0] }
 0x2e0   :  { %v7029_v31 = vld [vmem:[#allocation5 + $0x1c] sm:$0xf]  ;;  %3999 = vmatpush.bf16.msra.mxu2 %v5329_v20  ;;  %v5553_v38 = vor.u32 %v7229_v29, %v5550_v7  ;;  %3974 = vmatpush.bf16.msra.mxu0 %v4785_v30 }
 0x2e1   :  { %v4750_v32 = vld [vmem:[#allocation5 + $0x38] sm:$0xf0] }
 0x2e2   :  { %v7093_v35 = vld [vmem:[#allocation5 + $0x21c] sm:$0xf]  ;;  %4012 = vmatpush.bf16.msra.mxu3 %v5585_v25  ;;  %v4753_v48 = vor.u32 %v7029_v31, %v4750_v32  ;;  %3987 = vmatpush.bf16.msra.mxu1 %v5041_v33 }
 0x2e3   :  { %v5006_v49 = vld [vmem:[#allocation5 + $0x238] sm:$0xf0] }
 0x2e4   :  { %v7157_v36 = vld [vmem:[#allocation5 + $0x41c] sm:$0xf]  ;;  %4000 = vmatpush.bf16.msra.mxu2 %v5297_v34  ;;  %v5009_v61 = vor.u32 %v7093_v35, %v5006_v49  ;;  %3975 = vmatpush.bf16.msra.mxu0 %v4753_v48  ;;  %v669_v35 = vperm.slane %v7923_v22, 5  ;;  %v3782_v48 = vpop.f32.mrf.mxu1 }
 0x2e5   :  { %v5262_v50 = vld [vmem:[#allocation5 + $0x438] sm:$0xf0] }
 0x2e6   :  { %v7221_v39 = vld [vmem:[#allocation5 + $0x61c] sm:$0xf]  ;;  %v5265_v62 = vor.u32 %v7157_v36, %v5262_v50  ;;  %4013 = vmatpush.bf16.msra.mxu3 %v5553_v38  ;;  %3988 = vmatpush.bf16.msra.mxu1 %v5009_v61 }
 0x2e7   :  { %v5518_v40 = vld [vmem:[#allocation5 + $0x638] sm:$0xf0]  ;;  %3976 = vmatmul.bf16.vlgmr.msra.gmra.mxu0 %v7832_v47 }
 0x2e8   :  { %v7341_v42 = vld [vmem:[#allocation5 + $0x9dc] sm:$0xf]  ;;  %v5521_v4 = vor.u32 %v7221_v39, %v5518_v40  ;;  %4001 = vmatpush.bf16.msra.mxu2 %v5265_v62  ;;  %v3769_v39 = vpop.f32.mrf.mxu0 }
 0x2e9   :  { %v5998_v43 = vld [vmem:[#allocation5 + $0x9f8] sm:$0xf0]  ;;  %3989 = vmatmul.bf16.vlgmr.msra.gmra.mxu1 %v7836_v55 }
 0x2ea   :  { %v7405_v63 = vld [vmem:[#allocation5 + $0xbdc] sm:$0xf]  ;;  %v6001_v5 = vor.u32 %v7341_v42, %v5998_v43  ;;  %4014 = vmatpush.bf16.msra.mxu3 %v5521_v4 }
 0x2eb   :  { %v6254_v52 = vld [vmem:[#allocation5 + $0xbf8] sm:$0xf0]  ;;  %4002 = vmatmul.bf16.vlgmr.msra.gmra.mxu2 %v7830_v46 }
 0x2ec   :  { %v7469_v53 = vld [vmem:[#allocation5 + $0xddc] sm:$0xf]  ;;  %v6257_v6 = vor.u32 %v7405_v63, %v6254_v52  ;;  %4020 = vmatpush.bf16.msrb.mxu0 %v6001_v5  ;;  %v3770_v63 = vadd.f32 %v3769_v39, %v669_v35 }
 0x2ed   :  { %v6510_v60 = vld [vmem:[#allocation5 + $0xdf8] sm:$0xf0]  ;;  %4015 = vmatmul.bf16.vlgmr.msra.gmra.mxu3 %v7834_v51 }
 0x2ee   :  { %v7533_v0 = vld [vmem:[#allocation5 + $0xfdc] sm:$0xf]  ;;  %v6513_v10 = vor.u32 %v7469_v53, %v6510_v60  ;;  %4033 = vmatpush.bf16.msrb.mxu1 %v6257_v6 }
 0x2ef   :  { %v6766_v1 = vld [vmem:[#allocation5 + $0xff8] sm:$0xf0] }
 0x2f0   :  { %v7333_v8 = vld [vmem:[#allocation5 + $0x99c] sm:$0xf]  ;;  %v6769_v12 = vor.u32 %v7533_v0, %v6766_v1  ;;  %4046 = vmatpush.bf16.msrb.mxu2 %v6513_v10  ;;  %v3783_v1 = vadd.f32 %v3782_v48, %v3770_v63 }
 0x2f1   :  { %v5966_v9 = vld [vmem:[#allocation5 + $0x9b8] sm:$0xf0] }
 0x2f2   :  { %v7397_v11 = vld [vmem:[#allocation5 + $0xb9c] sm:$0xf]  ;;  %v5969_v19 = vor.u32 %v7333_v8, %v5966_v9  ;;  %4059 = vmatpush.bf16.msrb.mxu3 %v6769_v12 }
 0x2f3   :  { %v6222_v13 = vld [vmem:[#allocation5 + $0xbb8] sm:$0xf0] }
 0x2f4   :  { %v7461_v14 = vld [vmem:[#allocation5 + $0xd9c] sm:$0xf]  ;;  %v6225_v20 = vor.u32 %v7397_v11, %v6222_v13  ;;  %4021 = vmatpush.bf16.msrb.mxu0 %v5969_v19  ;;  %v3795_v11 = vpop.f32.mrf.mxu2 }
 0x2f5   :  { %v6478_v15 = vld [vmem:[#allocation5 + $0xdb8] sm:$0xf0] }
 0x2f6   :  { %v7525_v16 = vld [vmem:[#allocation5 + $0xf9c] sm:$0xf]  ;;  %v6481_v21 = vor.u32 %v7461_v14, %v6478_v15  ;;  %4034 = vmatpush.bf16.msrb.mxu1 %v6225_v20 }
 0x2f7   :  { %v6734_v18 = vld [vmem:[#allocation5 + $0xfb8] sm:$0xf0] }
 0x2f8   :  { %v7325_v23 = vld [vmem:[#allocation5 + $0x95c] sm:$0xf]  ;;  %v6737_v25 = vor.u32 %v7525_v16, %v6734_v18  ;;  %4047 = vmatpush.bf16.msrb.mxu2 %v6481_v21  ;;  %v3796_v16 = vadd.f32 %v3795_v11, %v3783_v1  ;;  %v3808_v18 = vpop.f32.mrf.mxu3  ;;  %v7542_v11 = vld [vmem:[#allocation8 + $0x20] sm:$0xff] }
 0x2f9   :  { %v5934_v56 = vld [vmem:[#allocation5 + $0x978] sm:$0xf0] }
 0x2fa   :  { %v7389_v24 = vld [vmem:[#allocation5 + $0xb5c] sm:$0xf]  ;;  %v5937_v30 = vor.u32 %v7325_v23, %v5934_v56  ;;  %4060 = vmatpush.bf16.msrb.mxu3 %v6737_v25  ;;  %v7940_v23 = vadd.f32 %v3808_v18, %v3796_v16  ;;  %v3771_v56 = vpop.f32.mrf.mxu0  ;;  %v7565_v18 = vld [vmem:[#allocation8 + $0xd8] sm:$0xff] }
 0x2fb   :  { %v6190_v26 = vld [vmem:[#allocation5 + $0xb78] sm:$0xf0] }
 0x2fc   :  { %v7453_v27 = vld [vmem:[#allocation5 + $0xd5c] sm:$0xf]  ;;  %v6193_v32 = vor.u32 %v7389_v24, %v6190_v26  ;;  %4022 = vmatpush.bf16.msrb.mxu0 %v5937_v30 }
 0x2fd   :  { %v6446_v28 = vld [vmem:[#allocation5 + $0xd78] sm:$0xf0] }
 0x2fe   :  { %v7517_v29 = vld [vmem:[#allocation5 + $0xf5c] sm:$0xf]  ;;  %v6449_v33 = vor.u32 %v7453_v27, %v6446_v28  ;;  %4035 = vmatpush.bf16.msrb.mxu1 %v6193_v32 }
 0x2ff   :  { %v6702_v7 = vld [vmem:[#allocation5 + $0xf78] sm:$0xf0] }
 0x300   :  { %v7317_v31 = vld [vmem:[#allocation5 + $0x91c] sm:$0xf]  ;;  %v6705_v49 = vor.u32 %v7517_v29, %v6702_v7  ;;  %4048 = vmatpush.bf16.msrb.mxu2 %v6449_v33  ;;  %v3784_v29 = vpop.f32.mrf.mxu1 }
 0x301   :  { %v5902_v34 = vld [vmem:[#allocation5 + $0x938] sm:$0xf0]  ;;  %v7555_v29 = vld [vmem:[#allocation8 + $0x88] sm:$0xff] }
 0x302   :  { %v7381_v46 = vld [vmem:[#allocation5 + $0xb1c] sm:$0xf]  ;;  %v5905_v50 = vor.u32 %v7317_v31, %v5902_v34  ;;  %4061 = vmatpush.bf16.msrb.mxu3 %v6705_v49 }
 0x303   :  { %v6158_v36 = vld [vmem:[#allocation5 + $0xb38] sm:$0xf0] }
 0x304   :  { %v7445_v37 = vld [vmem:[#allocation5 + $0xd1c] sm:$0xf]  ;;  %v6161_v55 = vor.u32 %v7381_v46, %v6158_v36  ;;  %4023 = vmatpush.bf16.msrb.mxu0 %v5905_v50 }
 0x305   :  { %v6414_v47 = vld [vmem:[#allocation5 + $0xd38] sm:$0xf0] }
 0x306   :  { %v7509_v38 = vld [vmem:[#allocation5 + $0xf1c] sm:$0xf]  ;;  %v6417_v40 = vor.u32 %v7445_v37, %v6414_v47  ;;  %4036 = vmatpush.bf16.msrb.mxu1 %v6161_v55 }
 0x307   :  { %v6670_v51 = vld [vmem:[#allocation5 + $0xf38] sm:$0xf0] }
 0x308   :  { %v7309_v41 = vld [vmem:[#allocation5 + $0x8dc] sm:$0xf]  ;;  %v6673_v52 = vor.u32 %v7509_v38, %v6670_v51  ;;  %4049 = vmatpush.bf16.msrb.mxu2 %v6417_v40  ;;  %v3797_v38 = vpop.f32.mrf.mxu2  ;;  %v3810_v40 = vpop.f32.mrf.mxu3 }
 0x309   :  { %v5870_v42 = vld [vmem:[#allocation5 + $0x8f8] sm:$0xf0]  ;;  %v4074_v38 = vpack.c.bf16 %v7903_v57, %v7903_v57  ;;  %v7591_v57 = vld [vmem:[#allocation8 + $0x1a8] sm:$0xff]  ;;  %v7574_v40 = vld [vmem:[#allocation8 + $0x120] sm:$0xff] }
 0x30a   :  { %v7373_v43 = vld [vmem:[#allocation5 + $0xadc] sm:$0xf]  ;;  %v5873_v4 = vor.u32 %v7309_v41, %v5870_v42  ;;  %4062 = vmatpush.bf16.msrb.mxu3 %v6673_v52 }
 0x30b   :  { %v6126_v53 = vld [vmem:[#allocation5 + $0xaf8] sm:$0xf0] }
 0x30c   :  { %v7437_v60 = vld [vmem:[#allocation5 + $0xcdc] sm:$0xf]  ;;  %v6129_v5 = vor.u32 %v7373_v43, %v6126_v53  ;;  %4024 = vmatpush.bf16.msrb.mxu0 %v5873_v4  ;;  %v7545_v53 = vld [vmem:[#allocation8 + $0x38] sm:$0xff] }
 0x30d   :  { %v6382_v61 = vld [vmem:[#allocation5 + $0xcf8] sm:$0xf0] }
 0x30e   :  { %v7501_v62 = vld [vmem:[#allocation5 + $0xedc] sm:$0xf]  ;;  %v6385_v6 = vor.u32 %v7437_v60, %v6382_v61  ;;  %4037 = vmatpush.bf16.msrb.mxu1 %v6129_v5  ;;  %v7553_v60 = vld [vmem:[#allocation8 + $0x78] sm:$0xff] }
 0x30f   :  { %v6638_v0 = vld [vmem:[#allocation5 + $0xef8] sm:$0xf0]  ;;  %v7561_v61 = vld [vmem:[#allocation8 + $0xb8] sm:$0xff] }
 0x310   :  { %v7301_v10 = vld [vmem:[#allocation5 + $0x89c] sm:$0xf]  ;;  %v6641_v12 = vor.u32 %v7501_v62, %v6638_v0  ;;  %4050 = vmatpush.bf16.msrb.mxu2 %v6385_v6  ;;  %v7569_v62 = vld [vmem:[#allocation8 + $0xf8] sm:$0xff]  ;;  %v7543_v6 = vld [vmem:[#allocation8 + $0x28] sm:$0xff]  ;;  %v7950_v16 = vpop.f32.mrf.mxu2 }
 0x311   :  { %v5838_v8 = vld [vmem:[#allocation5 + $0x8b8] sm:$0xf0] }
 0x312   :  { %v7365_v9 = vld [vmem:[#allocation5 + $0xa9c] sm:$0xf]  ;;  %v5841_v21 = vor.u32 %v7301_v10, %v5838_v8  ;;  %4063 = vmatpush.bf16.msrb.mxu3 %v6641_v12  ;;  %v7551_v10 = vld [vmem:[#allocation8 + $0x68] sm:$0xff]  ;;  %v7946_v12 = vpop.f32.mrf.mxu0 }
 0x313   :  { %v6094_v13 = vld [vmem:[#allocation5 + $0xab8] sm:$0xf0]  ;;  %v7559_v8 = vld [vmem:[#allocation8 + $0xa8] sm:$0xff] }
 0x314   :  { %v7429_v14 = vld [vmem:[#allocation5 + $0xc9c] sm:$0xf]  ;;  %v6097_v24 = vor.u32 %v7365_v9, %v6094_v13  ;;  %4025 = vmatpush.bf16.msrb.mxu0 %v5841_v21  ;;  %v7567_v9 = vld [vmem:[#allocation8 + $0xe8] sm:$0xff]  ;;  %v7948_v13 = vpop.f32.mrf.mxu1 }
 0x315   :  { %v6350_v15 = vld [vmem:[#allocation5 + $0xcb8] sm:$0xf0] }
 0x316   :  { %v7493_v19 = vld [vmem:[#allocation5 + $0xe9c] sm:$0xf]  ;;  %v6353_v25 = vor.u32 %v7429_v14, %v6350_v15  ;;  %4038 = vmatpush.bf16.msrb.mxu1 %v6097_v24  ;;  %v7549_v14 = vld [vmem:[#allocation8 + $0x58] sm:$0xff] }
 0x317   :  { %v6606_v20 = vld [vmem:[#allocation5 + $0xeb8] sm:$0xf0]  ;;  %v7557_v15 = vld [vmem:[#allocation8 + $0x98] sm:$0xff] }
 0x318   :  { %v7293_v26 = vld [vmem:[#allocation5 + $0x85c] sm:$0xf]  ;;  %v6609_v7 = vor.u32 %v7493_v19, %v6606_v20  ;;  %4051 = vmatpush.bf16.msrb.mxu2 %v6353_v25  ;;  %v7952_v19 = vpop.f32.mrf.mxu3 }
 0x319   :  { %v5806_v27 = vld [vmem:[#allocation5 + $0x878] sm:$0xf0] }
 0x31a   :  { %v7357_v28 = vld [vmem:[#allocation5 + $0xa5c] sm:$0xf]  ;;  %v5809_v46 = vor.u32 %v7293_v26, %v5806_v27  ;;  %4064 = vmatpush.bf16.msrb.mxu3 %v6609_v7  ;;  %v3823_v21 = vpop.f32.mrf.mxu0  ;;  %v7539_v27 = vld [vmem:[#allocation8 + $0x8] sm:$0xff]  ;;  %v3849_v7 = vpop.f32.mrf.mxu2 }
 0x31b   :  { %v6062_v30 = vld [vmem:[#allocation5 + $0xa78] sm:$0xf0] }
 0x31c   :  { %v7421_v31 = vld [vmem:[#allocation5 + $0xc5c] sm:$0xf]  ;;  %v6065_v35 = vor.u32 %v7357_v28, %v6062_v30  ;;  %4026 = vmatpush.bf16.msrb.mxu0 %v5809_v46  ;;  %v3836_v25 = vpop.f32.mrf.mxu1  ;;  %v7547_v28 = vld [vmem:[#allocation8 + $0x48] sm:$0xff]  ;;  %v7562_v46 = vld [vmem:[#allocation8 + $0xc0] sm:$0xff] }
 0x31d   :  { %v6318_v32 = vld [vmem:[#allocation5 + $0xc78] sm:$0xf0]  ;;  %v7563_v30 = vld [vmem:[#allocation8 + $0xc8] sm:$0xff] }
 0x31e   :  { %v7485_v33 = vld [vmem:[#allocation5 + $0xe5c] sm:$0xf]  ;;  %v6321_v49 = vor.u32 %v7421_v31, %v6318_v32  ;;  %4039 = vmatpush.bf16.msrb.mxu1 %v6065_v35  ;;  %v7538_v32 = vld [vmem:[#allocation8] sm:$0xff]  ;;  %v7577_v35 = vld [vmem:[#allocation8 + $0x138] sm:$0xff] }
 0x31f   :  { %v6574_v34 = vld [vmem:[#allocation5 + $0xe78] sm:$0xf0] }
 0x320   :  { %v7285_v36 = vld [vmem:[#allocation5 + $0x81c] sm:$0xf]  ;;  %v6577_v51 = vor.u32 %v7485_v33, %v6574_v34  ;;  %4052 = vmatpush.bf16.msrb.mxu2 %v6321_v49  ;;  %v3862_v31 = vpop.f32.mrf.mxu3  ;;  %v7546_v33 = vld [vmem:[#allocation8 + $0x40] sm:$0xff]  ;;  %v7585_v49 = vld [vmem:[#allocation8 + $0x178] sm:$0xff] }
 0x321   :  { %v5774_v37 = vld [vmem:[#allocation5 + $0x838] sm:$0xf0]  ;;  %v7554_v34 = vld [vmem:[#allocation8 + $0x80] sm:$0xff] }
 0x322   :  { %v7349_v47 = vld [vmem:[#allocation5 + $0xa1c] sm:$0xf]  ;;  %v5777_v43 = vor.u32 %v7285_v36, %v5774_v37  ;;  %4065 = vmatpush.bf16.msrb.mxu3 %v6577_v51  ;;  %v4072_v36 = vpack.c.bf16 %v7873_v3, %v7873_v3  ;;  %v7593_v37 = vld [vmem:[#allocation8 + $0x1b8] sm:$0xff] }
 0x323   :  { %v6030_v50 = vld [vmem:[#allocation5 + $0xa38] sm:$0xf0] }
 0x324   :  { %v7413_v39 = vld [vmem:[#allocation5 + $0xc1c] sm:$0xf]  ;;  %v6033_v63 = vor.u32 %v7349_v47, %v6030_v50  ;;  %4027 = vmatpush.bf16.msrb.mxu0 %v5777_v43  ;;  %v4073_v47 = vpack.c.bf16 %v7887_v45, %v7887_v45  ;;  %v4075_v50 = vpack.c.bf16 %v7917_v2, %v7917_v2  ;;  %v7583_v45 = vld [vmem:[#allocation8 + $0x168] sm:$0xff]  ;;  %v3886_v2 = vpop.f32.mrf.mxu1  ;;  %v7590_v43 = vld [vmem:[#allocation8 + $0x1a0] sm:$0xff] }
 0x325   :  { %v6286_v55 = vld [vmem:[#allocation5 + $0xc38] sm:$0xf0] }
 0x326   :  { %v7477_v41 = vld [vmem:[#allocation5 + $0xe1c] sm:$0xf]  ;;  %v6289_v48 = vor.u32 %v7413_v39, %v6286_v55  ;;  %4040 = vmatpush.bf16.msrb.mxu1 %v6033_v63  ;;  %v7575_v55 = vld [vmem:[#allocation8 + $0x128] sm:$0xff]  ;;  %v7573_v63 = vld [vmem:[#allocation8 + $0x118] sm:$0xff] }
 0x327   :  { %v6542_v42 = vld [vmem:[#allocation5 + $0xe38] sm:$0xf0]  ;;  %4028 = vmatmul.bf16.vlgmr.msrb.gmra.mxu0 %v7844_v54  ;;  %v7550_v54 = vld [vmem:[#allocation8 + $0x60] sm:$0xff] }
 0x328   :  { %v6545_v52 = vor.u32 %v7477_v41, %v6542_v42  ;;  %4053 = vmatpush.bf16.msrb.mxu2 %v6289_v48  ;;  %4596 = vmatpush.bf16.msra.mxu0 %v7545_v53  ;;  %v7544_v0 = vld [vmem:[#allocation8 + $0x30] sm:$0xff]  ;;  %v3873_v41 = vpop.f32.mrf.mxu0  ;;  %v7582_v42 = vld [vmem:[#allocation8 + $0x160] sm:$0xff]  ;;  %v7581_v48 = vld [vmem:[#allocation8 + $0x158] sm:$0xff]  ;;  %v3822_v53 = vadd.f32 %v7946_v12, %v7940_v23 }
 0x329   :  { %v7552_v1 = vld [vmem:[#allocation8 + $0x70] sm:$0xff]  ;;  %4041 = vmatmul.bf16.vlgmr.msrb.gmra.mxu1 %v7848_v59  ;;  %v7558_v59 = vld [vmem:[#allocation8 + $0xa0] sm:$0xff] }
 0x32a   :  { %4066 = vmatpush.bf16.msrb.mxu3 %v6545_v52  ;;  %4609 = vmatpush.bf16.msra.mxu1 %v7553_v60  ;;  %v7560_v4 = vld [vmem:[#allocation8 + $0xb0] sm:$0xff]  ;;  %v3899_v52 = vpop.f32.mrf.mxu2  ;;  %v3912_v60 = vpop.f32.mrf.mxu3 }
 0x32b   :  { %v7568_v5 = vld [vmem:[#allocation8 + $0xf0] sm:$0xff]  ;;  %4054 = vmatmul.bf16.vlgmr.msrb.gmra.mxu2 %v7842_v44  ;;  %v7566_v44 = vld [vmem:[#allocation8 + $0xe0] sm:$0xff] }
 0x32c   :  { %4622 = vmatpush.bf16.msra.mxu2 %v7561_v61  ;;  %4597 = vmatpush.bf16.msra.mxu0 %v7544_v0  ;;  %v7540_v20 = vld [vmem:[#allocation8 + $0x10] sm:$0xff]  ;;  %v7589_v61 = vld [vmem:[#allocation8 + $0x198] sm:$0xff] }
 0x32d   :  { %4067 = vmatmul.bf16.vlgmr.msrb.gmra.mxu3 %v7846_v58  ;;  %v7541_v58 = vld [vmem:[#allocation8 + $0x18] sm:$0xff]  ;;  %v7548_v56 = vld [vmem:[#allocation8 + $0x50] sm:$0xff] }
 0x32e   :  { %4635 = vmatpush.bf16.msra.mxu3 %v7569_v62  ;;  %4610 = vmatpush.bf16.msra.mxu1 %v7552_v1  ;;  %v7556_v24 = vld [vmem:[#allocation8 + $0x90] sm:$0xff] }
 0x32f   :  { %v7564_v26 = vld [vmem:[#allocation8 + $0xd0] sm:$0xff] }
 0x330   :  { %4623 = vmatpush.bf16.msra.mxu2 %v7560_v4  ;;  %4598 = vmatpush.bf16.msra.mxu0 %v7543_v6  ;;  %v7576_v51 = vld [vmem:[#allocation8 + $0x130] sm:$0xff]  ;;  %v3875_v0 = vpop.f32.mrf.mxu0  ;;  %v3888_v4 = vpop.f32.mrf.mxu1  ;;  %v670_v6 = vperm.slane %v7923_v22, 6 }
 0x331   :  { %v7584_v39 = vld [vmem:[#allocation8 + $0x170] sm:$0xff] }
 0x332   :  { %4636 = vmatpush.bf16.msra.mxu3 %v7568_v5  ;;  %4611 = vmatpush.bf16.msra.mxu1 %v7551_v10  ;;  %v7592_v3 = vld [vmem:[#allocation8 + $0x1b0] sm:$0xff]  ;;  %v3835_v5 = vadd.f32 %v7948_v13, %v3822_v53  ;;  %v3901_v23 = vpop.f32.mrf.mxu2  ;;  %v3914_v12 = vpop.f32.mrf.mxu3 }
 0x333   :  { %v7572_v62 = vld [vmem:[#allocation8 + $0x110] sm:$0xff] }
 0x334   :  { %4624 = vmatpush.bf16.msra.mxu2 %v7559_v8  ;;  %4599 = vmatpush.bf16.msra.mxu0 %v7542_v11  ;;  %v7580_v1 = vld [vmem:[#allocation8 + $0x150] sm:$0xff]  ;;  %v7571_v8 = vld [vmem:[#allocation8 + $0x108] sm:$0xff]  ;;  %v3848_v11 = vadd.f32 %v7950_v16, %v3835_v5 }
 0x335   :  { %v7588_v10 = vld [vmem:[#allocation8 + $0x190] sm:$0xff] }
 0x336   :  { %4637 = vmatpush.bf16.msra.mxu3 %v7567_v9  ;;  %4612 = vmatpush.bf16.msra.mxu1 %v7550_v54  ;;  %v7579_v9 = vld [vmem:[#allocation8 + $0x148] sm:$0xff]  ;;  %v3874_v54 = vadd.f32 %v3873_v41, %v670_v6  ;;  %v3861_v13 = vadd.f32 %v7952_v19, %v3848_v11 }
 0x338   :  { %4625 = vmatpush.bf16.msra.mxu2 %v7558_v59  ;;  %4600 = vmatpush.bf16.msra.mxu0 %v7541_v58  ;;  %v7587_v59 = vld [vmem:[#allocation8 + $0x188] sm:$0xff]  ;;  %v7578_v58 = vld [vmem:[#allocation8 + $0x140] sm:$0xff]  ;;  %v3887_v22 = vadd.f32 %v3886_v2, %v3874_v54 }
 0x33a   :  { %4638 = vmatpush.bf16.msra.mxu3 %v7566_v44  ;;  %4613 = vmatpush.bf16.msra.mxu1 %v7549_v14  ;;  %v7570_v44 = vld [vmem:[#allocation8 + $0x100] sm:$0xff]  ;;  %v3900_v16 = vadd.f32 %v3899_v52, %v3887_v22 }
 0x33b   :  { %v7586_v14 = vld [vmem:[#allocation8 + $0x180] sm:$0xff] }
 0x33c   :  { %4626 = vmatpush.bf16.msra.mxu2 %v7557_v15  ;;  %4601 = vmatpush.bf16.msra.mxu0 %v7540_v20  ;;  %v4076_v15 = vpack.c.bf16 %v7933_v17, %v7933_v17  ;;  %v3913_v20 = vadd.f32 %v3912_v60, %v3900_v16 }
 0x33e   :  { %4639 = vmatpush.bf16.msra.mxu3 %v7565_v18  ;;  %4614 = vmatpush.bf16.msra.mxu1 %v7548_v56  ;;  %v4077_v18 = vpack.c.bf16 %v3861_v13, %v3861_v13 }
 0x340   :  { %4627 = vmatpush.bf16.msra.mxu2 %v7556_v24  ;;  %4602 = vmatpush.bf16.msra.mxu0 %v7539_v27 }
 0x342   :  { %4640 = vmatpush.bf16.msra.mxu3 %v7564_v26  ;;  %4615 = vmatpush.bf16.msra.mxu1 %v7547_v28  ;;  %v7601_v26 = vld [vmem:[#allocation8 + $0x1f8] sm:$0xff] }
 0x344   :  { %4628 = vmatpush.bf16.msra.mxu2 %v7555_v29  ;;  %4603 = vmatpush.bf16.msra.mxu0 %v7538_v32  ;;  %v3925_v21 = vpop.f32.mrf.mxu0  ;;  %v7600_v29 = vld [vmem:[#allocation8 + $0x1f0] sm:$0xff]  ;;  %v7599_v32 = vld [vmem:[#allocation8 + $0x1e8] sm:$0xff] }
 0x345   :  { %v3926_v56 = vadd.f32 %v3925_v21, %v3913_v20 }
 0x346   :  { %4641 = vmatpush.bf16.msra.mxu3 %v7563_v30  ;;  %4616 = vmatpush.bf16.msra.mxu1 %v7546_v33  ;;  %v3938_v24 = vpop.f32.mrf.mxu1 }
 0x347   :  { %4604 = vmatmul.bf16.vlgmr.msra.gmra.mxu0 %v4072_v36  ;;  %v3939_v25 = vadd.f32 %v3938_v24, %v3926_v56 }
 0x348   :  { %4629 = vmatpush.bf16.msra.mxu2 %v7554_v34  ;;  %4648 = vmatpush.bf16.msrb.mxu0 %v7577_v35  ;;  %v7597_v35 = vld [vmem:[#allocation8 + $0x1d8] sm:$0xff] }
 0x349   :  { %4617 = vmatmul.bf16.vlgmr.msra.gmra.mxu1 %v4073_v47  ;;  %v7595_v47 = vld [vmem:[#allocation8 + $0x1c8] sm:$0xff] }
 0x34a   :  { %4642 = vmatpush.bf16.msra.mxu3 %v7562_v46  ;;  %4661 = vmatpush.bf16.msrb.mxu1 %v7585_v49  ;;  %v7598_v46 = vld [vmem:[#allocation8 + $0x1e0] sm:$0xff]  ;;  %v7596_v49 = vld [vmem:[#allocation8 + $0x1d0] sm:$0xff] }
 0x34b   :  { %4630 = vmatmul.bf16.vlgmr.msra.gmra.mxu2 %v4074_v38 }
 0x34c   :  { %4674 = vmatpush.bf16.msrb.mxu2 %v7593_v37  ;;  %4649 = vmatpush.bf16.msrb.mxu0 %v7576_v51  ;;  %v3927_v30 = vpop.f32.mrf.mxu0 }
 0x34d   :  { %4643 = vmatmul.bf16.vlgmr.msra.gmra.mxu3 %v4075_v50  ;;  %v7594_v50 = vld [vmem:[#allocation8 + $0x1c0] sm:$0xff] }
 0x34e   :  { %4662 = vmatpush.bf16.msrb.mxu1 %v7584_v39  ;;  %v3951_v19 = vpop.f32.mrf.mxu2  ;;  %4687 = vmatpush.bf16.msrb.mxu3 %v7601_v26  ;;  %v3940_v17 = vpop.f32.mrf.mxu1 }
 0x34f   :  { %v3952_v27 = vadd.f32 %v3951_v19, %v3939_v25 }
 0x350   :  { %4675 = vmatpush.bf16.msrb.mxu2 %v7592_v3  ;;  %4650 = vmatpush.bf16.msrb.mxu0 %v7575_v55  ;;  %v3964_v28 = vpop.f32.mrf.mxu3  ;;  %v7618_v55 = vld [vmem:[#allocation7] sm:$0xff] }
 0x351   :  { %v3965_v7 = vadd.f32 %v3964_v28, %v3952_v27 }
 0x352   :  { %4663 = vmatpush.bf16.msrb.mxu1 %v7583_v45  ;;  %4688 = vmatpush.bf16.msrb.mxu3 %v7600_v29  ;;  %v671_v45 = vperm.slane %v7618_v55, 7 }
 0x353   :  { %v4078_v31 = vpack.c.bf16 %v3965_v7, %v3965_v7 }
 0x354   :  { %4676 = vmatpush.bf16.msrb.mxu2 %v7591_v57  ;;  %4651 = vmatpush.bf16.msrb.mxu0 %v7574_v40 }
 0x356   :  { %4664 = vmatpush.bf16.msrb.mxu1 %v7582_v42  ;;  %v3953_v33 = vpop.f32.mrf.mxu2  ;;  %4689 = vmatpush.bf16.msrb.mxu3 %v7599_v32 }
 0x358   :  { %4677 = vmatpush.bf16.msrb.mxu2 %v7590_v43  ;;  %4652 = vmatpush.bf16.msrb.mxu0 %v7573_v63  ;;  %v3966_v34 = vpop.f32.mrf.mxu3 }
 0x35a   :  { %4665 = vmatpush.bf16.msrb.mxu1 %v7581_v48  ;;  %4690 = vmatpush.bf16.msrb.mxu3 %v7598_v46 }
 0x35c   :  { %4678 = vmatpush.bf16.msrb.mxu2 %v7589_v61  ;;  %4653 = vmatpush.bf16.msrb.mxu0 %v7572_v62 }
 0x35e   :  { %4666 = vmatpush.bf16.msrb.mxu1 %v7580_v1  ;;  %4691 = vmatpush.bf16.msrb.mxu3 %v7597_v35 }
 0x360   :  { %4679 = vmatpush.bf16.msrb.mxu2 %v7588_v10  ;;  %4654 = vmatpush.bf16.msrb.mxu0 %v7571_v8  ;;  %v7615_v8 = vld [vmem:[#allocation10] ss:$0 sm:$0xff] }
 0x362   :  { %4667 = vmatpush.bf16.msrb.mxu1 %v7579_v9  ;;  %4692 = vmatpush.bf16.msrb.mxu3 %v7596_v49 }
 0x364   :  { %4680 = vmatpush.bf16.msrb.mxu2 %v7587_v59  ;;  %4655 = vmatpush.bf16.msrb.mxu0 %v7570_v44  ;;  %v3977_v36 = vpop.f32.mrf.mxu0 }
 0x365   :  { %v3978_v41 = vadd.f32 %v3977_v36, %v671_v45 }
 0x366   :  { %4668 = vmatpush.bf16.msrb.mxu1 %v7578_v58  ;;  %v3990_v37 = vpop.f32.mrf.mxu1  ;;  %4693 = vmatpush.bf16.msrb.mxu3 %v7595_v47 }
 0x367   :  { %4656 = vmatmul.bf16.vlgmr.msrb.gmra.mxu0 %v4076_v15  ;;  %v3991_v42 = vadd.f32 %v3990_v37, %v3978_v41 }
 0x368   :  { %4681 = vmatpush.bf16.msrb.mxu2 %v7586_v14 }
 0x369   :  { %4669 = vmatmul.bf16.vlgmr.msrb.gmra.mxu1 %v4077_v18 }
 0x36a   :  { %4694 = vmatpush.bf16.msrb.mxu3 %v7594_v50 }
 0x36b   :  { %4682 = vmatmul.bf16.vlgmr.msrb.gmra.mxu2 %v4078_v31 }
 0x36c   :  { %v3979_v39 = vpop.f32.mrf.mxu0 }
 0x36e   :  { %v4003_v38 = vpop.f32.mrf.mxu2  ;;  %v3992_v3 = vpop.f32.mrf.mxu1 }
 0x36f   :  { %v4004_v2 = vadd.f32 %v4003_v38, %v3991_v42 }
 0x370   :  { %v4016_v51 = vpop.f32.mrf.mxu3 }
 0x371   :  { %v4017_v43 = vadd.f32 %v4016_v51, %v4004_v2 }
 0x376   :  { %v4005_v57 = vpop.f32.mrf.mxu2 }
 0x378   :  { %v4018_v40 = vpop.f32.mrf.mxu3 }
 0x3a4   :  { %v4029_v63 = vpop.f32.mrf.mxu0 }
 0x3a5   :  { %v4030_v52 = vadd.f32 %v4029_v63, %v4017_v43 }
 0x3a6   :  { %v4042_v48 = vpop.f32.mrf.mxu1 }
 0x3a7   :  { %v4043_v53 = vadd.f32 %v4042_v48, %v4030_v52 }
 0x3ac   :  { %v4031_v0 = vpop.f32.mrf.mxu0 }
 0x3ae   :  { %v4055_v60 = vpop.f32.mrf.mxu2  ;;  %v4044_v1 = vpop.f32.mrf.mxu1 }
 0x3af   :  { %v4056_v61 = vadd.f32 %v4055_v60, %v4043_v53 }
 0x3b0   :  { %v4068_v62 = vpop.f32.mrf.mxu3 }
 0x3b1   :  { %v4069_v4 = vadd.f32 %v4068_v62, %v4056_v61 }
 0x3b3   :  { %v4079_v5 = vpack.c.bf16 %v4069_v4, %v4069_v4 }
 0x3b5   :  { %4695 = vmatmul.bf16.vlgmr.msrb.gmra.mxu3 %v4079_v5 }
 0x3b6   :  { %v4057_v6 = vpop.f32.mrf.mxu2 }
 0x3b8   :  { %v4070_v10 = vpop.f32.mrf.mxu3 }
 0x3c4   :  { %v4605_v9 = vpop.f32.mrf.mxu0 }
 0x3c5   :  { %v4606_v23 = vadd.f32 %v7615_v8, %v4605_v9 }
 0x3c6   :  { %v4618_v11 = vpop.f32.mrf.mxu1 }
 0x3c7   :  { %v4619_v12 = vadd.f32 %v4618_v11, %v4606_v23 }
 0x3cc   :  { %v4607_v58 = vpop.f32.mrf.mxu0 }
 0x3ce   :  { %v4631_v54 = vpop.f32.mrf.mxu2  ;;  %v4620_v13 = vpop.f32.mrf.mxu1 }
 0x3cf   :  { %v4632_v59 = vadd.f32 %v4631_v54, %v4619_v12 }
 0x3d0   :  { %v4644_v44 = vpop.f32.mrf.mxu3 }
 0x3d1   :  { %v4645_v22 = vadd.f32 %v4644_v44, %v4632_v59 }
 0x3d6   :  { %v4633_v14 = vpop.f32.mrf.mxu2 }
 0x3d8   :  { %v4646_v15 = vpop.f32.mrf.mxu3 }
 0x3e4   :  { %v4657_v18 = vpop.f32.mrf.mxu0 }
 0x3e5   :  { %v4658_v16 = vadd.f32 %v4657_v18, %v4645_v22 }
 0x3e6   :  { %v4670_v20 = vpop.f32.mrf.mxu1 }
 0x3e7   :  { %v4671_v21 = vadd.f32 %v4670_v20, %v4658_v16 }
 0x3ec   :  { %v4659_v56 = vpop.f32.mrf.mxu0 }
 0x3ee   :  { %v4672_v24 = vpop.f32.mrf.mxu1  ;;  %v4683_v25 = vpop.f32.mrf.mxu2 }
 0x3ef   :  { %v4684_v19 = vadd.f32 %v4683_v25, %v4671_v21 }
 0x3f6   :  { %v4685_v26 = vpop.f32.mrf.mxu2 }
 0x438   :  { %v4696_v27 = vpop.f32.mrf.mxu3 }
 0x439   :  { %v4697_v28 = vadd.f32 %v4696_v27, %v4684_v19 }
 0x43b   :  { %4700 = vst [vmem:[#allocation11] sm:$0xff] %v4697_v28 }
 0x440   :  { %v4698_v29 = vpop.f32.mrf.mxu3 }
 0x441   :  { %4704 = vsyncadd [#allocation4], 96  ;;  %s4707_s21 = sshll.u32 %s7980_s5, 4  ;;  %s7782_s22 = smov [#allocation11]   ;;  %s4708_s21 = int_to_ptr.hbm [resolvable:$true] %s4707_s21 }
 0x442   :  { %s4705_s23 = sshll.u32 %s7782_s22, 4  ;;  %s7783_s24 = smov 2   ;;  %s4706_s23 = int_to_ptr.vmem [resolvable:$true] %s4705_s23 }
 0x443   :  { %4713 = dma.vmem_to_hbm [thread:$0]  %s4706_s23, 32, %s4708_s21, [#allocation4], %s7773_s27, %s7773_s27, %s7783_s24  }
 0x444   :  { %7769 = dma.done.wait [#allocation4], 128  }
 0x445   :  { %7770 = vsyncadd [#allocation4], 4294967168 }
 0x446   :  { %4718 = vsyncpa [#allocation3], 1 }
 0x447   :  { %4719 = vsyncpa [#allocation6], 1 }
 0x448   :  { %4720 = vsyncpa [#allocation9], 1 }
 0x449   :  { %4721 = vsyncpa [#allocation4], 1 }

</bundles_post_ra>
